<compile_context>
chip_gen: v6e
topology: v6e:2x2x1
jax: 0.10.0
libtpu: 0.0.40
codegen_flags: <defaults>
</compile_context>

<pallas_src>
import jax
import jax.numpy as jnp
from jax import lax
from jax.experimental import pallas as pl
from jax.experimental.pallas import tpu as pltpu

# ---- module hyper-parameters (small, consistent with the PyTorch module) ----
D_MODEL = 32          # d_model
NHEAD = 4             # nhead
PROJ_LEN = 8          # proj_len (proj_dim)
MIDDLE = 24           # fixed middle_dim in the module
SEQ_LEN = 16          # len (sequence length of x)
BATCH = 2             # bsz

HEAD_DIM = MIDDLE // NHEAD         # 6
HEAD_DIM_V = D_MODEL // NHEAD      # 8
QL_DIM = PROJ_LEN * NHEAD          # 32
SCALING = HEAD_DIM ** (-0.5)
PSCALING = HEAD_DIM ** (-0.5)
LN_EPS = 1e-5
NEG_INF = -1e30                    # finite "-inf": fully-masked rows stay NaN-free

# Column offsets inside the fused projection results.
S1_PV = MIDDLE                     # 24
S1_QL = MIDDLE + D_MODEL           # 56
S1_END = S1_QL + QL_DIM            # 88
S2_V = MIDDLE                      # 24
S2_Q = MIDDLE + D_MODEL            # 56
S2_END = S2_Q + MIDDLE             # 80


def _softmax_last(x):
    m = jnp.max(x, axis=-1, keepdims=True)
    e = jnp.exp(x - m)
    return e * pl.reciprocal(jnp.sum(e, axis=-1, keepdims=True), approx=True)


def dba_attention_kernel(x_ref, px_ref, maskf_ref, w_ref, b_ref, out_ref, pc_ref):
    # Parameter slabs (weights DMA'd once; bias slab is exactly one vreg).
    b = b_ref[...]                         # (8, 128)
    w1 = w_ref[0]                          # (D, 128)  stage-1 fused  [Wpk|Wpv|Wql|0]
    w2 = w_ref[1]                          # (D, 128)  stage-2 fused  [Wk |Wv |Wq*s|0]
    wpq = w_ref[2]                         # (D, 128)  Wpq * pscaling
    wout = w_ref[3][:, :D_MODEL]           # (D, D)

    b1 = b[0:1, :]
    b2 = b[1:2, :]
    bpq = b[2:3, :]
    bout = b[3:4, :D_MODEL]
    gamma = b[4:5, :D_MODEL]
    beta = b[5:6, :D_MODEL]

    maskf = maskf_ref[...]                 # (B, L)  1.0 where masked, else 0.0

    out_cols = []
    pc_cols = []
    for bi in range(BATCH):
        c0, c1 = bi * D_MODEL, (bi + 1) * D_MODEL
        x = x_ref[:, c0:c1]                # (L, D)  batch bi (static lane slice)
        px = px_ref[:, c0:c1]              # (P, D)

        # Additive key-padding mask, hoisted once per batch (shared by all heads).
        maskadd = maskf[bi:bi + 1, :] * NEG_INF                    # (1, L)
        mask_pl = jnp.broadcast_to(maskadd, (PROJ_LEN, SEQ_LEN))   # (P, L)

        # ---------- stage 1: fused projections of x and px ----------
        xw = jnp.dot(x, w1, preferred_element_type=jnp.float32) + b1      # (L, 128)
        pk = xw[:, :MIDDLE]                 # (L, 24)
        pv = xw[:, S1_PV:S1_QL]             # (L, 32)
        qlen = xw[:, S1_QL:S1_END]          # (L, 32)

        pqw = jnp.dot(px, wpq, preferred_element_type=jnp.float32) + bpq  # (P, 128)
        pq = pqw[:, :MIDDLE]                # (P, 24), pscaling already folded in

        # ---------- stage 1 attention: px attends to x (heads in registers) ----------
        pc_heads = []
        for h in range(NHEAD):
            pq_h = pq[:, h * HEAD_DIM:(h + 1) * HEAD_DIM]          # (P, 6)
            pk_h = pk[:, h * HEAD_DIM:(h + 1) * HEAD_DIM]          # (L, 6)
            pv_h = pv[:, h * HEAD_DIM_V:(h + 1) * HEAD_DIM_V]      # (L, 8)
            s = lax.dot_general(pq_h, pk_h, (((1,), (1,)), ((), ())),
                                preferred_element_type=jnp.float32)        # (P, L)
            p = _softmax_last(s + mask_pl)
            pc_heads.append(jnp.dot(p, pv_h, preferred_element_type=jnp.float32))  # (P, 8)
        pc = jnp.concatenate(pc_heads, axis=-1)     # (P, D)
        pc_cols.append(pc)

        # ---------- stage 2: fused projections of pc ----------
        pcw = jnp.dot(pc, w2, preferred_element_type=jnp.float32) + b2    # (P, 128)
        k = pcw[:, :MIDDLE]                 # (P, 24)
        v = pcw[:, S2_V:S2_Q]               # (P, 32)
        q = pcw[:, S2_Q:S2_END]             # (P, 24), scaling already folded in

        # ---------- stage 2: self-attention over pc ----------
        attn_heads = []
        for h in range(NHEAD):
            q_h = q[:, h * HEAD_DIM:(h + 1) * HEAD_DIM]            # (P, 6)
            k_h = k[:, h * HEAD_DIM:(h + 1) * HEAD_DIM]            # (P, 6)
            v_h = v[:, h * HEAD_DIM_V:(h + 1) * HEAD_DIM_V]        # (P, 8)
            s = lax.dot_general(q_h, k_h, (((1,), (1,)), ((), ())),
                                preferred_element_type=jnp.float32)        # (P, P)
            p = _softmax_last(s)
            attn_heads.append(jnp.dot(p, v_h, preferred_element_type=jnp.float32))  # (P, 8)
        a = jnp.concatenate(attn_heads, axis=-1)    # (P, D)

        # ---------- LayerNorm over d_model ----------
        mu = jnp.mean(a, axis=-1, keepdims=True)
        var = jnp.mean((a - mu) ** 2, axis=-1, keepdims=True)
        a_ln = (a - mu) * lax.rsqrt(var + LN_EPS)
        a_ln = a_ln * gamma + beta                                  # (P, D)

        # ---------- stage 3: q_len attention back to length L ----------
        out_heads = []
        for h in range(NHEAD):
            ql_h = _softmax_last(qlen[:, h * PROJ_LEN:(h + 1) * PROJ_LEN])   # (L, P)
            a_h = a_ln[:, h * HEAD_DIM_V:(h + 1) * HEAD_DIM_V]               # (P, 8)
            out_heads.append(jnp.dot(ql_h, a_h, preferred_element_type=jnp.float32))  # (L, 8)
        preout = jnp.concatenate(out_heads, axis=-1)   # (L, D)

        # ---------- output projection ----------
        out_cols.append(jnp.dot(preout, wout, preferred_element_type=jnp.float32)
                        + bout)                         # (L, D)

    # One lane-dense store per output (both batches concatenated along lanes).
    out_ref[...] = jnp.concatenate(out_cols, axis=-1)   # (L, B*D)
    pc_ref[...] = jnp.concatenate(pc_cols, axis=-1)     # (P, B*D)


def init_params(key, d_model=D_MODEL, nhead=NHEAD, proj_len=PROJ_LEN, middle=MIDDLE):
    """Deterministic PyTorch-Linear-style init. Weights stored as (in, out)."""
    def linear(k, fan_in, fan_out):
        bound = 1.0 / (fan_in ** 0.5)
        kw, kb = jax.random.split(k)
        w = jax.random.uniform(kw, (fan_in, fan_out), jnp.float32, -bound, bound)
        b = jax.random.uniform(kb, (1, fan_out), jnp.float32, -bound, bound)
        return w, b

    ks = jax.random.split(key, 8)
    wpq, bpq = linear(ks[0], d_model, middle)
    wq, bq = linear(ks[1], d_model, middle)
    wql, bql = linear(ks[2], d_model, proj_len * nhead)
    wpk, bpk = linear(ks[3], d_model, middle)
    wpv, bpv = linear(ks[4], d_model, d_model)
    wk, bk = linear(ks[5], d_model, middle)
    wv, bv = linear(ks[6], d_model, d_model)
    wout, bout = linear(ks[7], d_model, d_model)
    gamma = jnp.ones((1, d_model), jnp.float32)
    beta = jnp.zeros((1, d_model), jnp.float32)
    return (wpq, bpq, wq, bq, wql, bql, wpk, bpk, wpv, bpv,
            wk, bk, wv, bv, wout, bout, gamma, beta)


def pack_params(params):
    """Pack all 18 parameter tensors into two lane-dense arrays:
       w_packed (4, D, 128) and b_packed (8, 128). Attention scalings folded in."""
    (wpq, bpq, wq, bq, wql, bql, wpk, bpk, wpv, bpv,
     wk, bk, wv, bv, wout, bout, gamma, beta) = params

    # Fold the (compile-time constant) attention scalings into q / pq projections.
    wq_s, bq_s = wq * SCALING, bq * SCALING
    wpq_s, bpq_s = wpq * PSCALING, bpq * PSCALING

    def pad_cols(a, n=128):
        return jnp.pad(a, ((0, 0), (0, n - a.shape[1])))

    w1 = jnp.concatenate([wpk, wpv, wql], axis=1)     # (D, 88)  stage-1 fused (input x)
    w2 = jnp.concatenate([wk, wv, wq_s], axis=1)      # (D, 80)  stage-2 fused (input pc)
    w_packed = jnp.stack(
        [pad_cols(w1), pad_cols(w2), pad_cols(wpq_s), pad_cols(wout)],
        axis=0).astype(jnp.float32)                   # (4, D, 128)

    b1 = jnp.concatenate([bpk, bpv, bql], axis=1)     # (1, 88)
    b2 = jnp.concatenate([bk, bv, bq_s], axis=1)      # (1, 80)
    b_packed = jnp.concatenate(
        [pad_cols(b1), pad_cols(b2), pad_cols(bpq_s), pad_cols(bout),
         pad_cols(gamma), pad_cols(beta), jnp.zeros((2, 128), jnp.float32)],
        axis=0).astype(jnp.float32)                   # (8, 128)
    return w_packed, b_packed


def dba_attention_forward(x, px, mask, w_packed, b_packed):
    """x: (L, B, D) seq-first, px: (P, B, D), mask: (B, L) bool (True = masked).

    Returns (attn (L, B, D), pc (P, B, D)).  The wrapper does no transposes: the
    seq-first tensors are viewed as (rows, B*D) for free, and the kernel writes its
    outputs in the same layout.
    """
    L, B, D = x.shape
    P = px.shape[0]

    x2d = x.reshape(L, B * D).astype(jnp.float32)     # free row-major view
    px2d = px.reshape(P, B * D).astype(jnp.float32)   # free row-major view
    maskf = mask.astype(jnp.float32)                  # (B, L), 1.0 = masked

    out2d, pc2d = pl.pallas_call(
        dba_attention_kernel,
        out_shape=[
            jax.ShapeDtypeStruct((L, B * D), jnp.float32),
            jax.ShapeDtypeStruct((P, B * D), jnp.float32),
        ],
        grid_spec=pltpu.PrefetchScalarGridSpec(
            num_scalar_prefetch=0,
            grid=(1,),
            in_specs=[
                pl.BlockSpec((L, B * D), lambda i: (0, 0)),
                pl.BlockSpec((P, B * D), lambda i: (0, 0)),
                pl.BlockSpec((B, L), lambda i: (0, 0)),
                pl.BlockSpec((4, D, 128), lambda i: (0, 0, 0)),   # packed weights
                pl.BlockSpec((8, 128), lambda i: (0, 0)),         # packed biases/LN params
            ],
            out_specs=[
                pl.BlockSpec((L, B * D), lambda i: (0, 0)),
                pl.BlockSpec((P, B * D), lambda i: (0, 0)),
            ],
        ),
        compiler_params=pltpu.CompilerParams(
            dimension_semantics=("arbitrary",)),
    )(x2d, px2d, maskf, w_packed, b_packed)

    attn = out2d.reshape(L, B, D)   # free reshape
    pc = pc2d.reshape(P, B, D)      # free reshape
    return attn, pc


if __name__ == "__main__":
    key = jax.random.PRNGKey(0)
    kx, kpx, kp = jax.random.split(key, 3)

    x = jax.random.normal(kx, (SEQ_LEN, BATCH, D_MODEL), jnp.float32)        # (L, B, D)
    px = jax.random.normal(kpx, (PROJ_LEN, BATCH, D_MODEL), jnp.float32)     # (P, B, D)
    # key_padding mask: batch 0 fully valid, batch 1 has last 4 positions masked
    valid_lens = jnp.array([SEQ_LEN, SEQ_LEN - 4], jnp.int32)
    mask = jnp.arange(SEQ_LEN)[None, :] >= valid_lens[:, None]               # (B, L) bool

    params = init_params(kp)
    w_packed, b_packed = pack_params(params)

    attn, pc = jax.jit(dba_attention_forward)(x, px, mask, w_packed, b_packed)
    jax.block_until_ready((attn, pc))

    assert attn.shape == (SEQ_LEN, BATCH, D_MODEL)
    assert pc.shape == (PROJ_LEN, BATCH, D_MODEL)
    assert bool(jnp.all(jnp.isfinite(attn))) and bool(jnp.all(jnp.isfinite(pc)))
    print("KERNEL_OK")
</pallas_src>

<mosaic_0001>
module attributes {stable_mosaic.version = 11 : i64} {
  func.func @dba_attention_kernel(%arg0: i32, %arg1: memref<16x64xf32, #tpu.memory_space<vmem>>, %arg2: memref<8x64xf32, #tpu.memory_space<vmem>>, %arg3: memref<2x16xf32, #tpu.memory_space<vmem>>, %arg4: memref<4x32x128xf32, #tpu.memory_space<vmem>>, %arg5: memref<8x128xf32, #tpu.memory_space<vmem>>, %arg6: memref<16x64xf32, #tpu.memory_space<vmem>>, %arg7: memref<8x64xf32, #tpu.memory_space<vmem>>) attributes {dimension_semantics = [#tpu.dimension_semantics<arbitrary>], iteration_bounds = array<i64: 1>, scalar_prefetch = 0 : i64, scratch_operands = 0 : i64, tpu.core_type = #tpu.core_type<tc>, window_params = [{pipeline_mode = #tpu.pipeline_mode<synchronous>, transform_indices = @transform_0, window_bounds = array<i64: 16, 64>}, {pipeline_mode = #tpu.pipeline_mode<synchronous>, transform_indices = @transform_1, window_bounds = array<i64: 8, 64>}, {pipeline_mode = #tpu.pipeline_mode<synchronous>, transform_indices = @transform_2, window_bounds = array<i64: 2, 16>}, {pipeline_mode = #tpu.pipeline_mode<synchronous>, transform_indices = @transform_3, window_bounds = array<i64: 4, 32, 128>}, {pipeline_mode = #tpu.pipeline_mode<synchronous>, transform_indices = @transform_4, window_bounds = array<i64: 8, 128>}, {pipeline_mode = #tpu.pipeline_mode<synchronous>, transform_indices = @transform_5, window_bounds = array<i64: 16, 64>}, {pipeline_mode = #tpu.pipeline_mode<synchronous>, transform_indices = @transform_6, window_bounds = array<i64: 8, 64>}]} {
    %c0 = arith.constant 0 : index
    %c0_0 = arith.constant 0 : index
    %0 = vector.load %arg5[%c0, %c0_0] : memref<8x128xf32, #tpu.memory_space<vmem>>, vector<8x128xf32>
    %c0_1 = arith.constant 0 : index
    %c0_2 = arith.constant 0 : index
    %c0_3 = arith.constant 0 : index
    %1 = vector.load %arg4[%c0_1, %c0_2, %c0_3] : memref<4x32x128xf32, #tpu.memory_space<vmem>>, vector<1x32x128xf32>
    %2 = vector.shape_cast %1 : vector<1x32x128xf32> to vector<32x128xf32>
    %c1 = arith.constant 1 : index
    %c0_4 = arith.constant 0 : index
    %c0_5 = arith.constant 0 : index
    %3 = vector.load %arg4[%c1, %c0_4, %c0_5] : memref<4x32x128xf32, #tpu.memory_space<vmem>>, vector<1x32x128xf32>
    %4 = vector.shape_cast %3 : vector<1x32x128xf32> to vector<32x128xf32>
    %c2 = arith.constant 2 : index
    %c0_6 = arith.constant 0 : index
    %c0_7 = arith.constant 0 : index
    %5 = vector.load %arg4[%c2, %c0_6, %c0_7] : memref<4x32x128xf32, #tpu.memory_space<vmem>>, vector<1x32x128xf32>
    %6 = vector.shape_cast %5 : vector<1x32x128xf32> to vector<32x128xf32>
    %c3 = arith.constant 3 : index
    %c0_8 = arith.constant 0 : index
    %c0_9 = arith.constant 0 : index
    %7 = vector.load %arg4[%c3, %c0_8, %c0_9] : memref<4x32x128xf32, #tpu.memory_space<vmem>>, vector<1x32x128xf32>
    %8 = vector.shape_cast %7 : vector<1x32x128xf32> to vector<32x128xf32>
    %9 = vector.extract_strided_slice %8 {offsets = [0, 0], sizes = [32, 32], strides = [1, 1]} : vector<32x128xf32> to vector<32x32xf32>
    %10 = vector.extract_strided_slice %0 {offsets = [0, 0], sizes = [1, 128], strides = [1, 1]} : vector<8x128xf32> to vector<1x128xf32>
    %11 = vector.extract_strided_slice %0 {offsets = [1, 0], sizes = [1, 128], strides = [1, 1]} : vector<8x128xf32> to vector<1x128xf32>
    %12 = vector.extract_strided_slice %0 {offsets = [2, 0], sizes = [1, 128], strides = [1, 1]} : vector<8x128xf32> to vector<1x128xf32>
    %13 = vector.extract_strided_slice %0 {offsets = [3, 0], sizes = [1, 32], strides = [1, 1]} : vector<8x128xf32> to vector<1x32xf32>
    %14 = vector.extract_strided_slice %0 {offsets = [4, 0], sizes = [1, 32], strides = [1, 1]} : vector<8x128xf32> to vector<1x32xf32>
    %15 = vector.extract_strided_slice %0 {offsets = [5, 0], sizes = [1, 32], strides = [1, 1]} : vector<8x128xf32> to vector<1x32xf32>
    %c0_10 = arith.constant 0 : index
    %c0_11 = arith.constant 0 : index
    %16 = vector.load %arg3[%c0_10, %c0_11] : memref<2x16xf32, #tpu.memory_space<vmem>>, vector<2x16xf32>
    %c0_12 = arith.constant 0 : index
    %c0_13 = arith.constant 0 : index
    %17 = vector.load %arg1[%c0_12, %c0_13] : memref<16x64xf32, #tpu.memory_space<vmem>>, vector<16x32xf32>
    %c0_14 = arith.constant 0 : index
    %c0_15 = arith.constant 0 : index
    %18 = vector.load %arg2[%c0_14, %c0_15] : memref<8x64xf32, #tpu.memory_space<vmem>>, vector<8x32xf32>
    %19 = vector.extract_strided_slice %16 {offsets = [0, 0], sizes = [1, 16], strides = [1, 1]} : vector<2x16xf32> to vector<1x16xf32>
    %cst = arith.constant -1.000000e+30 : f32
    %20 = vector.broadcast %cst : f32 to vector<1x16xf32>
    %21 = arith.mulf %19, %20 : vector<1x16xf32>
    %22 = vector.shape_cast %21 : vector<1x16xf32> to vector<1x16xf32>
    %23 = vector.broadcast %22 : vector<1x16xf32> to vector<8x16xf32>
    %cst_16 = arith.constant dense<0.000000e+00> : vector<16x128xf32>
    %24 = tpu.matmul %17, %2, %cst_16 {dimension_numbers = #tpu.dot_dimension_numbers<[1], [0], [0], [1], [0, 0, 1, 1], [], []>} : vector<16x32xf32>, vector<32x128xf32>, vector<16x128xf32> -> vector<16x128xf32>
    %25 = vector.broadcast %10 : vector<1x128xf32> to vector<16x128xf32>
    %26 = arith.addf %24, %25 : vector<16x128xf32>
    %27 = vector.extract_strided_slice %26 {offsets = [0, 0], sizes = [16, 24], strides = [1, 1]} : vector<16x128xf32> to vector<16x24xf32>
    %28 = vector.extract_strided_slice %26 {offsets = [0, 24], sizes = [16, 32], strides = [1, 1]} : vector<16x128xf32> to vector<16x32xf32>
    %29 = vector.extract_strided_slice %26 {offsets = [0, 56], sizes = [16, 32], strides = [1, 1]} : vector<16x128xf32> to vector<16x32xf32>
    %cst_17 = arith.constant dense<0.000000e+00> : vector<8x128xf32>
    %30 = tpu.matmul %18, %6, %cst_17 {dimension_numbers = #tpu.dot_dimension_numbers<[1], [0], [0], [1], [0, 0, 1, 1], [], []>} : vector<8x32xf32>, vector<32x128xf32>, vector<8x128xf32> -> vector<8x128xf32>
    %31 = vector.broadcast %12 : vector<1x128xf32> to vector<8x128xf32>
    %32 = arith.addf %30, %31 : vector<8x128xf32>
    %33 = vector.extract_strided_slice %32 {offsets = [0, 0], sizes = [8, 24], strides = [1, 1]} : vector<8x128xf32> to vector<8x24xf32>
    %34 = vector.extract_strided_slice %33 {offsets = [0, 0], sizes = [8, 6], strides = [1, 1]} : vector<8x24xf32> to vector<8x6xf32>
    %35 = vector.extract_strided_slice %27 {offsets = [0, 0], sizes = [16, 6], strides = [1, 1]} : vector<16x24xf32> to vector<16x6xf32>
    %36 = vector.extract_strided_slice %28 {offsets = [0, 0], sizes = [16, 8], strides = [1, 1]} : vector<16x32xf32> to vector<16x8xf32>
    %cst_18 = arith.constant dense<0.000000e+00> : vector<8x16xf32>
    %37 = tpu.matmul %34, %35, %cst_18 {dimension_numbers = #tpu.dot_dimension_numbers<[1], [1], [0], [0], [0, 0, 1, 0], [], []>} : vector<8x6xf32>, vector<16x6xf32>, vector<8x16xf32> -> vector<8x16xf32>
    %38 = arith.addf %37, %23 : vector<8x16xf32>
    %cst_19 = arith.constant dense<0xFF800000> : vector<8xf32>
    %39 = vector.multi_reduction <maximumf>, %38, %cst_19 [1] : vector<8x16xf32> to vector<8xf32>
    %40 = vector.shape_cast %39 : vector<8xf32> to vector<8x1xf32>
    %41 = vector.broadcast %40 : vector<8x1xf32> to vector<8x16xf32>
    %42 = arith.subf %38, %41 : vector<8x16xf32>
    %43 = math.exp %42 : vector<8x16xf32>
    %cst_20 = arith.constant dense<0.000000e+00> : vector<8xf32>
    %44 = vector.multi_reduction <add>, %43, %cst_20 [1] : vector<8x16xf32> to vector<8xf32>
    %45 = vector.shape_cast %44 : vector<8xf32> to vector<8x1xf32>
    %46 = tpu.reciprocal %45 {approx = true} : vector<8x1xf32> -> vector<8x1xf32>
    %47 = vector.broadcast %46 : vector<8x1xf32> to vector<8x16xf32>
    %48 = arith.mulf %43, %47 : vector<8x16xf32>
    %cst_21 = arith.constant dense<0.000000e+00> : vector<8x8xf32>
    %49 = tpu.matmul %48, %36, %cst_21 {dimension_numbers = #tpu.dot_dimension_numbers<[1], [0], [0], [1], [0, 0, 1, 1], [], []>} : vector<8x16xf32>, vector<16x8xf32>, vector<8x8xf32> -> vector<8x8xf32>
    %50 = vector.extract_strided_slice %33 {offsets = [0, 6], sizes = [8, 6], strides = [1, 1]} : vector<8x24xf32> to vector<8x6xf32>
    %51 = vector.extract_strided_slice %27 {offsets = [0, 6], sizes = [16, 6], strides = [1, 1]} : vector<16x24xf32> to vector<16x6xf32>
    %52 = vector.extract_strided_slice %28 {offsets = [0, 8], sizes = [16, 8], strides = [1, 1]} : vector<16x32xf32> to vector<16x8xf32>
    %cst_22 = arith.constant dense<0.000000e+00> : vector<8x16xf32>
    %53 = tpu.matmul %50, %51, %cst_22 {dimension_numbers = #tpu.dot_dimension_numbers<[1], [1], [0], [0], [0, 0, 1, 0], [], []>} : vector<8x6xf32>, vector<16x6xf32>, vector<8x16xf32> -> vector<8x16xf32>
    %54 = arith.addf %53, %23 : vector<8x16xf32>
    %cst_23 = arith.constant dense<0xFF800000> : vector<8xf32>
    %55 = vector.multi_reduction <maximumf>, %54, %cst_23 [1] : vector<8x16xf32> to vector<8xf32>
    %56 = vector.shape_cast %55 : vector<8xf32> to vector<8x1xf32>
    %57 = vector.broadcast %56 : vector<8x1xf32> to vector<8x16xf32>
    %58 = arith.subf %54, %57 : vector<8x16xf32>
    %59 = math.exp %58 : vector<8x16xf32>
    %cst_24 = arith.constant dense<0.000000e+00> : vector<8xf32>
    %60 = vector.multi_reduction <add>, %59, %cst_24 [1] : vector<8x16xf32> to vector<8xf32>
    %61 = vector.shape_cast %60 : vector<8xf32> to vector<8x1xf32>
    %62 = tpu.reciprocal %61 {approx = true} : vector<8x1xf32> -> vector<8x1xf32>
    %63 = vector.broadcast %62 : vector<8x1xf32> to vector<8x16xf32>
    %64 = arith.mulf %59, %63 : vector<8x16xf32>
    %cst_25 = arith.constant dense<0.000000e+00> : vector<8x8xf32>
    %65 = tpu.matmul %64, %52, %cst_25 {dimension_numbers = #tpu.dot_dimension_numbers<[1], [0], [0], [1], [0, 0, 1, 1], [], []>} : vector<8x16xf32>, vector<16x8xf32>, vector<8x8xf32> -> vector<8x8xf32>
    %66 = vector.extract_strided_slice %33 {offsets = [0, 12], sizes = [8, 6], strides = [1, 1]} : vector<8x24xf32> to vector<8x6xf32>
    %67 = vector.extract_strided_slice %27 {offsets = [0, 12], sizes = [16, 6], strides = [1, 1]} : vector<16x24xf32> to vector<16x6xf32>
    %68 = vector.extract_strided_slice %28 {offsets = [0, 16], sizes = [16, 8], strides = [1, 1]} : vector<16x32xf32> to vector<16x8xf32>
    %cst_26 = arith.constant dense<0.000000e+00> : vector<8x16xf32>
    %69 = tpu.matmul %66, %67, %cst_26 {dimension_numbers = #tpu.dot_dimension_numbers<[1], [1], [0], [0], [0, 0, 1, 0], [], []>} : vector<8x6xf32>, vector<16x6xf32>, vector<8x16xf32> -> vector<8x16xf32>
    %70 = arith.addf %69, %23 : vector<8x16xf32>
    %cst_27 = arith.constant dense<0xFF800000> : vector<8xf32>
    %71 = vector.multi_reduction <maximumf>, %70, %cst_27 [1] : vector<8x16xf32> to vector<8xf32>
    %72 = vector.shape_cast %71 : vector<8xf32> to vector<8x1xf32>
    %73 = vector.broadcast %72 : vector<8x1xf32> to vector<8x16xf32>
    %74 = arith.subf %70, %73 : vector<8x16xf32>
    %75 = math.exp %74 : vector<8x16xf32>
    %cst_28 = arith.constant dense<0.000000e+00> : vector<8xf32>
    %76 = vector.multi_reduction <add>, %75, %cst_28 [1] : vector<8x16xf32> to vector<8xf32>
    %77 = vector.shape_cast %76 : vector<8xf32> to vector<8x1xf32>
    %78 = tpu.reciprocal %77 {approx = true} : vector<8x1xf32> -> vector<8x1xf32>
    %79 = vector.broadcast %78 : vector<8x1xf32> to vector<8x16xf32>
    %80 = arith.mulf %75, %79 : vector<8x16xf32>
    %cst_29 = arith.constant dense<0.000000e+00> : vector<8x8xf32>
    %81 = tpu.matmul %80, %68, %cst_29 {dimension_numbers = #tpu.dot_dimension_numbers<[1], [0], [0], [1], [0, 0, 1, 1], [], []>} : vector<8x16xf32>, vector<16x8xf32>, vector<8x8xf32> -> vector<8x8xf32>
    %82 = vector.extract_strided_slice %33 {offsets = [0, 18], sizes = [8, 6], strides = [1, 1]} : vector<8x24xf32> to vector<8x6xf32>
    %83 = vector.extract_strided_slice %27 {offsets = [0, 18], sizes = [16, 6], strides = [1, 1]} : vector<16x24xf32> to vector<16x6xf32>
    %84 = vector.extract_strided_slice %28 {offsets = [0, 24], sizes = [16, 8], strides = [1, 1]} : vector<16x32xf32> to vector<16x8xf32>
    %cst_30 = arith.constant dense<0.000000e+00> : vector<8x16xf32>
    %85 = tpu.matmul %82, %83, %cst_30 {dimension_numbers = #tpu.dot_dimension_numbers<[1], [1], [0], [0], [0, 0, 1, 0], [], []>} : vector<8x6xf32>, vector<16x6xf32>, vector<8x16xf32> -> vector<8x16xf32>
    %86 = arith.addf %85, %23 : vector<8x16xf32>
    %cst_31 = arith.constant dense<0xFF800000> : vector<8xf32>
    %87 = vector.multi_reduction <maximumf>, %86, %cst_31 [1] : vector<8x16xf32> to vector<8xf32>
    %88 = vector.shape_cast %87 : vector<8xf32> to vector<8x1xf32>
    %89 = vector.broadcast %88 : vector<8x1xf32> to vector<8x16xf32>
    %90 = arith.subf %86, %89 : vector<8x16xf32>
    %91 = math.exp %90 : vector<8x16xf32>
    %cst_32 = arith.constant dense<0.000000e+00> : vector<8xf32>
    %92 = vector.multi_reduction <add>, %91, %cst_32 [1] : vector<8x16xf32> to vector<8xf32>
    %93 = vector.shape_cast %92 : vector<8xf32> to vector<8x1xf32>
    %94 = tpu.reciprocal %93 {approx = true} : vector<8x1xf32> -> vector<8x1xf32>
    %95 = vector.broadcast %94 : vector<8x1xf32> to vector<8x16xf32>
    %96 = arith.mulf %91, %95 : vector<8x16xf32>
    %cst_33 = arith.constant dense<0.000000e+00> : vector<8x8xf32>
    %97 = tpu.matmul %96, %84, %cst_33 {dimension_numbers = #tpu.dot_dimension_numbers<[1], [0], [0], [1], [0, 0, 1, 1], [], []>} : vector<8x16xf32>, vector<16x8xf32>, vector<8x8xf32> -> vector<8x8xf32>
    %98 = tpu.concatenate %49, %65, %81, %97 in 1 : vector<8x8xf32>, vector<8x8xf32>, vector<8x8xf32>, vector<8x8xf32> -> vector<8x32xf32>
    %cst_34 = arith.constant dense<0.000000e+00> : vector<8x128xf32>
    %99 = tpu.matmul %98, %4, %cst_34 {dimension_numbers = #tpu.dot_dimension_numbers<[1], [0], [0], [1], [0, 0, 1, 1], [], []>} : vector<8x32xf32>, vector<32x128xf32>, vector<8x128xf32> -> vector<8x128xf32>
    %100 = vector.broadcast %11 : vector<1x128xf32> to vector<8x128xf32>
    %101 = arith.addf %99, %100 : vector<8x128xf32>
    %102 = vector.extract_strided_slice %101 {offsets = [0, 0], sizes = [8, 24], strides = [1, 1]} : vector<8x128xf32> to vector<8x24xf32>
    %103 = vector.extract_strided_slice %101 {offsets = [0, 24], sizes = [8, 32], strides = [1, 1]} : vector<8x128xf32> to vector<8x32xf32>
    %104 = vector.extract_strided_slice %101 {offsets = [0, 56], sizes = [8, 24], strides = [1, 1]} : vector<8x128xf32> to vector<8x24xf32>
    %105 = vector.extract_strided_slice %104 {offsets = [0, 0], sizes = [8, 6], strides = [1, 1]} : vector<8x24xf32> to vector<8x6xf32>
    %106 = vector.extract_strided_slice %102 {offsets = [0, 0], sizes = [8, 6], strides = [1, 1]} : vector<8x24xf32> to vector<8x6xf32>
    %107 = vector.extract_strided_slice %103 {offsets = [0, 0], sizes = [8, 8], strides = [1, 1]} : vector<8x32xf32> to vector<8x8xf32>
    %cst_35 = arith.constant dense<0.000000e+00> : vector<8x8xf32>
    %108 = tpu.matmul %105, %106, %cst_35 {dimension_numbers = #tpu.dot_dimension_numbers<[1], [1], [0], [0], [0, 0, 1, 0], [], []>} : vector<8x6xf32>, vector<8x6xf32>, vector<8x8xf32> -> vector<8x8xf32>
    %cst_36 = arith.constant dense<0xFF800000> : vector<8xf32>
    %109 = vector.multi_reduction <maximumf>, %108, %cst_36 [1] : vector<8x8xf32> to vector<8xf32>
    %110 = vector.shape_cast %109 : vector<8xf32> to vector<8x1xf32>
    %111 = vector.broadcast %110 : vector<8x1xf32> to vector<8x8xf32>
    %112 = arith.subf %108, %111 : vector<8x8xf32>
    %113 = math.exp %112 : vector<8x8xf32>
    %cst_37 = arith.constant dense<0.000000e+00> : vector<8xf32>
    %114 = vector.multi_reduction <add>, %113, %cst_37 [1] : vector<8x8xf32> to vector<8xf32>
    %115 = vector.shape_cast %114 : vector<8xf32> to vector<8x1xf32>
    %116 = tpu.reciprocal %115 {approx = true} : vector<8x1xf32> -> vector<8x1xf32>
    %117 = vector.broadcast %116 : vector<8x1xf32> to vector<8x8xf32>
    %118 = arith.mulf %113, %117 : vector<8x8xf32>
    %cst_38 = arith.constant dense<0.000000e+00> : vector<8x8xf32>
    %119 = tpu.matmul %118, %107, %cst_38 {dimension_numbers = #tpu.dot_dimension_numbers<[1], [0], [0], [1], [0, 0, 1, 1], [], []>} : vector<8x8xf32>, vector<8x8xf32>, vector<8x8xf32> -> vector<8x8xf32>
    %120 = vector.extract_strided_slice %104 {offsets = [0, 6], sizes = [8, 6], strides = [1, 1]} : vector<8x24xf32> to vector<8x6xf32>
    %121 = vector.extract_strided_slice %102 {offsets = [0, 6], sizes = [8, 6], strides = [1, 1]} : vector<8x24xf32> to vector<8x6xf32>
    %122 = vector.extract_strided_slice %103 {offsets = [0, 8], sizes = [8, 8], strides = [1, 1]} : vector<8x32xf32> to vector<8x8xf32>
    %cst_39 = arith.constant dense<0.000000e+00> : vector<8x8xf32>
    %123 = tpu.matmul %120, %121, %cst_39 {dimension_numbers = #tpu.dot_dimension_numbers<[1], [1], [0], [0], [0, 0, 1, 0], [], []>} : vector<8x6xf32>, vector<8x6xf32>, vector<8x8xf32> -> vector<8x8xf32>
    %cst_40 = arith.constant dense<0xFF800000> : vector<8xf32>
    %124 = vector.multi_reduction <maximumf>, %123, %cst_40 [1] : vector<8x8xf32> to vector<8xf32>
    %125 = vector.shape_cast %124 : vector<8xf32> to vector<8x1xf32>
    %126 = vector.broadcast %125 : vector<8x1xf32> to vector<8x8xf32>
    %127 = arith.subf %123, %126 : vector<8x8xf32>
    %128 = math.exp %127 : vector<8x8xf32>
    %cst_41 = arith.constant dense<0.000000e+00> : vector<8xf32>
    %129 = vector.multi_reduction <add>, %128, %cst_41 [1] : vector<8x8xf32> to vector<8xf32>
    %130 = vector.shape_cast %129 : vector<8xf32> to vector<8x1xf32>
    %131 = tpu.reciprocal %130 {approx = true} : vector<8x1xf32> -> vector<8x1xf32>
    %132 = vector.broadcast %131 : vector<8x1xf32> to vector<8x8xf32>
    %133 = arith.mulf %128, %132 : vector<8x8xf32>
    %cst_42 = arith.constant dense<0.000000e+00> : vector<8x8xf32>
    %134 = tpu.matmul %133, %122, %cst_42 {dimension_numbers = #tpu.dot_dimension_numbers<[1], [0], [0], [1], [0, 0, 1, 1], [], []>} : vector<8x8xf32>, vector<8x8xf32>, vector<8x8xf32> -> vector<8x8xf32>
    %135 = vector.extract_strided_slice %104 {offsets = [0, 12], sizes = [8, 6], strides = [1, 1]} : vector<8x24xf32> to vector<8x6xf32>
    %136 = vector.extract_strided_slice %102 {offsets = [0, 12], sizes = [8, 6], strides = [1, 1]} : vector<8x24xf32> to vector<8x6xf32>
    %137 = vector.extract_strided_slice %103 {offsets = [0, 16], sizes = [8, 8], strides = [1, 1]} : vector<8x32xf32> to vector<8x8xf32>
    %cst_43 = arith.constant dense<0.000000e+00> : vector<8x8xf32>
    %138 = tpu.matmul %135, %136, %cst_43 {dimension_numbers = #tpu.dot_dimension_numbers<[1], [1], [0], [0], [0, 0, 1, 0], [], []>} : vector<8x6xf32>, vector<8x6xf32>, vector<8x8xf32> -> vector<8x8xf32>
    %cst_44 = arith.constant dense<0xFF800000> : vector<8xf32>
    %139 = vector.multi_reduction <maximumf>, %138, %cst_44 [1] : vector<8x8xf32> to vector<8xf32>
    %140 = vector.shape_cast %139 : vector<8xf32> to vector<8x1xf32>
    %141 = vector.broadcast %140 : vector<8x1xf32> to vector<8x8xf32>
    %142 = arith.subf %138, %141 : vector<8x8xf32>
    %143 = math.exp %142 : vector<8x8xf32>
    %cst_45 = arith.constant dense<0.000000e+00> : vector<8xf32>
    %144 = vector.multi_reduction <add>, %143, %cst_45 [1] : vector<8x8xf32> to vector<8xf32>
    %145 = vector.shape_cast %144 : vector<8xf32> to vector<8x1xf32>
    %146 = tpu.reciprocal %145 {approx = true} : vector<8x1xf32> -> vector<8x1xf32>
    %147 = vector.broadcast %146 : vector<8x1xf32> to vector<8x8xf32>
    %148 = arith.mulf %143, %147 : vector<8x8xf32>
    %cst_46 = arith.constant dense<0.000000e+00> : vector<8x8xf32>
    %149 = tpu.matmul %148, %137, %cst_46 {dimension_numbers = #tpu.dot_dimension_numbers<[1], [0], [0], [1], [0, 0, 1, 1], [], []>} : vector<8x8xf32>, vector<8x8xf32>, vector<8x8xf32> -> vector<8x8xf32>
    %150 = vector.extract_strided_slice %104 {offsets = [0, 18], sizes = [8, 6], strides = [1, 1]} : vector<8x24xf32> to vector<8x6xf32>
    %151 = vector.extract_strided_slice %102 {offsets = [0, 18], sizes = [8, 6], strides = [1, 1]} : vector<8x24xf32> to vector<8x6xf32>
    %152 = vector.extract_strided_slice %103 {offsets = [0, 24], sizes = [8, 8], strides = [1, 1]} : vector<8x32xf32> to vector<8x8xf32>
    %cst_47 = arith.constant dense<0.000000e+00> : vector<8x8xf32>
    %153 = tpu.matmul %150, %151, %cst_47 {dimension_numbers = #tpu.dot_dimension_numbers<[1], [1], [0], [0], [0, 0, 1, 0], [], []>} : vector<8x6xf32>, vector<8x6xf32>, vector<8x8xf32> -> vector<8x8xf32>
    %cst_48 = arith.constant dense<0xFF800000> : vector<8xf32>
    %154 = vector.multi_reduction <maximumf>, %153, %cst_48 [1] : vector<8x8xf32> to vector<8xf32>
    %155 = vector.shape_cast %154 : vector<8xf32> to vector<8x1xf32>
    %156 = vector.broadcast %155 : vector<8x1xf32> to vector<8x8xf32>
    %157 = arith.subf %153, %156 : vector<8x8xf32>
    %158 = math.exp %157 : vector<8x8xf32>
    %cst_49 = arith.constant dense<0.000000e+00> : vector<8xf32>
    %159 = vector.multi_reduction <add>, %158, %cst_49 [1] : vector<8x8xf32> to vector<8xf32>
    %160 = vector.shape_cast %159 : vector<8xf32> to vector<8x1xf32>
    %161 = tpu.reciprocal %160 {approx = true} : vector<8x1xf32> -> vector<8x1xf32>
    %162 = vector.broadcast %161 : vector<8x1xf32> to vector<8x8xf32>
    %163 = arith.mulf %158, %162 : vector<8x8xf32>
    %cst_50 = arith.constant dense<0.000000e+00> : vector<8x8xf32>
    %164 = tpu.matmul %163, %152, %cst_50 {dimension_numbers = #tpu.dot_dimension_numbers<[1], [0], [0], [1], [0, 0, 1, 1], [], []>} : vector<8x8xf32>, vector<8x8xf32>, vector<8x8xf32> -> vector<8x8xf32>
    %165 = tpu.concatenate %119, %134, %149, %164 in 1 : vector<8x8xf32>, vector<8x8xf32>, vector<8x8xf32>, vector<8x8xf32> -> vector<8x32xf32>
    %cst_51 = arith.constant dense<0.000000e+00> : vector<8xf32>
    %166 = vector.multi_reduction <add>, %165, %cst_51 [1] : vector<8x32xf32> to vector<8xf32>
    %167 = vector.shape_cast %166 : vector<8xf32> to vector<8x1xf32>
    %cst_52 = arith.constant 3.200000e+01 : f32
    %168 = vector.broadcast %cst_52 : f32 to vector<8x1xf32>
    %169 = arith.divf %167, %168 : vector<8x1xf32>
    %170 = vector.broadcast %169 : vector<8x1xf32> to vector<8x32xf32>
    %171 = arith.subf %165, %170 : vector<8x32xf32>
    %172 = arith.mulf %171, %171 : vector<8x32xf32>
    %cst_53 = arith.constant dense<0.000000e+00> : vector<8xf32>
    %173 = vector.multi_reduction <add>, %172, %cst_53 [1] : vector<8x32xf32> to vector<8xf32>
    %174 = vector.shape_cast %173 : vector<8xf32> to vector<8x1xf32>
    %cst_54 = arith.constant 3.200000e+01 : f32
    %175 = vector.broadcast %cst_54 : f32 to vector<8x1xf32>
    %176 = arith.divf %174, %175 : vector<8x1xf32>
    %177 = vector.broadcast %169 : vector<8x1xf32> to vector<8x32xf32>
    %178 = arith.subf %165, %177 : vector<8x32xf32>
    %cst_55 = arith.constant 9.99999974E-6 : f32
    %179 = vector.broadcast %cst_55 : f32 to vector<8x1xf32>
    %180 = arith.addf %176, %179 : vector<8x1xf32>
    %181 = math.rsqrt %180 : vector<8x1xf32>
    %182 = vector.broadcast %181 : vector<8x1xf32> to vector<8x32xf32>
    %183 = arith.mulf %178, %182 : vector<8x32xf32>
    %184 = vector.broadcast %14 : vector<1x32xf32> to vector<8x32xf32>
    %185 = arith.mulf %183, %184 : vector<8x32xf32>
    %186 = vector.broadcast %15 : vector<1x32xf32> to vector<8x32xf32>
    %187 = arith.addf %185, %186 : vector<8x32xf32>
    %188 = vector.extract_strided_slice %29 {offsets = [0, 0], sizes = [16, 8], strides = [1, 1]} : vector<16x32xf32> to vector<16x8xf32>
    %cst_56 = arith.constant dense<0xFF800000> : vector<16xf32>
    %189 = vector.multi_reduction <maximumf>, %188, %cst_56 [1] : vector<16x8xf32> to vector<16xf32>
    %190 = vector.shape_cast %189 : vector<16xf32> to vector<16x1xf32>
    %191 = vector.broadcast %190 : vector<16x1xf32> to vector<16x8xf32>
    %192 = arith.subf %188, %191 : vector<16x8xf32>
    %193 = math.exp %192 : vector<16x8xf32>
    %cst_57 = arith.constant dense<0.000000e+00> : vector<16xf32>
    %194 = vector.multi_reduction <add>, %193, %cst_57 [1] : vector<16x8xf32> to vector<16xf32>
    %195 = vector.shape_cast %194 : vector<16xf32> to vector<16x1xf32>
    %196 = tpu.reciprocal %195 {approx = true} : vector<16x1xf32> -> vector<16x1xf32>
    %197 = vector.broadcast %196 : vector<16x1xf32> to vector<16x8xf32>
    %198 = arith.mulf %193, %197 : vector<16x8xf32>
    %199 = vector.extract_strided_slice %187 {offsets = [0, 0], sizes = [8, 8], strides = [1, 1]} : vector<8x32xf32> to vector<8x8xf32>
    %cst_58 = arith.constant dense<0.000000e+00> : vector<16x8xf32>
    %200 = tpu.matmul %198, %199, %cst_58 {dimension_numbers = #tpu.dot_dimension_numbers<[1], [0], [0], [1], [0, 0, 1, 1], [], []>} : vector<16x8xf32>, vector<8x8xf32>, vector<16x8xf32> -> vector<16x8xf32>
    %201 = vector.extract_strided_slice %29 {offsets = [0, 8], sizes = [16, 8], strides = [1, 1]} : vector<16x32xf32> to vector<16x8xf32>
    %cst_59 = arith.constant dense<0xFF800000> : vector<16xf32>
    %202 = vector.multi_reduction <maximumf>, %201, %cst_59 [1] : vector<16x8xf32> to vector<16xf32>
    %203 = vector.shape_cast %202 : vector<16xf32> to vector<16x1xf32>
    %204 = vector.broadcast %203 : vector<16x1xf32> to vector<16x8xf32>
    %205 = arith.subf %201, %204 : vector<16x8xf32>
    %206 = math.exp %205 : vector<16x8xf32>
    %cst_60 = arith.constant dense<0.000000e+00> : vector<16xf32>
    %207 = vector.multi_reduction <add>, %206, %cst_60 [1] : vector<16x8xf32> to vector<16xf32>
    %208 = vector.shape_cast %207 : vector<16xf32> to vector<16x1xf32>
    %209 = tpu.reciprocal %208 {approx = true} : vector<16x1xf32> -> vector<16x1xf32>
    %210 = vector.broadcast %209 : vector<16x1xf32> to vector<16x8xf32>
    %211 = arith.mulf %206, %210 : vector<16x8xf32>
    %212 = vector.extract_strided_slice %187 {offsets = [0, 8], sizes = [8, 8], strides = [1, 1]} : vector<8x32xf32> to vector<8x8xf32>
    %cst_61 = arith.constant dense<0.000000e+00> : vector<16x8xf32>
    %213 = tpu.matmul %211, %212, %cst_61 {dimension_numbers = #tpu.dot_dimension_numbers<[1], [0], [0], [1], [0, 0, 1, 1], [], []>} : vector<16x8xf32>, vector<8x8xf32>, vector<16x8xf32> -> vector<16x8xf32>
    %214 = vector.extract_strided_slice %29 {offsets = [0, 16], sizes = [16, 8], strides = [1, 1]} : vector<16x32xf32> to vector<16x8xf32>
    %cst_62 = arith.constant dense<0xFF800000> : vector<16xf32>
    %215 = vector.multi_reduction <maximumf>, %214, %cst_62 [1] : vector<16x8xf32> to vector<16xf32>
    %216 = vector.shape_cast %215 : vector<16xf32> to vector<16x1xf32>
    %217 = vector.broadcast %216 : vector<16x1xf32> to vector<16x8xf32>
    %218 = arith.subf %214, %217 : vector<16x8xf32>
    %219 = math.exp %218 : vector<16x8xf32>
    %cst_63 = arith.constant dense<0.000000e+00> : vector<16xf32>
    %220 = vector.multi_reduction <add>, %219, %cst_63 [1] : vector<16x8xf32> to vector<16xf32>
    %221 = vector.shape_cast %220 : vector<16xf32> to vector<16x1xf32>
    %222 = tpu.reciprocal %221 {approx = true} : vector<16x1xf32> -> vector<16x1xf32>
    %223 = vector.broadcast %222 : vector<16x1xf32> to vector<16x8xf32>
    %224 = arith.mulf %219, %223 : vector<16x8xf32>
    %225 = vector.extract_strided_slice %187 {offsets = [0, 16], sizes = [8, 8], strides = [1, 1]} : vector<8x32xf32> to vector<8x8xf32>
    %cst_64 = arith.constant dense<0.000000e+00> : vector<16x8xf32>
    %226 = tpu.matmul %224, %225, %cst_64 {dimension_numbers = #tpu.dot_dimension_numbers<[1], [0], [0], [1], [0, 0, 1, 1], [], []>} : vector<16x8xf32>, vector<8x8xf32>, vector<16x8xf32> -> vector<16x8xf32>
    %227 = vector.extract_strided_slice %29 {offsets = [0, 24], sizes = [16, 8], strides = [1, 1]} : vector<16x32xf32> to vector<16x8xf32>
    %cst_65 = arith.constant dense<0xFF800000> : vector<16xf32>
    %228 = vector.multi_reduction <maximumf>, %227, %cst_65 [1] : vector<16x8xf32> to vector<16xf32>
    %229 = vector.shape_cast %228 : vector<16xf32> to vector<16x1xf32>
    %230 = vector.broadcast %229 : vector<16x1xf32> to vector<16x8xf32>
    %231 = arith.subf %227, %230 : vector<16x8xf32>
    %232 = math.exp %231 : vector<16x8xf32>
    %cst_66 = arith.constant dense<0.000000e+00> : vector<16xf32>
    %233 = vector.multi_reduction <add>, %232, %cst_66 [1] : vector<16x8xf32> to vector<16xf32>
    %234 = vector.shape_cast %233 : vector<16xf32> to vector<16x1xf32>
    %235 = tpu.reciprocal %234 {approx = true} : vector<16x1xf32> -> vector<16x1xf32>
    %236 = vector.broadcast %235 : vector<16x1xf32> to vector<16x8xf32>
    %237 = arith.mulf %232, %236 : vector<16x8xf32>
    %238 = vector.extract_strided_slice %187 {offsets = [0, 24], sizes = [8, 8], strides = [1, 1]} : vector<8x32xf32> to vector<8x8xf32>
    %cst_67 = arith.constant dense<0.000000e+00> : vector<16x8xf32>
    %239 = tpu.matmul %237, %238, %cst_67 {dimension_numbers = #tpu.dot_dimension_numbers<[1], [0], [0], [1], [0, 0, 1, 1], [], []>} : vector<16x8xf32>, vector<8x8xf32>, vector<16x8xf32> -> vector<16x8xf32>
    %240 = tpu.concatenate %200, %213, %226, %239 in 1 : vector<16x8xf32>, vector<16x8xf32>, vector<16x8xf32>, vector<16x8xf32> -> vector<16x32xf32>
    %cst_68 = arith.constant dense<0.000000e+00> : vector<16x32xf32>
    %241 = tpu.matmul %240, %9, %cst_68 {dimension_numbers = #tpu.dot_dimension_numbers<[1], [0], [0], [1], [0, 0, 1, 1], [], []>} : vector<16x32xf32>, vector<32x32xf32>, vector<16x32xf32> -> vector<16x32xf32>
    %242 = vector.broadcast %13 : vector<1x32xf32> to vector<16x32xf32>
    %243 = arith.addf %241, %242 : vector<16x32xf32>
    %c0_69 = arith.constant 0 : index
    %c32 = arith.constant 32 : index
    %244 = vector.load %arg1[%c0_69, %c32] : memref<16x64xf32, #tpu.memory_space<vmem>>, vector<16x32xf32>
    %c0_70 = arith.constant 0 : index
    %c32_71 = arith.constant 32 : index
    %245 = vector.load %arg2[%c0_70, %c32_71] : memref<8x64xf32, #tpu.memory_space<vmem>>, vector<8x32xf32>
    %246 = vector.extract_strided_slice %16 {offsets = [1, 0], sizes = [1, 16], strides = [1, 1]} : vector<2x16xf32> to vector<1x16xf32>
    %cst_72 = arith.constant -1.000000e+30 : f32
    %247 = vector.broadcast %cst_72 : f32 to vector<1x16xf32>
    %248 = arith.mulf %246, %247 : vector<1x16xf32>
    %249 = vector.shape_cast %248 : vector<1x16xf32> to vector<1x16xf32>
    %250 = vector.broadcast %249 : vector<1x16xf32> to vector<8x16xf32>
    %cst_73 = arith.constant dense<0.000000e+00> : vector<16x128xf32>
    %251 = tpu.matmul %244, %2, %cst_73 {dimension_numbers = #tpu.dot_dimension_numbers<[1], [0], [0], [1], [0, 0, 1, 1], [], []>} : vector<16x32xf32>, vector<32x128xf32>, vector<16x128xf32> -> vector<16x128xf32>
    %252 = vector.broadcast %10 : vector<1x128xf32> to vector<16x128xf32>
    %253 = arith.addf %251, %252 : vector<16x128xf32>
    %254 = vector.extract_strided_slice %253 {offsets = [0, 0], sizes = [16, 24], strides = [1, 1]} : vector<16x128xf32> to vector<16x24xf32>
    %255 = vector.extract_strided_slice %253 {offsets = [0, 24], sizes = [16, 32], strides = [1, 1]} : vector<16x128xf32> to vector<16x32xf32>
    %256 = vector.extract_strided_slice %253 {offsets = [0, 56], sizes = [16, 32], strides = [1, 1]} : vector<16x128xf32> to vector<16x32xf32>
    %cst_74 = arith.constant dense<0.000000e+00> : vector<8x128xf32>
    %257 = tpu.matmul %245, %6, %cst_74 {dimension_numbers = #tpu.dot_dimension_numbers<[1], [0], [0], [1], [0, 0, 1, 1], [], []>} : vector<8x32xf32>, vector<32x128xf32>, vector<8x128xf32> -> vector<8x128xf32>
    %258 = vector.broadcast %12 : vector<1x128xf32> to vector<8x128xf32>
    %259 = arith.addf %257, %258 : vector<8x128xf32>
    %260 = vector.extract_strided_slice %259 {offsets = [0, 0], sizes = [8, 24], strides = [1, 1]} : vector<8x128xf32> to vector<8x24xf32>
    %261 = vector.extract_strided_slice %260 {offsets = [0, 0], sizes = [8, 6], strides = [1, 1]} : vector<8x24xf32> to vector<8x6xf32>
    %262 = vector.extract_strided_slice %254 {offsets = [0, 0], sizes = [16, 6], strides = [1, 1]} : vector<16x24xf32> to vector<16x6xf32>
    %263 = vector.extract_strided_slice %255 {offsets = [0, 0], sizes = [16, 8], strides = [1, 1]} : vector<16x32xf32> to vector<16x8xf32>
    %cst_75 = arith.constant dense<0.000000e+00> : vector<8x16xf32>
    %264 = tpu.matmul %261, %262, %cst_75 {dimension_numbers = #tpu.dot_dimension_numbers<[1], [1], [0], [0], [0, 0, 1, 0], [], []>} : vector<8x6xf32>, vector<16x6xf32>, vector<8x16xf32> -> vector<8x16xf32>
    %265 = arith.addf %264, %250 : vector<8x16xf32>
    %cst_76 = arith.constant dense<0xFF800000> : vector<8xf32>
    %266 = vector.multi_reduction <maximumf>, %265, %cst_76 [1] : vector<8x16xf32> to vector<8xf32>
    %267 = vector.shape_cast %266 : vector<8xf32> to vector<8x1xf32>
    %268 = vector.broadcast %267 : vector<8x1xf32> to vector<8x16xf32>
    %269 = arith.subf %265, %268 : vector<8x16xf32>
    %270 = math.exp %269 : vector<8x16xf32>
    %cst_77 = arith.constant dense<0.000000e+00> : vector<8xf32>
    %271 = vector.multi_reduction <add>, %270, %cst_77 [1] : vector<8x16xf32> to vector<8xf32>
    %272 = vector.shape_cast %271 : vector<8xf32> to vector<8x1xf32>
    %273 = tpu.reciprocal %272 {approx = true} : vector<8x1xf32> -> vector<8x1xf32>
    %274 = vector.broadcast %273 : vector<8x1xf32> to vector<8x16xf32>
    %275 = arith.mulf %270, %274 : vector<8x16xf32>
    %cst_78 = arith.constant dense<0.000000e+00> : vector<8x8xf32>
    %276 = tpu.matmul %275, %263, %cst_78 {dimension_numbers = #tpu.dot_dimension_numbers<[1], [0], [0], [1], [0, 0, 1, 1], [], []>} : vector<8x16xf32>, vector<16x8xf32>, vector<8x8xf32> -> vector<8x8xf32>
    %277 = vector.extract_strided_slice %260 {offsets = [0, 6], sizes = [8, 6], strides = [1, 1]} : vector<8x24xf32> to vector<8x6xf32>
    %278 = vector.extract_strided_slice %254 {offsets = [0, 6], sizes = [16, 6], strides = [1, 1]} : vector<16x24xf32> to vector<16x6xf32>
    %279 = vector.extract_strided_slice %255 {offsets = [0, 8], sizes = [16, 8], strides = [1, 1]} : vector<16x32xf32> to vector<16x8xf32>
    %cst_79 = arith.constant dense<0.000000e+00> : vector<8x16xf32>
    %280 = tpu.matmul %277, %278, %cst_79 {dimension_numbers = #tpu.dot_dimension_numbers<[1], [1], [0], [0], [0, 0, 1, 0], [], []>} : vector<8x6xf32>, vector<16x6xf32>, vector<8x16xf32> -> vector<8x16xf32>
    %281 = arith.addf %280, %250 : vector<8x16xf32>
    %cst_80 = arith.constant dense<0xFF800000> : vector<8xf32>
    %282 = vector.multi_reduction <maximumf>, %281, %cst_80 [1] : vector<8x16xf32> to vector<8xf32>
    %283 = vector.shape_cast %282 : vector<8xf32> to vector<8x1xf32>
    %284 = vector.broadcast %283 : vector<8x1xf32> to vector<8x16xf32>
    %285 = arith.subf %281, %284 : vector<8x16xf32>
    %286 = math.exp %285 : vector<8x16xf32>
    %cst_81 = arith.constant dense<0.000000e+00> : vector<8xf32>
    %287 = vector.multi_reduction <add>, %286, %cst_81 [1] : vector<8x16xf32> to vector<8xf32>
    %288 = vector.shape_cast %287 : vector<8xf32> to vector<8x1xf32>
    %289 = tpu.reciprocal %288 {approx = true} : vector<8x1xf32> -> vector<8x1xf32>
    %290 = vector.broadcast %289 : vector<8x1xf32> to vector<8x16xf32>
    %291 = arith.mulf %286, %290 : vector<8x16xf32>
    %cst_82 = arith.constant dense<0.000000e+00> : vector<8x8xf32>
    %292 = tpu.matmul %291, %279, %cst_82 {dimension_numbers = #tpu.dot_dimension_numbers<[1], [0], [0], [1], [0, 0, 1, 1], [], []>} : vector<8x16xf32>, vector<16x8xf32>, vector<8x8xf32> -> vector<8x8xf32>
    %293 = vector.extract_strided_slice %260 {offsets = [0, 12], sizes = [8, 6], strides = [1, 1]} : vector<8x24xf32> to vector<8x6xf32>
    %294 = vector.extract_strided_slice %254 {offsets = [0, 12], sizes = [16, 6], strides = [1, 1]} : vector<16x24xf32> to vector<16x6xf32>
    %295 = vector.extract_strided_slice %255 {offsets = [0, 16], sizes = [16, 8], strides = [1, 1]} : vector<16x32xf32> to vector<16x8xf32>
    %cst_83 = arith.constant dense<0.000000e+00> : vector<8x16xf32>
    %296 = tpu.matmul %293, %294, %cst_83 {dimension_numbers = #tpu.dot_dimension_numbers<[1], [1], [0], [0], [0, 0, 1, 0], [], []>} : vector<8x6xf32>, vector<16x6xf32>, vector<8x16xf32> -> vector<8x16xf32>
    %297 = arith.addf %296, %250 : vector<8x16xf32>
    %cst_84 = arith.constant dense<0xFF800000> : vector<8xf32>
    %298 = vector.multi_reduction <maximumf>, %297, %cst_84 [1] : vector<8x16xf32> to vector<8xf32>
    %299 = vector.shape_cast %298 : vector<8xf32> to vector<8x1xf32>
    %300 = vector.broadcast %299 : vector<8x1xf32> to vector<8x16xf32>
    %301 = arith.subf %297, %300 : vector<8x16xf32>
    %302 = math.exp %301 : vector<8x16xf32>
    %cst_85 = arith.constant dense<0.000000e+00> : vector<8xf32>
    %303 = vector.multi_reduction <add>, %302, %cst_85 [1] : vector<8x16xf32> to vector<8xf32>
    %304 = vector.shape_cast %303 : vector<8xf32> to vector<8x1xf32>
    %305 = tpu.reciprocal %304 {approx = true} : vector<8x1xf32> -> vector<8x1xf32>
    %306 = vector.broadcast %305 : vector<8x1xf32> to vector<8x16xf32>
    %307 = arith.mulf %302, %306 : vector<8x16xf32>
    %cst_86 = arith.constant dense<0.000000e+00> : vector<8x8xf32>
    %308 = tpu.matmul %307, %295, %cst_86 {dimension_numbers = #tpu.dot_dimension_numbers<[1], [0], [0], [1], [0, 0, 1, 1], [], []>} : vector<8x16xf32>, vector<16x8xf32>, vector<8x8xf32> -> vector<8x8xf32>
    %309 = vector.extract_strided_slice %260 {offsets = [0, 18], sizes = [8, 6], strides = [1, 1]} : vector<8x24xf32> to vector<8x6xf32>
    %310 = vector.extract_strided_slice %254 {offsets = [0, 18], sizes = [16, 6], strides = [1, 1]} : vector<16x24xf32> to vector<16x6xf32>
    %311 = vector.extract_strided_slice %255 {offsets = [0, 24], sizes = [16, 8], strides = [1, 1]} : vector<16x32xf32> to vector<16x8xf32>
    %cst_87 = arith.constant dense<0.000000e+00> : vector<8x16xf32>
    %312 = tpu.matmul %309, %310, %cst_87 {dimension_numbers = #tpu.dot_dimension_numbers<[1], [1], [0], [0], [0, 0, 1, 0], [], []>} : vector<8x6xf32>, vector<16x6xf32>, vector<8x16xf32> -> vector<8x16xf32>
    %313 = arith.addf %312, %250 : vector<8x16xf32>
    %cst_88 = arith.constant dense<0xFF800000> : vector<8xf32>
    %314 = vector.multi_reduction <maximumf>, %313, %cst_88 [1] : vector<8x16xf32> to vector<8xf32>
    %315 = vector.shape_cast %314 : vector<8xf32> to vector<8x1xf32>
    %316 = vector.broadcast %315 : vector<8x1xf32> to vector<8x16xf32>
    %317 = arith.subf %313, %316 : vector<8x16xf32>
    %318 = math.exp %317 : vector<8x16xf32>
    %cst_89 = arith.constant dense<0.000000e+00> : vector<8xf32>
    %319 = vector.multi_reduction <add>, %318, %cst_89 [1] : vector<8x16xf32> to vector<8xf32>
    %320 = vector.shape_cast %319 : vector<8xf32> to vector<8x1xf32>
    %321 = tpu.reciprocal %320 {approx = true} : vector<8x1xf32> -> vector<8x1xf32>
    %322 = vector.broadcast %321 : vector<8x1xf32> to vector<8x16xf32>
    %323 = arith.mulf %318, %322 : vector<8x16xf32>
    %cst_90 = arith.constant dense<0.000000e+00> : vector<8x8xf32>
    %324 = tpu.matmul %323, %311, %cst_90 {dimension_numbers = #tpu.dot_dimension_numbers<[1], [0], [0], [1], [0, 0, 1, 1], [], []>} : vector<8x16xf32>, vector<16x8xf32>, vector<8x8xf32> -> vector<8x8xf32>
    %325 = tpu.concatenate %276, %292, %308, %324 in 1 : vector<8x8xf32>, vector<8x8xf32>, vector<8x8xf32>, vector<8x8xf32> -> vector<8x32xf32>
    %cst_91 = arith.constant dense<0.000000e+00> : vector<8x128xf32>
    %326 = tpu.matmul %325, %4, %cst_91 {dimension_numbers = #tpu.dot_dimension_numbers<[1], [0], [0], [1], [0, 0, 1, 1], [], []>} : vector<8x32xf32>, vector<32x128xf32>, vector<8x128xf32> -> vector<8x128xf32>
    %327 = vector.broadcast %11 : vector<1x128xf32> to vector<8x128xf32>
    %328 = arith.addf %326, %327 : vector<8x128xf32>
    %329 = vector.extract_strided_slice %328 {offsets = [0, 0], sizes = [8, 24], strides = [1, 1]} : vector<8x128xf32> to vector<8x24xf32>
    %330 = vector.extract_strided_slice %328 {offsets = [0, 24], sizes = [8, 32], strides = [1, 1]} : vector<8x128xf32> to vector<8x32xf32>
    %331 = vector.extract_strided_slice %328 {offsets = [0, 56], sizes = [8, 24], strides = [1, 1]} : vector<8x128xf32> to vector<8x24xf32>
    %332 = vector.extract_strided_slice %331 {offsets = [0, 0], sizes = [8, 6], strides = [1, 1]} : vector<8x24xf32> to vector<8x6xf32>
    %333 = vector.extract_strided_slice %329 {offsets = [0, 0], sizes = [8, 6], strides = [1, 1]} : vector<8x24xf32> to vector<8x6xf32>
    %334 = vector.extract_strided_slice %330 {offsets = [0, 0], sizes = [8, 8], strides = [1, 1]} : vector<8x32xf32> to vector<8x8xf32>
    %cst_92 = arith.constant dense<0.000000e+00> : vector<8x8xf32>
    %335 = tpu.matmul %332, %333, %cst_92 {dimension_numbers = #tpu.dot_dimension_numbers<[1], [1], [0], [0], [0, 0, 1, 0], [], []>} : vector<8x6xf32>, vector<8x6xf32>, vector<8x8xf32> -> vector<8x8xf32>
    %cst_93 = arith.constant dense<0xFF800000> : vector<8xf32>
    %336 = vector.multi_reduction <maximumf>, %335, %cst_93 [1] : vector<8x8xf32> to vector<8xf32>
    %337 = vector.shape_cast %336 : vector<8xf32> to vector<8x1xf32>
    %338 = vector.broadcast %337 : vector<8x1xf32> to vector<8x8xf32>
    %339 = arith.subf %335, %338 : vector<8x8xf32>
    %340 = math.exp %339 : vector<8x8xf32>
    %cst_94 = arith.constant dense<0.000000e+00> : vector<8xf32>
    %341 = vector.multi_reduction <add>, %340, %cst_94 [1] : vector<8x8xf32> to vector<8xf32>
    %342 = vector.shape_cast %341 : vector<8xf32> to vector<8x1xf32>
    %343 = tpu.reciprocal %342 {approx = true} : vector<8x1xf32> -> vector<8x1xf32>
    %344 = vector.broadcast %343 : vector<8x1xf32> to vector<8x8xf32>
    %345 = arith.mulf %340, %344 : vector<8x8xf32>
    %cst_95 = arith.constant dense<0.000000e+00> : vector<8x8xf32>
    %346 = tpu.matmul %345, %334, %cst_95 {dimension_numbers = #tpu.dot_dimension_numbers<[1], [0], [0], [1], [0, 0, 1, 1], [], []>} : vector<8x8xf32>, vector<8x8xf32>, vector<8x8xf32> -> vector<8x8xf32>
    %347 = vector.extract_strided_slice %331 {offsets = [0, 6], sizes = [8, 6], strides = [1, 1]} : vector<8x24xf32> to vector<8x6xf32>
    %348 = vector.extract_strided_slice %329 {offsets = [0, 6], sizes = [8, 6], strides = [1, 1]} : vector<8x24xf32> to vector<8x6xf32>
    %349 = vector.extract_strided_slice %330 {offsets = [0, 8], sizes = [8, 8], strides = [1, 1]} : vector<8x32xf32> to vector<8x8xf32>
    %cst_96 = arith.constant dense<0.000000e+00> : vector<8x8xf32>
    %350 = tpu.matmul %347, %348, %cst_96 {dimension_numbers = #tpu.dot_dimension_numbers<[1], [1], [0], [0], [0, 0, 1, 0], [], []>} : vector<8x6xf32>, vector<8x6xf32>, vector<8x8xf32> -> vector<8x8xf32>
    %cst_97 = arith.constant dense<0xFF800000> : vector<8xf32>
    %351 = vector.multi_reduction <maximumf>, %350, %cst_97 [1] : vector<8x8xf32> to vector<8xf32>
    %352 = vector.shape_cast %351 : vector<8xf32> to vector<8x1xf32>
    %353 = vector.broadcast %352 : vector<8x1xf32> to vector<8x8xf32>
    %354 = arith.subf %350, %353 : vector<8x8xf32>
    %355 = math.exp %354 : vector<8x8xf32>
    %cst_98 = arith.constant dense<0.000000e+00> : vector<8xf32>
    %356 = vector.multi_reduction <add>, %355, %cst_98 [1] : vector<8x8xf32> to vector<8xf32>
    %357 = vector.shape_cast %356 : vector<8xf32> to vector<8x1xf32>
    %358 = tpu.reciprocal %357 {approx = true} : vector<8x1xf32> -> vector<8x1xf32>
    %359 = vector.broadcast %358 : vector<8x1xf32> to vector<8x8xf32>
    %360 = arith.mulf %355, %359 : vector<8x8xf32>
    %cst_99 = arith.constant dense<0.000000e+00> : vector<8x8xf32>
    %361 = tpu.matmul %360, %349, %cst_99 {dimension_numbers = #tpu.dot_dimension_numbers<[1], [0], [0], [1], [0, 0, 1, 1], [], []>} : vector<8x8xf32>, vector<8x8xf32>, vector<8x8xf32> -> vector<8x8xf32>
    %362 = vector.extract_strided_slice %331 {offsets = [0, 12], sizes = [8, 6], strides = [1, 1]} : vector<8x24xf32> to vector<8x6xf32>
    %363 = vector.extract_strided_slice %329 {offsets = [0, 12], sizes = [8, 6], strides = [1, 1]} : vector<8x24xf32> to vector<8x6xf32>
    %364 = vector.extract_strided_slice %330 {offsets = [0, 16], sizes = [8, 8], strides = [1, 1]} : vector<8x32xf32> to vector<8x8xf32>
    %cst_100 = arith.constant dense<0.000000e+00> : vector<8x8xf32>
    %365 = tpu.matmul %362, %363, %cst_100 {dimension_numbers = #tpu.dot_dimension_numbers<[1], [1], [0], [0], [0, 0, 1, 0], [], []>} : vector<8x6xf32>, vector<8x6xf32>, vector<8x8xf32> -> vector<8x8xf32>
    %cst_101 = arith.constant dense<0xFF800000> : vector<8xf32>
    %366 = vector.multi_reduction <maximumf>, %365, %cst_101 [1] : vector<8x8xf32> to vector<8xf32>
    %367 = vector.shape_cast %366 : vector<8xf32> to vector<8x1xf32>
    %368 = vector.broadcast %367 : vector<8x1xf32> to vector<8x8xf32>
    %369 = arith.subf %365, %368 : vector<8x8xf32>
    %370 = math.exp %369 : vector<8x8xf32>
    %cst_102 = arith.constant dense<0.000000e+00> : vector<8xf32>
    %371 = vector.multi_reduction <add>, %370, %cst_102 [1] : vector<8x8xf32> to vector<8xf32>
    %372 = vector.shape_cast %371 : vector<8xf32> to vector<8x1xf32>
    %373 = tpu.reciprocal %372 {approx = true} : vector<8x1xf32> -> vector<8x1xf32>
    %374 = vector.broadcast %373 : vector<8x1xf32> to vector<8x8xf32>
    %375 = arith.mulf %370, %374 : vector<8x8xf32>
    %cst_103 = arith.constant dense<0.000000e+00> : vector<8x8xf32>
    %376 = tpu.matmul %375, %364, %cst_103 {dimension_numbers = #tpu.dot_dimension_numbers<[1], [0], [0], [1], [0, 0, 1, 1], [], []>} : vector<8x8xf32>, vector<8x8xf32>, vector<8x8xf32> -> vector<8x8xf32>
    %377 = vector.extract_strided_slice %331 {offsets = [0, 18], sizes = [8, 6], strides = [1, 1]} : vector<8x24xf32> to vector<8x6xf32>
    %378 = vector.extract_strided_slice %329 {offsets = [0, 18], sizes = [8, 6], strides = [1, 1]} : vector<8x24xf32> to vector<8x6xf32>
    %379 = vector.extract_strided_slice %330 {offsets = [0, 24], sizes = [8, 8], strides = [1, 1]} : vector<8x32xf32> to vector<8x8xf32>
    %cst_104 = arith.constant dense<0.000000e+00> : vector<8x8xf32>
    %380 = tpu.matmul %377, %378, %cst_104 {dimension_numbers = #tpu.dot_dimension_numbers<[1], [1], [0], [0], [0, 0, 1, 0], [], []>} : vector<8x6xf32>, vector<8x6xf32>, vector<8x8xf32> -> vector<8x8xf32>
    %cst_105 = arith.constant dense<0xFF800000> : vector<8xf32>
    %381 = vector.multi_reduction <maximumf>, %380, %cst_105 [1] : vector<8x8xf32> to vector<8xf32>
    %382 = vector.shape_cast %381 : vector<8xf32> to vector<8x1xf32>
    %383 = vector.broadcast %382 : vector<8x1xf32> to vector<8x8xf32>
    %384 = arith.subf %380, %383 : vector<8x8xf32>
    %385 = math.exp %384 : vector<8x8xf32>
    %cst_106 = arith.constant dense<0.000000e+00> : vector<8xf32>
    %386 = vector.multi_reduction <add>, %385, %cst_106 [1] : vector<8x8xf32> to vector<8xf32>
    %387 = vector.shape_cast %386 : vector<8xf32> to vector<8x1xf32>
    %388 = tpu.reciprocal %387 {approx = true} : vector<8x1xf32> -> vector<8x1xf32>
    %389 = vector.broadcast %388 : vector<8x1xf32> to vector<8x8xf32>
    %390 = arith.mulf %385, %389 : vector<8x8xf32>
    %cst_107 = arith.constant dense<0.000000e+00> : vector<8x8xf32>
    %391 = tpu.matmul %390, %379, %cst_107 {dimension_numbers = #tpu.dot_dimension_numbers<[1], [0], [0], [1], [0, 0, 1, 1], [], []>} : vector<8x8xf32>, vector<8x8xf32>, vector<8x8xf32> -> vector<8x8xf32>
    %392 = tpu.concatenate %346, %361, %376, %391 in 1 : vector<8x8xf32>, vector<8x8xf32>, vector<8x8xf32>, vector<8x8xf32> -> vector<8x32xf32>
    %cst_108 = arith.constant dense<0.000000e+00> : vector<8xf32>
    %393 = vector.multi_reduction <add>, %392, %cst_108 [1] : vector<8x32xf32> to vector<8xf32>
    %394 = vector.shape_cast %393 : vector<8xf32> to vector<8x1xf32>
    %cst_109 = arith.constant 3.200000e+01 : f32
    %395 = vector.broadcast %cst_109 : f32 to vector<8x1xf32>
    %396 = arith.divf %394, %395 : vector<8x1xf32>
    %397 = vector.broadcast %396 : vector<8x1xf32> to vector<8x32xf32>
    %398 = arith.subf %392, %397 : vector<8x32xf32>
    %399 = arith.mulf %398, %398 : vector<8x32xf32>
    %cst_110 = arith.constant dense<0.000000e+00> : vector<8xf32>
    %400 = vector.multi_reduction <add>, %399, %cst_110 [1] : vector<8x32xf32> to vector<8xf32>
    %401 = vector.shape_cast %400 : vector<8xf32> to vector<8x1xf32>
    %cst_111 = arith.constant 3.200000e+01 : f32
    %402 = vector.broadcast %cst_111 : f32 to vector<8x1xf32>
    %403 = arith.divf %401, %402 : vector<8x1xf32>
    %404 = vector.broadcast %396 : vector<8x1xf32> to vector<8x32xf32>
    %405 = arith.subf %392, %404 : vector<8x32xf32>
    %cst_112 = arith.constant 9.99999974E-6 : f32
    %406 = vector.broadcast %cst_112 : f32 to vector<8x1xf32>
    %407 = arith.addf %403, %406 : vector<8x1xf32>
    %408 = math.rsqrt %407 : vector<8x1xf32>
    %409 = vector.broadcast %408 : vector<8x1xf32> to vector<8x32xf32>
    %410 = arith.mulf %405, %409 : vector<8x32xf32>
    %411 = vector.broadcast %14 : vector<1x32xf32> to vector<8x32xf32>
    %412 = arith.mulf %410, %411 : vector<8x32xf32>
    %413 = vector.broadcast %15 : vector<1x32xf32> to vector<8x32xf32>
    %414 = arith.addf %412, %413 : vector<8x32xf32>
    %415 = vector.extract_strided_slice %256 {offsets = [0, 0], sizes = [16, 8], strides = [1, 1]} : vector<16x32xf32> to vector<16x8xf32>
    %cst_113 = arith.constant dense<0xFF800000> : vector<16xf32>
    %416 = vector.multi_reduction <maximumf>, %415, %cst_113 [1] : vector<16x8xf32> to vector<16xf32>
    %417 = vector.shape_cast %416 : vector<16xf32> to vector<16x1xf32>
    %418 = vector.broadcast %417 : vector<16x1xf32> to vector<16x8xf32>
    %419 = arith.subf %415, %418 : vector<16x8xf32>
    %420 = math.exp %419 : vector<16x8xf32>
    %cst_114 = arith.constant dense<0.000000e+00> : vector<16xf32>
    %421 = vector.multi_reduction <add>, %420, %cst_114 [1] : vector<16x8xf32> to vector<16xf32>
    %422 = vector.shape_cast %421 : vector<16xf32> to vector<16x1xf32>
    %423 = tpu.reciprocal %422 {approx = true} : vector<16x1xf32> -> vector<16x1xf32>
    %424 = vector.broadcast %423 : vector<16x1xf32> to vector<16x8xf32>
    %425 = arith.mulf %420, %424 : vector<16x8xf32>
    %426 = vector.extract_strided_slice %414 {offsets = [0, 0], sizes = [8, 8], strides = [1, 1]} : vector<8x32xf32> to vector<8x8xf32>
    %cst_115 = arith.constant dense<0.000000e+00> : vector<16x8xf32>
    %427 = tpu.matmul %425, %426, %cst_115 {dimension_numbers = #tpu.dot_dimension_numbers<[1], [0], [0], [1], [0, 0, 1, 1], [], []>} : vector<16x8xf32>, vector<8x8xf32>, vector<16x8xf32> -> vector<16x8xf32>
    %428 = vector.extract_strided_slice %256 {offsets = [0, 8], sizes = [16, 8], strides = [1, 1]} : vector<16x32xf32> to vector<16x8xf32>
    %cst_116 = arith.constant dense<0xFF800000> : vector<16xf32>
    %429 = vector.multi_reduction <maximumf>, %428, %cst_116 [1] : vector<16x8xf32> to vector<16xf32>
    %430 = vector.shape_cast %429 : vector<16xf32> to vector<16x1xf32>
    %431 = vector.broadcast %430 : vector<16x1xf32> to vector<16x8xf32>
    %432 = arith.subf %428, %431 : vector<16x8xf32>
    %433 = math.exp %432 : vector<16x8xf32>
    %cst_117 = arith.constant dense<0.000000e+00> : vector<16xf32>
    %434 = vector.multi_reduction <add>, %433, %cst_117 [1] : vector<16x8xf32> to vector<16xf32>
    %435 = vector.shape_cast %434 : vector<16xf32> to vector<16x1xf32>
    %436 = tpu.reciprocal %435 {approx = true} : vector<16x1xf32> -> vector<16x1xf32>
    %437 = vector.broadcast %436 : vector<16x1xf32> to vector<16x8xf32>
    %438 = arith.mulf %433, %437 : vector<16x8xf32>
    %439 = vector.extract_strided_slice %414 {offsets = [0, 8], sizes = [8, 8], strides = [1, 1]} : vector<8x32xf32> to vector<8x8xf32>
    %cst_118 = arith.constant dense<0.000000e+00> : vector<16x8xf32>
    %440 = tpu.matmul %438, %439, %cst_118 {dimension_numbers = #tpu.dot_dimension_numbers<[1], [0], [0], [1], [0, 0, 1, 1], [], []>} : vector<16x8xf32>, vector<8x8xf32>, vector<16x8xf32> -> vector<16x8xf32>
    %441 = vector.extract_strided_slice %256 {offsets = [0, 16], sizes = [16, 8], strides = [1, 1]} : vector<16x32xf32> to vector<16x8xf32>
    %cst_119 = arith.constant dense<0xFF800000> : vector<16xf32>
    %442 = vector.multi_reduction <maximumf>, %441, %cst_119 [1] : vector<16x8xf32> to vector<16xf32>
    %443 = vector.shape_cast %442 : vector<16xf32> to vector<16x1xf32>
    %444 = vector.broadcast %443 : vector<16x1xf32> to vector<16x8xf32>
    %445 = arith.subf %441, %444 : vector<16x8xf32>
    %446 = math.exp %445 : vector<16x8xf32>
    %cst_120 = arith.constant dense<0.000000e+00> : vector<16xf32>
    %447 = vector.multi_reduction <add>, %446, %cst_120 [1] : vector<16x8xf32> to vector<16xf32>
    %448 = vector.shape_cast %447 : vector<16xf32> to vector<16x1xf32>
    %449 = tpu.reciprocal %448 {approx = true} : vector<16x1xf32> -> vector<16x1xf32>
    %450 = vector.broadcast %449 : vector<16x1xf32> to vector<16x8xf32>
    %451 = arith.mulf %446, %450 : vector<16x8xf32>
    %452 = vector.extract_strided_slice %414 {offsets = [0, 16], sizes = [8, 8], strides = [1, 1]} : vector<8x32xf32> to vector<8x8xf32>
    %cst_121 = arith.constant dense<0.000000e+00> : vector<16x8xf32>
    %453 = tpu.matmul %451, %452, %cst_121 {dimension_numbers = #tpu.dot_dimension_numbers<[1], [0], [0], [1], [0, 0, 1, 1], [], []>} : vector<16x8xf32>, vector<8x8xf32>, vector<16x8xf32> -> vector<16x8xf32>
    %454 = vector.extract_strided_slice %256 {offsets = [0, 24], sizes = [16, 8], strides = [1, 1]} : vector<16x32xf32> to vector<16x8xf32>
    %cst_122 = arith.constant dense<0xFF800000> : vector<16xf32>
    %455 = vector.multi_reduction <maximumf>, %454, %cst_122 [1] : vector<16x8xf32> to vector<16xf32>
    %456 = vector.shape_cast %455 : vector<16xf32> to vector<16x1xf32>
    %457 = vector.broadcast %456 : vector<16x1xf32> to vector<16x8xf32>
    %458 = arith.subf %454, %457 : vector<16x8xf32>
    %459 = math.exp %458 : vector<16x8xf32>
    %cst_123 = arith.constant dense<0.000000e+00> : vector<16xf32>
    %460 = vector.multi_reduction <add>, %459, %cst_123 [1] : vector<16x8xf32> to vector<16xf32>
    %461 = vector.shape_cast %460 : vector<16xf32> to vector<16x1xf32>
    %462 = tpu.reciprocal %461 {approx = true} : vector<16x1xf32> -> vector<16x1xf32>
    %463 = vector.broadcast %462 : vector<16x1xf32> to vector<16x8xf32>
    %464 = arith.mulf %459, %463 : vector<16x8xf32>
    %465 = vector.extract_strided_slice %414 {offsets = [0, 24], sizes = [8, 8], strides = [1, 1]} : vector<8x32xf32> to vector<8x8xf32>
    %cst_124 = arith.constant dense<0.000000e+00> : vector<16x8xf32>
    %466 = tpu.matmul %464, %465, %cst_124 {dimension_numbers = #tpu.dot_dimension_numbers<[1], [0], [0], [1], [0, 0, 1, 1], [], []>} : vector<16x8xf32>, vector<8x8xf32>, vector<16x8xf32> -> vector<16x8xf32>
    %467 = tpu.concatenate %427, %440, %453, %466 in 1 : vector<16x8xf32>, vector<16x8xf32>, vector<16x8xf32>, vector<16x8xf32> -> vector<16x32xf32>
    %cst_125 = arith.constant dense<0.000000e+00> : vector<16x32xf32>
    %468 = tpu.matmul %467, %9, %cst_125 {dimension_numbers = #tpu.dot_dimension_numbers<[1], [0], [0], [1], [0, 0, 1, 1], [], []>} : vector<16x32xf32>, vector<32x32xf32>, vector<16x32xf32> -> vector<16x32xf32>
    %469 = vector.broadcast %13 : vector<1x32xf32> to vector<16x32xf32>
    %470 = arith.addf %468, %469 : vector<16x32xf32>
    %471 = tpu.concatenate %243, %470 in 1 : vector<16x32xf32>, vector<16x32xf32> -> vector<16x64xf32>
    %c0_126 = arith.constant 0 : index
    %c0_127 = arith.constant 0 : index
    %472 = vector.load %arg6[%c0_126, %c0_127] : memref<16x64xf32, #tpu.memory_space<vmem>>, vector<16x64xf32>
    tpu.vector_store %arg6[%c0_126, %c0_127], %471 {strides = array<i32>} : memref<16x64xf32, #tpu.memory_space<vmem>>, vector<16x64xf32>,
    %473 = tpu.concatenate %98, %325 in 1 : vector<8x32xf32>, vector<8x32xf32> -> vector<8x64xf32>
    %c0_128 = arith.constant 0 : index
    %c0_129 = arith.constant 0 : index
    %474 = vector.load %arg7[%c0_128, %c0_129] : memref<8x64xf32, #tpu.memory_space<vmem>>, vector<8x64xf32>
    tpu.vector_store %arg7[%c0_128, %c0_129], %473 {strides = array<i32>} : memref<8x64xf32, #tpu.memory_space<vmem>>, vector<8x64xf32>,
    return
  }
  func.func @transform_0(%arg0: i32) -> (i32, i32) {
    %c0_i32 = arith.constant 0 : i32
    %c0_i32_0 = arith.constant 0 : i32
    %c0_i32_1 = arith.constant 0 : i32
    return %c0_i32, %c0_i32_0 : i32, i32
  }
  func.func @transform_1(%arg0: i32) -> (i32, i32) {
    %c0_i32 = arith.constant 0 : i32
    %c0_i32_0 = arith.constant 0 : i32
    %c0_i32_1 = arith.constant 0 : i32
    return %c0_i32, %c0_i32_0 : i32, i32
  }
  func.func @transform_2(%arg0: i32) -> (i32, i32) {
    %c0_i32 = arith.constant 0 : i32
    %c0_i32_0 = arith.constant 0 : i32
    %c0_i32_1 = arith.constant 0 : i32
    return %c0_i32, %c0_i32_0 : i32, i32
  }
  func.func @transform_3(%arg0: i32) -> (i32, i32, i32) {
    %c0_i32 = arith.constant 0 : i32
    %c0_i32_0 = arith.constant 0 : i32
    %c0_i32_1 = arith.constant 0 : i32
    %c0_i32_2 = arith.constant 0 : i32
    return %c0_i32, %c0_i32_0, %c0_i32_1 : i32, i32, i32
  }
  func.func @transform_4(%arg0: i32) -> (i32, i32) {
    %c0_i32 = arith.constant 0 : i32
    %c0_i32_0 = arith.constant 0 : i32
    %c0_i32_1 = arith.constant 0 : i32
    return %c0_i32, %c0_i32_0 : i32, i32
  }
  func.func @transform_5(%arg0: i32) -> (i32, i32) {
    %c0_i32 = arith.constant 0 : i32
    %c0_i32_0 = arith.constant 0 : i32
    %c0_i32_1 = arith.constant 0 : i32
    return %c0_i32, %c0_i32_0 : i32, i32
  }
  func.func @transform_6(%arg0: i32) -> (i32, i32) {
    %c0_i32 = arith.constant 0 : i32
    %c0_i32_0 = arith.constant 0 : i32
    %c0_i32_1 = arith.constant 0 : i32
    return %c0_i32, %c0_i32_0 : i32, i32
  }
}

</mosaic_0001>

<bundles_post_ra>
// kernel: dba_attention_forward.1
= control target key start
LH: loop header
LB: loop body
LE: loop exit
PB: predicated region body
PF: predicated region fallthrough
CT: control target
= control target key end

     0   :  { %12 = vsyncpa [#allocation3], 0  ;;  %s5277_s21 = smov [#allocation2]   ;;  %s6060_s0 = inlined_call_operand.vmem [shape: f32[16,64], index: 0, kind: input, shape index: {}]   ;;  %s6061_s1 = inlined_call_operand.vmem [shape: f32[8,64], index: 1, kind: input, shape index: {}]   ;;  %s6062_s2 = inlined_call_operand.vmem [shape: f32[2,16], index: 2, kind: input, shape index: {}]   ;;  %s6063_s3 = inlined_call_operand.hbm [shape: f32[4,32,128], index: 3, kind: input, shape index: {}]   ;;  %s6064_s4 = inlined_call_operand.vmem [shape: f32[8,128], index: 4, kind: input, shape index: {}]   ;;  %s6065_s5 = inlined_call_operand.vmem [shape: f32[16,64], index: 5, kind: output, shape index: {0}]   ;;  %s6066_s6 = inlined_call_operand.vmem [shape: f32[8,64], index: 6, kind: output, shape index: {1}]  }
   0x1   :  { %s24_s22 = sshll.u32 %s5277_s21, 4  ;;  %s25_s22 = int_to_ptr.vmem [resolvable:$true] %s24_s22 }
   0x2   :  { %s5263_s23 = scalar_lea.vmem %s25_s22, 2048  ;;  %p5268_p1 = scmp.lt.s32.totalorder %s25_s22, %s25_s22 }
   0x3   :  { %p5264_p0 = scmp.ne.s32.totalorder %s25_s22, %s5263_s23  ;;  %p5269_p2 = scmp.lt.s32.totalorder %s5263_s23, %s5263_s23 }
   0x5   :  { %p5270_p3 = por %p5269_p2, %p5268_p1 }
   0x7   :  { %p5271_p4 = pnand %p5270_p3, %p5264_p0 }
   0x9   :  { %5274 = shalt.err (!%p5271_p4)
}
   0xa   :  { %s5278_s24 = smov 128   ;;  %s5279_s25 = smov 8  }
   0xb   :  { %30 = dma.hbm_to_vmem [thread:$0]  %s6063_s3, 2048, %s25_s22, [#allocation3], %s5278_s24, %s5278_s24, %s5279_s25  }
   0xc   :  { %5275 = dma.done.wait [#allocation3], 2048  }
   0xd   :  { %5276 = vsyncadd [#allocation3], 4294965248  ;;  %v5280_v0 = vmov 0.0   ;;  %vm5281_vm0 = vmmov 0   ;;  %v40_v1 = vld [vmem:[#allocation2 + $0x18] sm:$0xff]  ;;  %v39_v2 = vld [vmem:[#allocation2 + $0x10] sm:$0xff]  ;;  %v61_v12 = vlaneseq }
   0xe   :  { %4770 = vmatprep.subr.mxu1 %v5280_v0  ;;  %4778 = vmatprep.mubr.msk.f32.mxu1 %vm5281_vm0, %v5280_v0  ;;  %vm69_vm1 = vcmask 261120   ;;  %v50_v3 = vld [vmem:[#allocation2 + $0x58] sm:$0xff]  ;;  %v57_v4 = vld [vmem:[%s6060_s0] sm:$0xff]  ;;  %v38_v5 = vld [vmem:[#allocation2 + $0x8] sm:$0xff]  ;;  %vm228_vm2 = vcmask 48128   ;;  %s5282_s11 = smov 104  }
   0xf   :  { %4759 = vmatprep.subr.mxu0 %v40_v1  ;;  %4771 = vmatpush3.msra.mxu1 %v50_v3  ;;  %v49_v6 = vld [vmem:[#allocation2 + $0x50] sm:$0xff]  ;;  %v37_v7 = vld [vmem:[#allocation2] sm:$0xff]  ;;  %v48_v8 = vld [vmem:[#allocation2 + $0x48] sm:$0xff]  ;;  %v5364_v13 = vshrl.u32 %v61_v12, 7  ;;  %s5283_s12 = smov 122   ;;  %s5284_s13 = smov 116  }
  0x10   :  { %4760 = vmatpush3.msra.mxu0 %v40_v1  ;;  %4767 = vmatprep.mubr.msk.f32.mxu0 %vm69_vm1, %v57_v4  ;;  %v58_v9 = vld [vmem:[%s6060_s0 + $0x8] sm:$0xff]  ;;  %v47_v10 = vld [vmem:[#allocation2 + $0x40] sm:$0xff]  ;;  %vm308_vm3 = vcmask 130048   ;;  %s5286_s16 = smov 88   ;;  %s5287_s17 = smov 110   ;;  %vm927_vm4 = vcmask 64512  }
  0x11   :  { %4761 = vmatprep.subr.mxu0 %v39_v2  ;;  %4772 = vmatprep.subr.mxu1 %v5280_v0  ;;  %v59_v11 = vld [vmem:[%s6061_s1] sm:$0xff]  ;;  %v63_v14 = vsub.s32 0, %v5364_v13  ;;  %v153_v17 = vsub.s32 2, %v5364_v13  ;;  %s5288_s18 = smov 80   ;;  %s5289_s19 = smov 16   ;;  %vm930_vm5 = vcmask 195584  }
  0x12   :  { %4762 = vmatpush3.msra.mxu0 %v39_v2  ;;  %4773 = vmatpush3.msra.mxu1 %v49_v6  ;;  %v5370_v15 = vld [vmem:[%s6064_s4] sm:$0xff]  ;;  %s5290_s20 = smov 24   ;;  %s5291_s21 = smov 72   ;;  %vm1707_vm6 = vcmask 523712   ;;  %vm1823_vm7 = vcmask 589312   ;;  %vm1943_vm8 = vcmask 654912  }
  0x13   :  { %4763 = vmatprep.subr.mxu0 %v38_v5  ;;  %4774 = vmatprep.subr.mxu1 %v5280_v0  ;;  %v5373_v16 = vrot.slane %v5370_v15, %v63_v14  ;;  %v5380_v22 = vrot.slane %v5370_v15, %v153_v17  ;;  %v56_v33 = vld [vmem:[%s6062_s2] sm:$0x3]  ;;  %s5285_s2 = smov 96   ;;  %s5292_s22 = smov 66   ;;  %vm2062_vm9 = vcmask 720512   ;;  %vm4510_vm10 = vcmask 523264  }
  0x14   :  { %4764 = vmatpush3.msra.mxu0 %v38_v5  ;;  %4775 = vmatpush3.msra.mxu1 %v48_v8  ;;  %v5424_v34 = vmul.f32 -1e+30, %v56_v33  ;;  %s5293_s23 = smov 60   ;;  %s5294_s24 = smov 54  }
  0x15   :  { %4765 = vmatprep.subr.mxu0 %v37_v7  ;;  %4776 = vmatprep.subr.mxu1 %v5280_v0  ;;  %s5295_s26 = smov 64   ;;  %s5296_s27 = smov 56  }
  0x16   :  { %4766 = vmatpush3.msra.mxu0 %v37_v7  ;;  %4777 = vmatpush3.msra.mxu1 %v47_v10  ;;  %v5427_v35 = vrot.slane %v5424_v34, %v63_v14  ;;  %s5297_s28 = smov 48   ;;  %s5298_s29 = smov 112  }
  0x17   :  { %4768 = vmatmul.mubr.msk.f32.vlgmr.msra.gmra.mxu0 %vm69_vm1, %v58_v9  ;;  %4779 = vmatmul.mubr.msk.f32.vlgmr.msra.gmra.mxu1 %vm69_vm1, %v59_v11  ;;  %s5299_s3 = smov 120  }
  0x18   :  { %4781 = vmatprep.subr.mxu0 %v5280_v0  ;;  %4785 = vmatprep.mubr.msk.f32.mxu0 %vm5281_vm0, %v5280_v0 }
  0x19   :  { %4788 = vmatprep.subr.mxu1 %v5280_v0  ;;  %4792 = vmatprep.mubr.msk.f32.mxu1 %vm5281_vm0, %v5280_v0 }
  0xd7   :  { %v4769_v18 = vpop.f32.mrf.mxu0  ;;  %v224_v20 = vpop.f32.mrf.mxu1 }
  0xd8   :  { %v5377_v19 = vadd.f32 %v4769_v18, %v5373_v16  ;;  %v5391_v25 = vadd.f32 %v224_v20, %v5380_v22 }
  0xd9   :  { %v142_v21 = vpop.f32.mrf.mxu0  ;;  %v4780_v23 = vpop.f32.mrf.mxu1 }
  0xda   :  { %322 = vrot.lane.b32.xlu1 %v5377_v19, %s5282_s11  ;;  %4782 = vmatpush3.xpose.msk.msra.mxu0 %vm228_vm2, %v5377_v19  ;;  %v5388_v24 = vadd.f32 %v142_v21, %v5373_v16 }
  0xdb   :  { %4783 = vmatprep.subr.mxu0 %v5280_v0 }
  0xde   :  { %320 = vrot.lane.b32.xlu1 %v5388_v24, %s5282_s11  ;;  %4784 = vmatpush3.xpose.msk.msra.mxu0 %vm228_vm2, %v5388_v24 }
  0xdf   :  { %4809 = vmatprep.subr.mxu0 %v5280_v0 }
  0xe1   :  { %4786 = vmatmul.mubr.msk.f32.vlgmr.msra.gmra.mxu0 %vm228_vm2, %v5391_v25 }
  0xe2   :  { %401 = vrot.lane.b32.xlu1 %v5388_v24, %s5283_s12  ;;  %4813 = vmatprep.mubr.msk.f32.mxu0 %vm5281_vm0, %v5280_v0 }
  0xe6   :  { %575 = vrot.lane.b32.xlu1 %v5377_v19, %s5284_s13 }
  0xea   :  { %399 = vrot.lane.b32.xlu1 %v5391_v25, %s5283_s12 }
  0xee   :  { %573 = vrot.lane.b32.xlu1 %v5388_v24, %s5284_s13 }
  0xf2   :  { %571 = vrot.lane.b32.xlu1 %v5391_v25, %s5284_s13 }
 0x14c   :  { %v323_v26 = vpop.permute.xlu1 %322 }
 0x14d   :  { %4789 = vmatpush3.msra.mxu1 %v323_v26 }
 0x14e   :  { %4790 = vmatprep.subr.mxu1 %v5280_v0 }
 0x150   :  { %v321_v27 = vpop.permute.xlu1 %320 }
 0x151   :  { %4791 = vmatpush3.msra.mxu1 %v321_v27 }
 0x152   :  { %4795 = vmatprep.subr.mxu1 %v5280_v0 }
 0x154   :  { %v402_v28 = vpop.permute.xlu1 %401 }
 0x158   :  { %v576_v29 = vpop.permute.xlu1 %575 }
 0x159   :  { %4810 = vmatpush3.xpose.msk.msra.mxu0 %vm228_vm2, %v576_v29 }
 0x15a   :  { %4811 = vmatprep.subr.mxu0 %v5280_v0 }
 0x15c   :  { %v400_v30 = vpop.permute.xlu1 %399 }
 0x160   :  { %v574_v31 = vpop.permute.xlu1 %573 }
 0x161   :  { %4812 = vmatpush3.xpose.msk.msra.mxu0 %vm228_vm2, %v574_v31 }
 0x162   :  { %4830 = vmatprep.subr.mxu0 %v5280_v0 }
 0x164   :  { %v572_v32 = vpop.permute.xlu1 %571 }
 0x165   :  { %4814 = vmatmul.mubr.msk.f32.vlgmr.msra.gmra.mxu0 %vm228_vm2, %v572_v32 }
 0x166   :  { %4834 = vmatprep.mubr.msk.f32.mxu0 %vm5281_vm0, %v5280_v0 }
 0x1a1   :  { %v304_v36 = vpop.f32.mrf.mxu0 }
 0x1a2   :  { %v305_v37 = vadd.f32 %v304_v36, %v5427_v35 }
 0x1a3   :  { %v4787_v38 = vpop.f32.mrf.mxu0 }
 0x1a4   :  { %v309_v39 = vsel %vm308_vm3, %v305_v37, -inf }
 0x1a5   :  { %310 = vmax.xlane.f32.xlu0 %v309_v39 }
 0x225   :  { %v649_v40 = vpop.f32.mrf.mxu0 }
 0x226   :  { %v650_v47 = vadd.f32 %v649_v40, %v5427_v35 }
 0x227   :  { %v4815_v41 = vpop.f32.mrf.mxu0 }
 0x228   :  { %v653_v48 = vsel %vm308_vm3, %v650_v47, -inf }
 0x22e   :  { %v311_v42 = vpop.xlane.xlu0 %310 }
 0x22f   :  { %v312_v43 = vsub.f32 %v305_v37, %v311_v42 }
 0x231   :  { %v313_v44 = vmul.f32 1.442695, %v312_v43 }
 0x233   :  { %5103 = vpow2.f32 %v313_v44  ;;  %v45_v44 = vld [vmem:[#allocation2 + $0x38] sm:$0xff] }
 0x240   :  { %v5104_v45 = vpop.eup %5103 }
 0x241   :  { %v315_v46 = vsel %vm308_vm3, %v5104_v45, 0.0 }
 0x242   :  { %316 = vadd.xlane.f32.xlu0 %v315_v46  ;;  %v43_v46 = vld [vmem:[#allocation2 + $0x28] sm:$0xff] }
 0x258   :  { %403 = vrot.lane.b32.xlu0 %v5377_v19, %s5283_s12 }
 0x277   :  { %654 = vmax.xlane.f32.xlu0 %v653_v48 }
 0x28d   :  { %494 = vrot.lane.b32.xlu0 %v5377_v19, %s5285_s2 }
 0x2cb   :  { %v317_v49 = vpop.xlane.xlu0 %316 }
 0x2cc   :  { %5105 = vrcp.f32 %v317_v49 }
 0x2cf   :  { %v404_v52 = vpop.permute.xlu0 %403 }
 0x2d9   :  { %v5106_v50 = vpop.eup %5105 }
 0x2da   :  { %v319_v51 = vmul.f32 %v5106_v50, %v5104_v45  ;;  %v44_v45 = vld [vmem:[#allocation2 + $0x30] sm:$0xff] }
 0x2dc   :  { %4793 = vmatmul.mubr.msk.f32.vlgmr.msra.gmra.mxu1 %vm308_vm3, %v319_v51 }
 0x2dd   :  { %4796 = vmatpush3.xpose.msk.msra.mxu1 %vm228_vm2, %v404_v52  ;;  %4799 = vmatprep.mubr.msk.f32.mxu1 %vm5281_vm0, %v5280_v0 }
 0x2de   :  { %4797 = vmatprep.subr.mxu1 %v5280_v0 }
 0x2e1   :  { %4798 = vmatpush3.xpose.msk.msra.mxu1 %vm228_vm2, %v402_v28 }
 0x2e2   :  { %4802 = vmatprep.subr.mxu1 %v5280_v0 }
 0x2e4   :  { %4800 = vmatmul.mubr.msk.f32.vlgmr.msra.gmra.mxu1 %vm228_vm2, %v400_v30 }
 0x2e5   :  { %4806 = vmatprep.mubr.msk.f32.mxu1 %vm5281_vm0, %v5280_v0 }
 0x300   :  { %v655_v53 = vpop.xlane.xlu0 %654 }
 0x301   :  { %v656_v55 = vsub.f32 %v650_v47, %v655_v53  ;;  %v42_v47 = vld [vmem:[#allocation2 + $0x20] sm:$0xff] }
 0x303   :  { %v657_v56 = vmul.f32 1.442695, %v656_v55 }
 0x304   :  { %v495_v54 = vpop.permute.xlu0 %494 }
 0x305   :  { %4803 = vmatpush3.msra.mxu1 %v495_v54  ;;  %5107 = vpow2.f32 %v657_v56  ;;  %v934_v56 = vsub.s32 1, %v5364_v13 }
 0x306   :  { %4804 = vmatprep.subr.mxu1 %v5280_v0 }
 0x312   :  { %v5108_v63 = vpop.eup %5107 }
 0x313   :  { %v659_v1 = vsel %vm308_vm3, %v5108_v63, 0.0 }
 0x39c   :  { %v5449_v57 = vpop.f32.mrf.mxu1 }
 0x39e   :  { %v4794_v58 = vpop.f32.mrf.mxu1 }
 0x39f   :  { %v5516_v58 = vrot.slane %v5370_v15, %v934_v56 }
 0x3a4   :  { %v477_v59 = vpop.f32.mrf.mxu1 }
 0x3a5   :  { %v478_v60 = vadd.f32 %v477_v59, %v5427_v35 }
 0x3a6   :  { %v4801_v61 = vpop.f32.mrf.mxu1 }
 0x3a7   :  { %v481_v62 = vsel %vm308_vm3, %v478_v60, -inf }
 0x3a8   :  { %482 = vmax.xlane.f32.xlu1 %v481_v62 }
 0x3ac   :  { %660 = vadd.xlane.f32.xlu1 %v659_v1 }
 0x3bd   :  { %492 = vrot.lane.b32.xlu1 %v5388_v24, %s5285_s2 }
 0x3c1   :  { %666 = vrot.lane.b32.xlu1 %v5377_v19, %s5286_s16 }
 0x3c5   :  { %747 = vrot.lane.b32.xlu1 %v5377_v19, %s5287_s17 }
 0x3c9   :  { %743 = vrot.lane.b32.xlu1 %v5391_v25, %s5287_s17 }
 0x431   :  { %v483_v2 = vpop.xlane.xlu1 %482 }
 0x432   :  { %v484_v3 = vsub.f32 %v478_v60, %v483_v2 }
 0x434   :  { %v485_v4 = vmul.f32 1.442695, %v484_v3 }
 0x435   :  { %v661_v5 = vpop.xlane.xlu1 %660 }
 0x436   :  { %5109 = vpow2.f32 %v485_v4 }
 0x439   :  { %v493_v6 = vpop.permute.xlu1 %492 }
 0x43a   :  { %4805 = vmatpush3.msra.mxu1 %v493_v6 }
 0x43b   :  { %4816 = vmatprep.subr.mxu1 %v5280_v0 }
 0x43d   :  { %v667_v11 = vpop.permute.xlu1 %666 }
 0x441   :  { %v748_v20 = vpop.permute.xlu1 %747 }
 0x443   :  { %v5110_v7 = vpop.eup %5109 }
 0x444   :  { %v487_v8 = vsel %vm308_vm3, %v5110_v7, 0.0 }
 0x445   :  { %488 = vadd.xlane.f32.xlu0 %v487_v8  ;;  %v744_v23 = vpop.permute.xlu1 %743 }
 0x45b   :  { %664 = vrot.lane.b32.xlu0 %v5388_v24, %s5286_s16 }
 0x45f   :  { %745 = vrot.lane.b32.xlu0 %v5388_v24, %s5287_s17 }
 0x4ce   :  { %v489_v9 = vpop.xlane.xlu0 %488 }
 0x4cf   :  { %5111 = vrcp.f32 %v489_v9 }
 0x4d0   :  { %5113 = vrcp.f32 %v661_v5 }
 0x4d2   :  { %v665_v17 = vpop.permute.xlu0 %664 }
 0x4d6   :  { %v746_v21 = vpop.permute.xlu0 %745 }
 0x4dc   :  { %v5112_v10 = vpop.eup %5111 }
 0x4dd   :  { %v491_v12 = vmul.f32 %v5112_v10, %v5110_v7  ;;  %v5114_v14 = vpop.eup %5113 }
 0x4de   :  { %v663_v18 = vmul.f32 %v5114_v14, %v5108_v63 }
 0x4df   :  { %4807 = vmatmul.mubr.msk.f32.vlgmr.msra.gmra.mxu1 %vm308_vm3, %v491_v12 }
 0x4e0   :  { %4817 = vmatpush3.msra.mxu1 %v667_v11  ;;  %4820 = vmatprep.mubr.msk.f32.mxu1 %vm5281_vm0, %v5280_v0 }
 0x4e1   :  { %4818 = vmatprep.subr.mxu1 %v5280_v0 }
 0x4e2   :  { %4819 = vmatpush3.msra.mxu1 %v665_v17 }
 0x4e3   :  { %4823 = vmatprep.subr.mxu1 %v5280_v0  ;;  %4821 = vmatmul.mubr.msk.f32.vlgmr.msra.gmra.mxu1 %vm308_vm3, %v663_v18 }
 0x4e4   :  { %4824 = vmatpush3.xpose.msk.msra.mxu1 %vm228_vm2, %v748_v20  ;;  %4827 = vmatprep.mubr.msk.f32.mxu1 %vm5281_vm0, %v5280_v0 }
 0x4e5   :  { %4825 = vmatprep.subr.mxu1 %v5280_v0 }
 0x4e8   :  { %4826 = vmatpush3.xpose.msk.msra.mxu1 %vm228_vm2, %v746_v21 }
 0x4e9   :  { %4848 = vmatprep.subr.mxu1 %v5280_v0 }
 0x4eb   :  { %4828 = vmatmul.mubr.msk.f32.vlgmr.msra.gmra.mxu1 %vm228_vm2, %v744_v23 }
 0x4ec   :  { %4850 = vmatprep.mubr.msk.f32.mxu1 %vm5281_vm0, %v5280_v0 }
 0x59f   :  { %v567_v25 = vpop.f32.mrf.mxu1 }
 0x5a1   :  { %v4808_v26 = vpop.f32.mrf.mxu1 }
 0x5a3   :  { %v739_v27 = vpop.f32.mrf.mxu1 }
 0x5a5   :  { %v4822_v28 = vpop.f32.mrf.mxu1 }
 0x5ab   :  { %v821_v29 = vpop.f32.mrf.mxu1 }
 0x5ac   :  { %v822_v30 = vadd.f32 %v821_v29, %v5427_v35 }
 0x5ad   :  { %v4829_v31 = vpop.f32.mrf.mxu1 }
 0x5ae   :  { %v825_v32 = vsel %vm308_vm3, %v822_v30, -inf }
 0x5af   :  { %826 = vmax.xlane.f32.xlu0 %v825_v32 }
 0x5c5   :  { %838 = vrot.lane.b32.xlu0 %v5377_v19, %s5288_s18 }
 0x5c9   :  { %916 = vrot.lane.b32.xlu0 %v567_v25, %s5279_s25 }
 0x638   :  { %v827_v33 = vpop.xlane.xlu0 %826 }
 0x639   :  { %v828_v36 = vsub.f32 %v822_v30, %v827_v33 }
 0x63b   :  { %v829_v37 = vmul.f32 1.442695, %v828_v36 }
 0x63c   :  { %v839_v38 = vpop.permute.xlu0 %838 }
 0x63d   :  { %5115 = vpow2.f32 %v829_v37  ;;  %4831 = vmatpush3.msra.mxu0 %v839_v38 }
 0x63e   :  { %4832 = vmatprep.subr.mxu0 %v5280_v0 }
 0x640   :  { %v917_v50 = vpop.permute.xlu0 %916 }
 0x641   :  { %v928_v52 = vsel %vm927_vm4, %v5449_v57, %v917_v50  ;;  %v1947_v50 = vsel %vm1943_vm8, %v5377_v19, -inf }
 0x64a   :  { %v5116_v39 = vpop.eup %5115 }
 0x64b   :  { %v831_v35 = vsel %vm308_vm3, %v5116_v39, 0.0 }
 0x64c   :  { %832 = vadd.xlane.f32.xlu1 %v831_v35 }
 0x65d   :  { %836 = vrot.lane.b32.xlu1 %v5388_v24, %s5288_s18 }
 0x661   :  { %920 = vrot.lane.b32.xlu1 %v739_v27, %s5289_s19 }
 0x6d5   :  { %v833_v40 = vpop.xlane.xlu1 %832 }
 0x6d6   :  { %5117 = vrcp.f32 %v833_v40 }
 0x6d9   :  { %v837_v41 = vpop.permute.xlu1 %836 }
 0x6da   :  { %4833 = vmatpush3.msra.mxu0 %v837_v41 }
 0x6db   :  { %4837 = vmatprep.subr.mxu0 %v5280_v0 }
 0x6dd   :  { %v921_v51 = vpop.permute.xlu1 %920 }
 0x6de   :  { %v929_v53 = vsel %vm308_vm3, %v928_v52, %v921_v51  ;;  %v2063_v51 = vsel %vm2062_vm9, %v5388_v24, -inf  ;;  %v2066_v52 = vsel %vm2062_vm9, %v5377_v19, -inf }
 0x6e3   :  { %v5118_v42 = vpop.eup %5117 }
 0x6e4   :  { %v835_v43 = vmul.f32 %v5118_v42, %v5116_v39 }
 0x6e6   :  { %4835 = vmatmul.mubr.msk.f32.vlgmr.msra.gmra.mxu0 %vm308_vm3, %v835_v43 }
 0x6e7   :  { %4845 = vmatprep.mubr.msk.f32.mxu0 %vm5281_vm0, %v5280_v0  ;;  %4838 = vmatpush3.msra.mxu0 %v45_v44 }
 0x6e8   :  { %4839 = vmatprep.subr.mxu0 %v5280_v0 }
 0x6e9   :  { %4840 = vmatpush3.msra.mxu0 %v44_v45  ;;  %v1708_v45 = vsel %vm1707_vm6, %v5388_v24, -inf }
 0x6ea   :  { %4841 = vmatprep.subr.mxu0 %v5280_v0 }
 0x6eb   :  { %4842 = vmatpush3.msra.mxu0 %v43_v46  ;;  %v1711_v46 = vsel %vm1707_vm6, %v5377_v19, -inf }
 0x6ec   :  { %4843 = vmatprep.subr.mxu0 %v5280_v0 }
 0x6ed   :  { %4844 = vmatpush3.msra.mxu0 %v42_v47  ;;  %v1824_v47 = vsel %vm1823_vm7, %v5388_v24, -inf }
 0x6ee   :  { %4858 = vmatprep.subr.mxu0 %v5280_v0 }
 0x7a6   :  { %v911_v48 = vpop.f32.mrf.mxu0 }
 0x7a7   :  { %924 = vrot.lane.b32.xlu0 %v911_v48, %s5290_s20  ;;  %v1827_v48 = vsel %vm1823_vm7, %v5377_v19, -inf }
 0x7a8   :  { %v4836_v49 = vpop.f32.mrf.mxu0 }
 0x7a9   :  { %v1944_v49 = vsel %vm1943_vm8, %v5388_v24, -inf }
 0x819   :  { %v925_v54 = vpop.permute.xlu0 %924 }
 0x81a   :  { %v5506_v55 = vsel %vm930_vm5, %v929_v53, %v925_v54 }
 0x81b   :  { %4846 = vmatmul.mubr.msk.f32.vlgmr.msra.gmra.mxu0 %vm69_vm1, %v5506_v55 }
 0x81c   :  { %4860 = vmatprep.mubr.msk.f32.mxu0 %vm5281_vm0, %v5280_v0 }
 0x8db   :  { %v1005_v57 = vpop.f32.mrf.mxu0 }
 0x8dc   :  { %v5519_v59 = vadd.f32 %v1005_v57, %v5516_v58 }
 0x8dd   :  { %v4847_v60 = vpop.f32.mrf.mxu0 }
 0x8de   :  { %1175 = vrot.lane.b32.xlu0 %v5519_v59, %s5283_s12  ;;  %1010 = vrot.lane.b32.xlu1 %v5519_v59, %s5291_s21 }
 0x8df   :  { %4849 = vmatpush3.xpose.msk.msra.mxu1 %vm228_vm2, %v5519_v59 }
 0x8e0   :  { %4853 = vmatprep.subr.mxu1 %v5280_v0 }
 0x8e2   :  { %1340 = vrot.lane.b32.xlu0 %v5519_v59, %s5284_s13  ;;  %1173 = vrot.lane.b32.xlu1 %v5519_v59, %s5292_s22 }
 0x8e6   :  { %1505 = vrot.lane.b32.xlu0 %v5519_v59, %s5287_s17  ;;  %1338 = vrot.lane.b32.xlu1 %v5519_v59, %s5293_s23 }
 0x8ea   :  { %1503 = vrot.lane.b32.xlu1 %v5519_v59, %s5294_s24 }
 0x950   :  { %v1176_v61 = vpop.permute.xlu0 %1175  ;;  %v1011_v62 = vpop.permute.xlu1 %1010 }
 0x951   :  { %4851 = vmatmul.mubr.msk.f32.vlgmr.msra.gmra.mxu1 %vm228_vm2, %v1011_v62  ;;  %4859 = vmatpush3.xpose.msk.msra.mxu0 %vm228_vm2, %v1176_v61 }
 0x952   :  { %4868 = vmatprep.subr.mxu0 %v5280_v0  ;;  %4855 = vmatprep.mubr.msk.f32.mxu1 %vm5281_vm0, %v5280_v0 }
 0x954   :  { %v1341_v63 = vpop.permute.xlu0 %1340  ;;  %v1174_v1 = vpop.permute.xlu1 %1173 }
 0x955   :  { %4861 = vmatmul.mubr.msk.f32.vlgmr.msra.gmra.mxu0 %vm228_vm2, %v1174_v1 }
 0x956   :  { %4869 = vmatpush3.xpose.msk.msra.mxu0 %vm228_vm2, %v1341_v63  ;;  %4870 = vmatprep.mubr.msk.f32.mxu0 %vm5281_vm0, %v5280_v0 }
 0x957   :  { %4878 = vmatprep.subr.mxu0 %v5280_v0 }
 0x958   :  { %v1506_v2 = vpop.permute.xlu0 %1505  ;;  %v1339_v3 = vpop.permute.xlu1 %1338 }
 0x959   :  { %4871 = vmatmul.mubr.msk.f32.vlgmr.msra.gmra.mxu0 %vm228_vm2, %v1339_v3 }
 0x95a   :  { %4879 = vmatpush3.xpose.msk.msra.mxu0 %vm228_vm2, %v1506_v2  ;;  %4880 = vmatprep.mubr.msk.f32.mxu0 %vm5281_vm0, %v5280_v0 }
 0x95c   :  { %v1504_v4 = vpop.permute.xlu1 %1503 }
 0x95d   :  { %4881 = vmatmul.mubr.msk.f32.vlgmr.msra.gmra.mxu0 %vm228_vm2, %v1504_v4 }
 0xa11   :  { %v1082_v5 = vpop.f32.mrf.mxu1 }
 0xa12   :  { %v1086_v6 = vsel %vm927_vm4, %v1082_v5, -inf }
 0xa13   :  { %1087 = vmax.xlane.f32.xlu0 %v1086_v6  ;;  %v4852_v7 = vpop.f32.mrf.mxu1 }
 0xa15   :  { %v1247_v8 = vpop.f32.mrf.mxu0 }
 0xa16   :  { %v1251_v9 = vsel %vm927_vm4, %v1247_v8, -inf }
 0xa17   :  { %1252 = vmax.xlane.f32.xlu1 %v1251_v9  ;;  %v4862_v10 = vpop.f32.mrf.mxu0 }
 0xa19   :  { %v1412_v11 = vpop.f32.mrf.mxu0 }
 0xa1a   :  { %v1416_v12 = vsel %vm927_vm4, %v1412_v11, -inf }
 0xa1b   :  { %1417 = vmax.xlane.f32.xlu0 %v1416_v12  ;;  %v4872_v14 = vpop.f32.mrf.mxu0 }
 0xa1d   :  { %v1577_v17 = vpop.f32.mrf.mxu0 }
 0xa1e   :  { %v1581_v18 = vsel %vm927_vm4, %v1577_v17, -inf }
 0xa1f   :  { %1582 = vmax.xlane.f32.xlu0 %v1581_v18  ;;  %v4882_v20 = vpop.f32.mrf.mxu0 }
 0xa28   :  { %1097 = vrot.lane.b32.xlu1 %v5519_v59, %s5282_s11 }
 0xa9c   :  { %v1088_v21 = vpop.xlane.xlu0 %1087 }
 0xa9d   :  { %v1089_v23 = vsub.f32 %v1082_v5, %v1088_v21 }
 0xa9f   :  { %v1090_v25 = vmul.f32 1.442695, %v1089_v23 }
 0xaa0   :  { %v1253_v26 = vpop.xlane.xlu1 %1252 }
 0xaa1   :  { %5119 = vpow2.f32 %v1090_v25  ;;  %v1254_v27 = vsub.f32 %v1247_v8, %v1253_v26 }
 0xaa3   :  { %v1255_v28 = vmul.f32 1.442695, %v1254_v27 }
 0xaa4   :  { %v1098_v29 = vpop.permute.xlu1 %1097  ;;  %v1418_v30 = vpop.xlane.xlu0 %1417 }
 0xaa5   :  { %5121 = vpow2.f32 %v1255_v28  ;;  %v1419_v31 = vsub.f32 %v1412_v11, %v1418_v30  ;;  %4854 = vmatpush3.msra.mxu1 %v1098_v29 }
 0xaa6   :  { %4863 = vmatprep.subr.mxu1 %v5280_v0 }
 0xaa7   :  { %v1420_v32 = vmul.f32 1.442695, %v1419_v31 }
 0xaa8   :  { %v1583_v33 = vpop.xlane.xlu0 %1582 }
 0xaa9   :  { %5123 = vpow2.f32 %v1420_v32  ;;  %v1584_v36 = vsub.f32 %v1577_v17, %v1583_v33 }
 0xaab   :  { %v1585_v37 = vmul.f32 1.442695, %v1584_v36 }
 0xaad   :  { %5125 = vpow2.f32 %v1585_v37 }
 0xaae   :  { %v5120_v38 = vpop.eup %5119 }
 0xaaf   :  { %v1092_v39 = vsel %vm927_vm4, %v5120_v38, 0.0 }
 0xab0   :  { %1093 = vadd.xlane.f32.xlu1 %v1092_v39 }
 0xab2   :  { %v5122_v35 = vpop.eup %5121 }
 0xab3   :  { %v1257_v40 = vsel %vm927_vm4, %v5122_v35, 0.0 }
 0xab4   :  { %1258 = vadd.xlane.f32.xlu0 %v1257_v40 }
 0xab6   :  { %v5124_v41 = vpop.eup %5123 }
 0xab7   :  { %v1422_v42 = vsel %vm927_vm4, %v5124_v41, 0.0 }
 0xab8   :  { %1423 = vadd.xlane.f32.xlu1 %v1422_v42 }
 0xaba   :  { %v5126_v43 = vpop.eup %5125 }
 0xabb   :  { %v1587_v44 = vsel %vm927_vm4, %v5126_v43, 0.0 }
 0xabc   :  { %1588 = vadd.xlane.f32.xlu0 %v1587_v44 }
 0xac9   :  { %1427 = vrot.lane.b32.xlu1 %v5519_v59, %s5286_s16 }
 0xacd   :  { %1592 = vrot.lane.b32.xlu1 %v5519_v59, %s5288_s18 }
 0xad2   :  { %1262 = vrot.lane.b32.xlu0 %v5519_v59, %s5285_s2 }
 0xaf1   :  { %1709 = vmax.xlane.f32.xlu1 %v1708_v45  ;;  %1712 = vmax.xlane.f32.xlu0 %v1711_v46 }
 0xaf5   :  { %1825 = vmax.xlane.f32.xlu1 %v1824_v47 }
 0xaf9   :  { %1828 = vmax.xlane.f32.xlu1 %v1827_v48 }
 0xafd   :  { %1945 = vmax.xlane.f32.xlu1 %v1944_v49 }
 0xb01   :  { %1948 = vmax.xlane.f32.xlu1 %v1947_v50 }
 0xb05   :  { %2064 = vmax.xlane.f32.xlu1 %v2063_v51 }
 0xb09   :  { %2067 = vmax.xlane.f32.xlu1 %v2066_v52 }
 0xb39   :  { %v1094_v53 = vpop.xlane.xlu1 %1093 }
 0xb3a   :  { %5127 = vrcp.f32 %v1094_v53 }
 0xb3d   :  { %v1259_v54 = vpop.xlane.xlu0 %1258 }
 0xb3e   :  { %5129 = vrcp.f32 %v1259_v54 }
 0xb41   :  { %v1424_v57 = vpop.xlane.xlu1 %1423 }
 0xb42   :  { %5131 = vrcp.f32 %v1424_v57 }
 0xb45   :  { %v1589_v59 = vpop.xlane.xlu0 %1588  ;;  %v1428_v1 = vpop.permute.xlu1 %1427 }
 0xb46   :  { %5133 = vrcp.f32 %v1589_v59 }
 0xb47   :  { %v5128_v60 = vpop.eup %5127 }
 0xb48   :  { %v1096_v61 = vmul.f32 %v5128_v60, %v5120_v38 }
 0xb49   :  { %v1263_v62 = vpop.permute.xlu0 %1262  ;;  %v1593_v5 = vpop.permute.xlu1 %1592 }
 0xb4a   :  { %4856 = vmatmul.mubr.msk.f32.vlgmr.msra.gmra.mxu1 %vm927_vm4, %v1096_v61 }
 0xb4b   :  { %v5130_v63 = vpop.eup %5129  ;;  %4864 = vmatpush3.msra.mxu1 %v1263_v62  ;;  %4865 = vmatprep.mubr.msk.f32.mxu1 %vm5281_vm0, %v5280_v0 }
 0xb4c   :  { %4873 = vmatprep.subr.mxu1 %v5280_v0  ;;  %v1261_v2 = vmul.f32 %v5130_v63, %v5122_v35 }
 0xb4e   :  { %4866 = vmatmul.mubr.msk.f32.vlgmr.msra.gmra.mxu1 %vm927_vm4, %v1261_v2 }
 0xb4f   :  { %v5132_v3 = vpop.eup %5131  ;;  %4874 = vmatpush3.msra.mxu1 %v1428_v1  ;;  %4875 = vmatprep.mubr.msk.f32.mxu1 %vm5281_vm0, %v5280_v0 }
 0xb50   :  { %4883 = vmatprep.subr.mxu1 %v5280_v0  ;;  %v1426_v4 = vmul.f32 %v5132_v3, %v5124_v41 }
 0xb52   :  { %4876 = vmatmul.mubr.msk.f32.vlgmr.msra.gmra.mxu1 %vm927_vm4, %v1426_v4 }
 0xb53   :  { %v5134_v6 = vpop.eup %5133  ;;  %4884 = vmatpush3.msra.mxu1 %v1593_v5  ;;  %4885 = vmatprep.mubr.msk.f32.mxu1 %vm5281_vm0, %v5280_v0 }
 0xb54   :  { %v1591_v7 = vmul.f32 %v5134_v6, %v5126_v43 }
 0xb56   :  { %4886 = vmatmul.mubr.msk.f32.vlgmr.msra.gmra.mxu1 %vm927_vm4, %v1591_v7 }
 0xb7a   :  { %v1710_v8 = vpop.xlane.xlu1 %1709  ;;  %v1713_v9 = vpop.xlane.xlu0 %1712 }
 0xb7b   :  { %v1714_v10 = vsub.f32 %v5388_v24, %v1710_v8  ;;  %v1715_v11 = vsub.f32 %v5377_v19, %v1713_v9 }
 0xb7d   :  { %v1716_v12 = vmul.f32 1.442695, %v1714_v10  ;;  %v1718_v17 = vmul.f32 1.442695, %v1715_v11 }
 0xb7e   :  { %v1826_v14 = vpop.xlane.xlu1 %1825 }
 0xb7f   :  { %5135 = vpow2.f32 %v1716_v12  ;;  %v1830_v18 = vsub.f32 %v5388_v24, %v1826_v14 }
 0xb80   :  { %5137 = vpow2.f32 %v1718_v17 }
 0xb81   :  { %v1832_v21 = vmul.f32 1.442695, %v1830_v18 }
 0xb82   :  { %v1829_v20 = vpop.xlane.xlu1 %1828 }
 0xb83   :  { %v1831_v23 = vsub.f32 %v5377_v19, %v1829_v20  ;;  %5139 = vpow2.f32 %v1832_v21 }
 0xb85   :  { %v1834_v26 = vmul.f32 1.442695, %v1831_v23 }
 0xb86   :  { %v1946_v25 = vpop.xlane.xlu1 %1945 }
 0xb87   :  { %v1950_v27 = vsub.f32 %v5388_v24, %v1946_v25  ;;  %5141 = vpow2.f32 %v1834_v26 }
 0xb89   :  { %v1952_v29 = vmul.f32 1.442695, %v1950_v27 }
 0xb8a   :  { %v1949_v28 = vpop.xlane.xlu1 %1948 }
 0xb8b   :  { %5143 = vpow2.f32 %v1952_v29  ;;  %v1951_v61 = vsub.f32 %v5377_v19, %v1949_v28 }
 0xb8c   :  { %v5603_v30 = vpop.eup %5135 }
 0xb8d   :  { %1722 = vrot.lane.b32.xlu1 %v5603_v30, %s5291_s21  ;;  %v5608_v33 = vpop.eup %5137  ;;  %v1954_v62 = vmul.f32 1.442695, %v1951_v61 }
 0xb8e   :  { %v2065_v31 = vpop.xlane.xlu1 %2064 }
 0xb8f   :  { %v2069_v32 = vsub.f32 %v5388_v24, %v2065_v31 }
 0xb90   :  { %v5613_v39 = vpop.eup %5139 }
 0xb91   :  { %v2071_v36 = vmul.f32 1.442695, %v2069_v32  ;;  %1724 = vrot.lane.b32.xlu1 %v5608_v33, %s5291_s21 }
 0xb92   :  { %v2068_v37 = vpop.xlane.xlu1 %2067 }
 0xb93   :  { %5145 = vpow2.f32 %v2071_v36  ;;  %v2070_v38 = vsub.f32 %v5377_v19, %v2068_v37 }
 0xb94   :  { %v5617_v40 = vpop.eup %5141 }
 0xb95   :  { %v2073_v35 = vmul.f32 1.442695, %v2070_v38  ;;  %1838 = vrot.lane.b32.xlu1 %v5613_v39, %s5295_s26 }
 0xb97   :  { %5147 = vpow2.f32 %v2073_v35 }
 0xb98   :  { %v5621_v24 = vpop.eup %5143  ;;  %5149 = vpow2.f32 %v1954_v62 }
 0xb99   :  { %1840 = vrot.lane.b32.xlu1 %v5617_v40, %s5295_s26 }
 0xb9d   :  { %1958 = vrot.lane.b32.xlu1 %v5621_v24, %s5296_s27 }
 0xba0   :  { %v5625_v41 = vpop.eup %5145 }
 0xba1   :  { %2077 = vrot.lane.b32.xlu1 %v5625_v41, %s5297_s28 }
 0xba4   :  { %v5629_v42 = vpop.eup %5147 }
 0xba5   :  { %2079 = vrot.lane.b32.xlu1 %v5629_v42, %s5297_s28  ;;  %v5641_v63 = vpop.eup %5149 }
 0xbff   :  { %v1723_v1 = vpop.permute.xlu1 %1722 }
 0xc00   :  { %v1728_v4 = vsel %vm927_vm4, %v1723_v1, 0.0 }
 0xc03   :  { %v1725_v2 = vpop.permute.xlu1 %1724 }
 0xc04   :  { %v1731_v21 = vsel %vm927_vm4, %v1725_v2, 0.0 }
 0xc07   :  { %v1839_v3 = vpop.permute.xlu1 %1838 }
 0xc08   :  { %v1844_v23 = vsel %vm927_vm4, %v1839_v3, 0.0 }
 0xc0a   :  { %v1169_v43 = vpop.f32.mrf.mxu1 }
 0xc0b   :  { %v1841_v5 = vpop.permute.xlu1 %1840 }
 0xc0c   :  { %v4857_v44 = vpop.f32.mrf.mxu1  ;;  %v1847_v6 = vsel %vm927_vm4, %v1841_v5, 0.0 }
 0xc0e   :  { %v1334_v45 = vpop.f32.mrf.mxu1 }
 0xc0f   :  { %1669 = vrot.lane.b32.xlu0 %v1334_v45, %s5279_s25  ;;  %v1959_v7 = vpop.permute.xlu1 %1958 }
 0xc10   :  { %v4867_v46 = vpop.f32.mrf.mxu1  ;;  %v1964_v25 = vsel %vm927_vm4, %v1959_v7, 0.0 }
 0xc11   :  { %v1699_v46 = vsub.s32 4, %v5364_v13 }
 0xc12   :  { %v1499_v47 = vpop.f32.mrf.mxu1 }
 0xc13   :  { %1673 = vrot.lane.b32.xlu0 %v1499_v47, %s5289_s19  ;;  %v2078_v19 = vpop.permute.xlu1 %2077  ;;  %v1704_v47 = vsub.s32 5, %v5364_v13 }
 0xc14   :  { %v4877_v48 = vpop.f32.mrf.mxu1  ;;  %v2083_v26 = vsel %vm927_vm4, %v2078_v19, 0.0 }
 0xc16   :  { %v1664_v49 = vpop.f32.mrf.mxu1 }
 0xc17   :  { %1677 = vrot.lane.b32.xlu0 %v1664_v49, %s5290_s20  ;;  %v2080_v17 = vpop.permute.xlu1 %2079 }
 0xc18   :  { %v4887_v50 = vpop.f32.mrf.mxu1  ;;  %v2086_v20 = vsel %vm927_vm4, %v2080_v17, 0.0  ;;  %v5238_v17 = vld [vmem:[#allocation2] sm:$0xff] }
 0xc81   :  { %v1670_v51 = vpop.permute.xlu0 %1669 }
 0xc82   :  { %v1680_v53 = vsel %vm927_vm4, %v1169_v43, %v1670_v51 }
 0xc85   :  { %v1674_v52 = vpop.permute.xlu0 %1673 }
 0xc86   :  { %v1681_v54 = vsel %vm308_vm3, %v1680_v53, %v1674_v52  ;;  %v5664_v52 = vrot.slane %v5370_v15, %v1704_v47 }
 0xc89   :  { %v1678_v57 = vpop.permute.xlu0 %1677 }
 0xc8a   :  { %v1682_v59 = vsel %vm930_vm5, %v1681_v54, %v1678_v57 }
 0xc8b   :  { %v1683_v60 = vsel %vm69_vm1, %v1682_v59, 0.0 }
 0xc8c   :  { %1684 = vadd.xlane.f32.xlu0 %v1683_v60 }
 0xca2   :  { %1960 = vrot.lane.b32.xlu0 %v5641_v63, %s5296_s27 }
 0xcc1   :  { %1729 = vadd.xlane.f32.xlu0 %v1728_v4 }
 0xcc5   :  { %1848 = vadd.xlane.f32.xlu0 %v1847_v6 }
 0xd15   :  { %v1685_v8 = vpop.xlane.xlu0 %1684 }
 0xd16   :  { %v1687_v9 = vmul.f32 0.03125, %v1685_v8 }
 0xd18   :  { %v1688_v10 = vsub.f32 %v1682_v59, %v1687_v9 }
 0xd19   :  { %v1961_v11 = vpop.permute.xlu0 %1960 }
 0xd1a   :  { %v1967_v12 = vsel %vm927_vm4, %v1961_v11, 0.0  ;;  %v1689_v14 = vmul.f32 %v1688_v10, %v1688_v10 }
 0xd1b   :  { %1968 = vadd.xlane.f32.xlu0 %v1967_v12  ;;  %v5236_v12 = vld [vmem:[#allocation2 + $0x10] sm:$0xff] }
 0xd1c   :  { %v1690_v18 = vsel %vm69_vm1, %v1689_v14, 0.0  ;;  %v5237_v14 = vld [vmem:[#allocation2 + $0x8] sm:$0xff] }
 0xd1d   :  { %1691 = vadd.xlane.f32.xlu1 %v1690_v18  ;;  %v55_v18 = vld [vmem:[#allocation2 + $0x78] sm:$0xff] }
 0xd1f   :  { %2087 = vadd.xlane.f32.xlu0 %v2086_v20  ;;  %v54_v20 = vld [vmem:[#allocation2 + $0x70] sm:$0xff] }
 0xd21   :  { %1732 = vadd.xlane.f32.xlu1 %v1731_v21 }
 0xd25   :  { %1845 = vadd.xlane.f32.xlu1 %v1844_v23  ;;  %v53_v23 = vld [vmem:[#allocation2 + $0x68] sm:$0xff] }
 0xd29   :  { %1965 = vadd.xlane.f32.xlu1 %v1964_v25  ;;  %v52_v25 = vld [vmem:[#allocation2 + $0x60] sm:$0xff] }
 0xd2d   :  { %2084 = vadd.xlane.f32.xlu1 %v2083_v26 }
 0xd4a   :  { %v1730_v27 = vpop.xlane.xlu0 %1729 }
 0xd4b   :  { %5151 = vrcp.f32 %v1730_v27 }
 0xd4e   :  { %v1849_v28 = vpop.xlane.xlu0 %1848 }
 0xd4f   :  { %5153 = vrcp.f32 %v1849_v28 }
 0xd58   :  { %v5152_v29 = vpop.eup %5151 }
 0xd59   :  { %v1736_v31 = vmul.f32 %v5152_v29, %v5603_v30 }
 0xd5b   :  { %1740 = vrot.lane.b32.xlu1 %v1736_v31, %s5291_s21 }
 0xd5c   :  { %v5154_v32 = vpop.eup %5153 }
 0xd5d   :  { %v1853_v36 = vmul.f32 %v5154_v32, %v5617_v40  ;;  %v5661_v40 = vrot.slane %v5370_v15, %v1699_v46 }
 0xd5f   :  { %1858 = vrot.lane.b32.xlu0 %v1853_v36, %s5295_s26 }
 0xda4   :  { %v1969_v30 = vpop.xlane.xlu0 %1968 }
 0xda6   :  { %v1692_v37 = vpop.xlane.xlu1 %1691 }
 0xda7   :  { %v1693_v38 = vmul.f32 0.03125, %v1692_v37  ;;  %v5239_v37 = vld [vmem:[%s6060_s0 + $0x8] sm:$0xff] }
 0xda8   :  { %v2088_v53 = vpop.xlane.xlu0 %2087 }
 0xda9   :  { %v1694_v35 = vadd.f32 1e-05, %v1693_v38  ;;  %v5240_v38 = vld [vmem:[%s6060_s0] sm:$0xff] }
 0xdaa   :  { %v1733_v43 = vpop.xlane.xlu1 %1732 }
 0xdab   :  { %5155 = vrsqrt.f32 %v1694_v35  ;;  %v5241_v35 = vld [vmem:[%s6061_s1] sm:$0xff] }
 0xdac   :  { %5157 = vrcp.f32 %v1733_v43 }
 0xdae   :  { %v1846_v44 = vpop.xlane.xlu1 %1845 }
 0xdaf   :  { %5159 = vrcp.f32 %v1846_v44 }
 0xdb2   :  { %v1966_v45 = vpop.xlane.xlu1 %1965 }
 0xdb3   :  { %5161 = vrcp.f32 %v1966_v45 }
 0xdb4   :  { %5163 = vrcp.f32 %v1969_v30 }
 0xdb6   :  { %v2085_v48 = vpop.xlane.xlu1 %2084 }
 0xdb7   :  { %5165 = vrcp.f32 %v2085_v48 }
 0xdb8   :  { %v5156_v49 = vpop.eup %5155  ;;  %5167 = vrcp.f32 %v2088_v53 }
 0xdb9   :  { %v5158_v50 = vpop.eup %5157  ;;  %v1696_v51 = vmul.f32 %v5156_v49, %v1688_v10  ;;  %v5235_v10 = vld [vmem:[#allocation2 + $0x18] sm:$0xff] }
 0xdba   :  { %v1737_v54 = vmul.f32 %v5158_v50, %v5608_v33 }
 0xdbb   :  { %v1701_v57 = vmul.f32 %v5661_v40, %v1696_v51 }
 0xdbc   :  { %v5160_v59 = vpop.eup %5159  ;;  %1742 = vrot.lane.b32.xlu1 %v1737_v54, %s5291_s21 }
 0xdbd   :  { %v1706_v60 = vadd.f32 %v5664_v52, %v1701_v57  ;;  %v1852_v61 = vmul.f32 %v5160_v59, %v5613_v39  ;;  %v5242_v59 = vld [vmem:[#allocation2 + $0x58] sm:$0xff] }
 0xdbf   :  { %4888 = vmatprep.subr.mxu0 %v1706_v60 }
 0xdc0   :  { %v5162_v62 = vpop.eup %5161  ;;  %1856 = vrot.lane.b32.xlu1 %v1852_v61, %s5295_s26  ;;  %4889 = vmatpush3.msra.mxu0 %v1706_v60  ;;  %v5243_v61 = vld [vmem:[#allocation2 + $0x50] sm:$0xff] }
 0xdc1   :  { %v1972_v15 = vmul.f32 %v5162_v62, %v5621_v24  ;;  %v5164_v33 = vpop.eup %5163  ;;  %v5244_v62 = vld [vmem:[#allocation2 + $0x48] sm:$0xff] }
 0xdc2   :  { %v1973_v39 = vmul.f32 %v5164_v33, %v5641_v63  ;;  %v5245_v33 = vld [vmem:[#allocation2 + $0x40] sm:$0xff] }
 0xdc3   :  { %1976 = vrot.lane.b32.xlu0 %v1972_v15, %s5296_s27 }
 0xdc4   :  { %1980 = vrot.lane.b32.xlu1 %v1706_v60, %s5298_s29  ;;  %v5166_v1 = vpop.eup %5165 }
 0xdc5   :  { %v5168_v2 = vpop.eup %5167  ;;  %v2091_v3 = vmul.f32 %v5166_v1, %v5625_v41 }
 0xdc6   :  { %v2092_v4 = vmul.f32 %v5168_v2, %v5629_v42 }
 0xdc7   :  { %1861 = vrot.lane.b32.xlu0 %v1706_v60, %s5299_s3 }
 0xdc8   :  { %2099 = vrot.lane.b32.xlu1 %v1706_v60, %s5282_s11 }
 0xdcb   :  { %1978 = vrot.lane.b32.xlu0 %v1973_v39, %s5296_s27 }
 0xdcc   :  { %2095 = vrot.lane.b32.xlu1 %v2091_v3, %s5297_s28 }
 0xdcd   :  { %v1741_v24 = vpop.permute.xlu1 %1740 }
 0xdce   :  { %4890 = vmatprep.mubr.msk.f32.mxu0 %vm927_vm4, %v1741_v24 }
 0xdcf   :  { %2097 = vrot.lane.b32.xlu0 %v2092_v4, %s5297_s28 }
 0xdd1   :  { %v1859_v6 = vpop.permute.xlu0 %1858 }
 0xe2e   :  { %v1743_v5 = vpop.permute.xlu1 %1742 }
 0xe2f   :  { %4891 = vmatmul.mubr.msk.f32.vlgmr.msra.gmra.mxu0 %vm927_vm4, %v1743_v5 }
 0xe32   :  { %v1857_v7 = vpop.permute.xlu1 %1856 }
 0xe33   :  { %4895 = vmatprep.mubr.msk.f32.mxu1 %vm927_vm4, %v1857_v7 }
 0xe35   :  { %v1977_v63 = vpop.permute.xlu0 %1976 }
 0xe36   :  { %v1981_v41 = vpop.permute.xlu1 %1980  ;;  %4900 = vmatprep.mubr.msk.f32.mxu0 %vm927_vm4, %v1977_v63 }
 0xe37   :  { %4898 = vmatprep.subr.mxu0 %v1981_v41 }
 0xe38   :  { %4899 = vmatpush3.msra.mxu0 %v1981_v41  ;;  %v5771_v41 = vrot.slane %v5424_v34, %v934_v56 }
 0xe39   :  { %v1862_v19 = vpop.permute.xlu0 %1861  ;;  %4908 = vmatprep.subr.mxu0 %v55_v18 }
 0xe3a   :  { %v2100_v8 = vpop.permute.xlu1 %2099  ;;  %4893 = vmatprep.subr.mxu1 %v1862_v19 }
 0xe3b   :  { %4894 = vmatpush3.msra.mxu1 %v1862_v19 }
 0xe3c   :  { %4896 = vmatmul.mubr.msk.f32.vlgmr.msra.gmra.mxu1 %vm927_vm4, %v1859_v6  ;;  %4903 = vmatprep.subr.mxu1 %v2100_v8 }
 0xe3d   :  { %4904 = vmatpush3.msra.mxu1 %v2100_v8  ;;  %v1979_v42 = vpop.permute.xlu0 %1978 }
 0xe3e   :  { %v2096_v9 = vpop.permute.xlu1 %2095  ;;  %4901 = vmatmul.mubr.msk.f32.vlgmr.msra.gmra.mxu0 %vm927_vm4, %v1979_v42  ;;  %4919 = vmatprep.subr.mxu1 %v5235_v10 }
 0xe3f   :  { %4905 = vmatprep.mubr.msk.f32.mxu1 %vm927_vm4, %v2096_v9  ;;  %4909 = vmatpush3.msra.mxu0 %v55_v18 }
 0xe40   :  { %4910 = vmatprep.subr.mxu0 %v54_v20 }
 0xe41   :  { %v2098_v11 = vpop.permute.xlu0 %2097  ;;  %4911 = vmatpush3.msra.mxu0 %v54_v20 }
 0xe42   :  { %4906 = vmatmul.mubr.msk.f32.vlgmr.msra.gmra.mxu1 %vm927_vm4, %v2098_v11  ;;  %4912 = vmatprep.subr.mxu0 %v53_v23 }
 0xe43   :  { %4920 = vmatpush3.msra.mxu1 %v5235_v10  ;;  %4913 = vmatpush3.msra.mxu0 %v53_v23 }
 0xe44   :  { %4921 = vmatprep.subr.mxu1 %v5236_v12  ;;  %4914 = vmatprep.subr.mxu0 %v52_v25 }
 0xe45   :  { %4922 = vmatpush3.msra.mxu1 %v5236_v12  ;;  %4915 = vmatpush3.msra.mxu0 %v52_v25 }
 0xe46   :  { %4923 = vmatprep.subr.mxu1 %v5237_v14  ;;  %4930 = vmatprep.subr.mxu0 %v5280_v0 }
 0xe47   :  { %4924 = vmatpush3.msra.mxu1 %v5237_v14 }
 0xe48   :  { %4925 = vmatprep.subr.mxu1 %v5238_v17 }
 0xe49   :  { %4926 = vmatpush3.msra.mxu1 %v5238_v17 }
 0xe4a   :  { %4941 = vmatprep.subr.mxu1 %v5280_v0 }
 0xeef   :  { %v4892_v21 = vpop.f32.mrf.mxu0 }
 0xef1   :  { %v1814_v26 = vpop.f32.mrf.mxu0 }
 0xefc   :  { %v4897_v27 = vpop.f32.mrf.mxu1 }
 0xefd   :  { %2185 = vrot.lane.b32.xlu0 %v4897_v27, %s5279_s25 }
 0xefe   :  { %v1934_v28 = vpop.f32.mrf.mxu1  ;;  %v4902_v29 = vpop.f32.mrf.mxu0 }
 0xeff   :  { %2183 = vrot.lane.b32.xlu1 %v1934_v28, %s5279_s25 }
 0xf00   :  { %v2053_v31 = vpop.f32.mrf.mxu0 }
 0xf01   :  { %2193 = vrot.lane.b32.xlu0 %v4902_v29, %s5289_s19 }
 0xf02   :  { %v4907_v32 = vpop.f32.mrf.mxu1 }
 0xf03   :  { %2191 = vrot.lane.b32.xlu1 %v2053_v31, %s5289_s19 }
 0xf04   :  { %v2172_v36 = vpop.f32.mrf.mxu1 }
 0xf05   :  { %2201 = vrot.lane.b32.xlu0 %v4907_v32, %s5290_s20 }
 0xf07   :  { %2199 = vrot.lane.b32.xlu1 %v2172_v36, %s5290_s20 }
 0xf09   :  { %2302 = vrot.lane.b32.xlu0 %v5239_v37, %s5285_s2 }
 0xf0b   :  { %2300 = vrot.lane.b32.xlu1 %v5240_v38, %s5285_s2 }
 0xf0f   :  { %2383 = vrot.lane.b32.xlu1 %v5241_v35, %s5285_s2 }
 0xf6f   :  { %v2186_v43 = vpop.permute.xlu0 %2185 }
 0xf70   :  { %v2206_v48 = vsel %vm927_vm4, %v4892_v21, %v2186_v43 }
 0xf71   :  { %v2184_v44 = vpop.permute.xlu1 %2183 }
 0xf72   :  { %v2205_v30 = vsel %vm927_vm4, %v1814_v26, %v2184_v44 }
 0xf73   :  { %v2194_v45 = vpop.permute.xlu0 %2193 }
 0xf74   :  { %v2208_v51 = vsel %vm308_vm3, %v2206_v48, %v2194_v45 }
 0xf75   :  { %v2192_v46 = vpop.permute.xlu1 %2191 }
 0xf76   :  { %v2207_v49 = vsel %vm308_vm3, %v2205_v30, %v2192_v46 }
 0xf77   :  { %v2202_v47 = vpop.permute.xlu0 %2201 }
 0xf78   :  { %v2210_v54 = vsel %vm930_vm5, %v2208_v51, %v2202_v47 }
 0xf79   :  { %v2200_v50 = vpop.permute.xlu1 %2199 }
 0xf7a   :  { %v2209_v53 = vsel %vm930_vm5, %v2207_v49, %v2200_v50 }
 0xf7b   :  { %4916 = vmatprep.mubr.msk.f32.mxu0 %vm69_vm1, %v2209_v53  ;;  %v2303_v57 = vpop.permute.xlu0 %2302 }
 0xf7c   :  { %4917 = vmatmul.mubr.msk.f32.vlgmr.msra.gmra.mxu0 %vm69_vm1, %v2210_v54 }
 0xf7d   :  { %4931 = vmatpush3.msra.mxu0 %v5242_v59  ;;  %v2301_v60 = vpop.permute.xlu1 %2300  ;;  %4938 = vmatprep.mubr.msk.f32.mxu0 %vm5281_vm0, %v5280_v0 }
 0xf7e   :  { %4927 = vmatprep.mubr.msk.f32.mxu1 %vm69_vm1, %v2301_v60  ;;  %4932 = vmatprep.subr.mxu0 %v5280_v0 }
 0xf7f   :  { %4928 = vmatmul.mubr.msk.f32.vlgmr.msra.gmra.mxu1 %vm69_vm1, %v2303_v57  ;;  %4933 = vmatpush3.msra.mxu0 %v5243_v61 }
 0xf80   :  { %4934 = vmatprep.subr.mxu0 %v5280_v0  ;;  %4945 = vmatprep.mubr.msk.f32.mxu1 %vm5281_vm0, %v5280_v0 }
 0xf81   :  { %4935 = vmatpush3.msra.mxu0 %v5244_v62  ;;  %v2384_v15 = vpop.permute.xlu1 %2383 }
 0xf82   :  { %4936 = vmatprep.subr.mxu0 %v5280_v0 }
 0xf83   :  { %4937 = vmatpush3.msra.mxu0 %v5245_v33 }
 0xf84   :  { %4939 = vmatmul.mubr.msk.f32.vlgmr.msra.gmra.mxu0 %vm69_vm1, %v2384_v15  ;;  %4948 = vmatprep.subr.mxu0 %v5280_v0 }
 0xf85   :  { %4952 = vmatprep.mubr.msk.f32.mxu0 %vm5281_vm0, %v5280_v0 }
0x103c   :  { %v5732_v1 = vpop.f32.mrf.mxu0 }
0x103e   :  { %v5737_v24 = vpop.f32.mrf.mxu0 }
0x103f   :  { %v4929_v39 = vpop.f32.mrf.mxu1 }
0x1040   :  { %v5735_v2 = vadd.f32 %v4929_v39, %v5373_v16 }
0x1041   :  { %v2374_v3 = vpop.f32.mrf.mxu1 }
0x1042   :  { %v5740_v4 = vadd.f32 %v2374_v3, %v5373_v16  ;;  %2630 = vrot.lane.b32.xlu0 %v5735_v2, %s5283_s12  ;;  %4942 = vmatpush3.xpose.msk.msra.mxu1 %vm228_vm2, %v5735_v2 }
0x1043   :  { %4943 = vmatprep.subr.mxu1 %v5280_v0 }
0x1044   :  { %2628 = vrot.lane.b32.xlu1 %v5740_v4, %s5283_s12  ;;  %v2453_v5 = vpop.f32.mrf.mxu0 }
0x1045   :  { %v5750_v6 = vadd.f32 %v2453_v5, %v5380_v22 }
0x1046   :  { %v4940_v7 = vpop.f32.mrf.mxu0  ;;  %4944 = vmatpush3.xpose.msk.msra.mxu1 %vm228_vm2, %v5740_v4 }
0x1047   :  { %2626 = vrot.lane.b32.xlu0 %v5750_v6, %s5283_s12  ;;  %4955 = vmatprep.subr.mxu1 %v5280_v0 }
0x1049   :  { %4946 = vmatmul.mubr.msk.f32.vlgmr.msra.gmra.mxu1 %vm228_vm2, %v5750_v6 }
0x104a   :  { %4959 = vmatprep.mubr.msk.f32.mxu1 %vm5281_vm0, %v5280_v0 }
0x10b4   :  { %v2631_v16 = vpop.permute.xlu0 %2630 }
0x10b5   :  { %4956 = vmatpush3.xpose.msk.msra.mxu1 %vm228_vm2, %v2631_v16 }
0x10b6   :  { %4957 = vmatprep.subr.mxu1 %v5280_v0  ;;  %v2629_v22 = vpop.permute.xlu1 %2628 }
0x10b9   :  { %4958 = vmatpush3.xpose.msk.msra.mxu1 %vm228_vm2, %v2629_v22  ;;  %v2627_v63 = vpop.permute.xlu0 %2626 }
0x10ba   :  { %4976 = vmatprep.subr.mxu1 %v5280_v0 }
0x10bc   :  { %4960 = vmatmul.mubr.msk.f32.vlgmr.msra.gmra.mxu1 %vm228_vm2, %v2627_v63 }
0x10bd   :  { %4980 = vmatprep.mubr.msk.f32.mxu1 %vm5281_vm0, %v5280_v0 }
0x1109   :  { %v2532_v19 = vpop.f32.mrf.mxu1 }
0x110a   :  { %v2533_v8 = vadd.f32 %v2532_v19, %v5771_v41 }
0x110b   :  { %v4947_v42 = vpop.f32.mrf.mxu1 }
0x110c   :  { %v2536_v9 = vsel %vm308_vm3, %v2533_v8, -inf }
0x110d   :  { %2537 = vmax.xlane.f32.xlu1 %v2536_v9 }
0x111e   :  { %2547 = vrot.lane.b32.xlu1 %v5740_v4, %s5282_s11 }
0x1122   :  { %2721 = vrot.lane.b32.xlu1 %v5735_v2, %s5285_s2 }
0x1126   :  { %2802 = vrot.lane.b32.xlu1 %v5735_v2, %s5284_s13 }
0x117c   :  { %v2704_v10 = vpop.f32.mrf.mxu1 }
0x117d   :  { %v2705_v34 = vadd.f32 %v2704_v10, %v5771_v41 }
0x117e   :  { %v4961_v56 = vpop.f32.mrf.mxu1 }
0x117f   :  { %v2708_v11 = vsel %vm308_vm3, %v2705_v34, -inf }
0x1180   :  { %2709 = vmax.xlane.f32.xlu0 %v2708_v11 }
0x1196   :  { %2549 = vrot.lane.b32.xlu0 %v5735_v2, %s5282_s11  ;;  %v2538_v12 = vpop.xlane.xlu1 %2537 }
0x1197   :  { %v2539_v14 = vsub.f32 %v2533_v8, %v2538_v12 }
0x1199   :  { %v2540_v17 = vmul.f32 1.442695, %v2539_v14 }
0x119a   :  { %v2548_v27 = vpop.permute.xlu1 %2547 }
0x119b   :  { %5169 = vpow2.f32 %v2540_v17 }
0x119e   :  { %v2722_v37 = vpop.permute.xlu1 %2721 }
0x11a2   :  { %v2803_v35 = vpop.permute.xlu1 %2802 }
0x11a8   :  { %v5170_v18 = vpop.eup %5169 }
0x11a9   :  { %v2542_v20 = vsel %vm308_vm3, %v5170_v18, 0.0 }
0x11b5   :  { %2543 = vadd.xlane.f32.xlu0 %v2542_v20 }
0x11cb   :  { %2719 = vrot.lane.b32.xlu0 %v5740_v4, %s5285_s2 }
0x11cf   :  { %2800 = vrot.lane.b32.xlu0 %v5740_v4, %s5284_s13 }
0x1209   :  { %v2710_v21 = vpop.xlane.xlu0 %2709 }
0x120a   :  { %v2711_v23 = vsub.f32 %v2705_v34, %v2710_v21 }
0x120c   :  { %v2712_v25 = vmul.f32 1.442695, %v2711_v23  ;;  %v5246_v23 = vld [vmem:[#allocation2 + $0x38] sm:$0xff] }
0x120d   :  { %v2550_v26 = vpop.permute.xlu0 %2549 }
0x120e   :  { %5171 = vpow2.f32 %v2712_v25  ;;  %4949 = vmatpush3.msra.mxu0 %v2550_v26  ;;  %v5247_v25 = vld [vmem:[#allocation2 + $0x30] sm:$0xff]  ;;  %v5248_v26 = vld [vmem:[#allocation2 + $0x28] sm:$0xff] }
0x120f   :  { %4950 = vmatprep.subr.mxu0 %v5280_v0 }
0x1210   :  { %4951 = vmatpush3.msra.mxu0 %v2548_v27  ;;  %v5249_v27 = vld [vmem:[#allocation2 + $0x20] sm:$0xff] }
0x1211   :  { %4962 = vmatprep.subr.mxu0 %v5280_v0 }
0x121b   :  { %v5172_v28 = vpop.eup %5171 }
0x121c   :  { %v2714_v29 = vsel %vm308_vm3, %v5172_v28, 0.0 }
0x121d   :  { %2715 = vadd.xlane.f32.xlu1 %v2714_v29 }
0x122e   :  { %2798 = vrot.lane.b32.xlu1 %v5750_v6, %s5284_s13 }
0x1232   :  { %2891 = vrot.lane.b32.xlu1 %v5740_v4, %s5286_s16 }
0x123e   :  { %v2544_v31 = vpop.xlane.xlu0 %2543 }
0x123f   :  { %5173 = vrcp.f32 %v2544_v31 }
0x1242   :  { %v2720_v38 = vpop.permute.xlu0 %2719 }
0x1246   :  { %v2801_v46 = vpop.permute.xlu0 %2800 }
0x124c   :  { %v5174_v32 = vpop.eup %5173 }
0x124d   :  { %v2546_v36 = vmul.f32 %v5174_v32, %v5170_v18 }
0x124f   :  { %4953 = vmatmul.mubr.msk.f32.vlgmr.msra.gmra.mxu0 %vm308_vm3, %v2546_v36 }
0x1250   :  { %4963 = vmatpush3.msra.mxu0 %v2722_v37  ;;  %4966 = vmatprep.mubr.msk.f32.mxu0 %vm5281_vm0, %v5280_v0 }
0x1251   :  { %4964 = vmatprep.subr.mxu0 %v5280_v0 }
0x1252   :  { %4965 = vmatpush3.msra.mxu0 %v2720_v38 }
0x1253   :  { %4969 = vmatprep.subr.mxu0 %v5280_v0 }
0x12a6   :  { %v2716_v43 = vpop.xlane.xlu1 %2715 }
0x12a7   :  { %5175 = vrcp.f32 %v2716_v43 }
0x12aa   :  { %v2799_v30 = vpop.permute.xlu1 %2798 }
0x12ae   :  { %v2892_v15 = vpop.permute.xlu1 %2891 }
0x12b4   :  { %v5176_v44 = vpop.eup %5175 }
0x12b5   :  { %v2718_v45 = vmul.f32 %v5176_v44, %v5172_v28 }
0x12b7   :  { %4967 = vmatmul.mubr.msk.f32.vlgmr.msra.gmra.mxu0 %vm308_vm3, %v2718_v45 }
0x12b8   :  { %4970 = vmatpush3.xpose.msk.msra.mxu0 %vm228_vm2, %v2803_v35  ;;  %4973 = vmatprep.mubr.msk.f32.mxu0 %vm5281_vm0, %v5280_v0 }
0x12b9   :  { %4971 = vmatprep.subr.mxu0 %v5280_v0 }
0x12bc   :  { %4972 = vmatpush3.xpose.msk.msra.mxu0 %vm228_vm2, %v2801_v46 }
0x12bd   :  { %4990 = vmatprep.subr.mxu0 %v5280_v0 }
0x12bf   :  { %4974 = vmatmul.mubr.msk.f32.vlgmr.msra.gmra.mxu0 %vm228_vm2, %v2799_v30 }
0x12c0   :  { %4994 = vmatprep.mubr.msk.f32.mxu0 %vm5281_vm0, %v5280_v0 }
0x130f   :  { %v5812_v47 = vpop.f32.mrf.mxu0 }
0x1311   :  { %v4954_v48 = vpop.f32.mrf.mxu0 }
0x1377   :  { %v2794_v49 = vpop.f32.mrf.mxu0 }
0x1379   :  { %v4968_v50 = vpop.f32.mrf.mxu0 }
0x137f   :  { %v2876_v51 = vpop.f32.mrf.mxu0 }
0x1380   :  { %v2877_v53 = vadd.f32 %v2876_v51, %v5771_v41 }
0x1381   :  { %v4975_v54 = vpop.f32.mrf.mxu0 }
0x1382   :  { %v2880_v57 = vsel %vm308_vm3, %v2877_v53, -inf }
0x1383   :  { %2881 = vmax.xlane.f32.xlu0 %v2880_v57 }
0x1399   :  { %2893 = vrot.lane.b32.xlu0 %v5735_v2, %s5286_s16 }
0x139d   :  { %2974 = vrot.lane.b32.xlu0 %v5735_v2, %s5287_s17 }
0x13a1   :  { %2970 = vrot.lane.b32.xlu0 %v5750_v6, %s5287_s17 }
0x140c   :  { %v2882_v59 = vpop.xlane.xlu0 %2881 }
0x140d   :  { %v2883_v60 = vsub.f32 %v2877_v53, %v2882_v59 }
0x140f   :  { %v2884_v61 = vmul.f32 1.442695, %v2883_v60 }
0x1410   :  { %v2894_v62 = vpop.permute.xlu0 %2893 }
0x1411   :  { %5177 = vpow2.f32 %v2884_v61  ;;  %4977 = vmatpush3.msra.mxu1 %v2894_v62 }
0x1412   :  { %4978 = vmatprep.subr.mxu1 %v5280_v0 }
0x1413   :  { %4979 = vmatpush3.msra.mxu1 %v2892_v15 }
0x1414   :  { %4983 = vmatprep.subr.mxu1 %v5280_v0  ;;  %v2975_v7 = vpop.permute.xlu0 %2974 }
0x1418   :  { %v2971_v22 = vpop.permute.xlu0 %2970 }
0x141e   :  { %v5178_v33 = vpop.eup %5177 }
0x141f   :  { %v2886_v39 = vsel %vm308_vm3, %v5178_v33, 0.0 }
0x1420   :  { %2887 = vadd.xlane.f32.xlu1 %v2886_v39 }
0x1431   :  { %2972 = vrot.lane.b32.xlu1 %v5740_v4, %s5287_s17 }
0x14a9   :  { %v2888_v3 = vpop.xlane.xlu1 %2887 }
0x14aa   :  { %5179 = vrcp.f32 %v2888_v3 }
0x14ad   :  { %v2973_v16 = vpop.permute.xlu1 %2972 }
0x14b7   :  { %v5180_v5 = vpop.eup %5179 }
0x14b8   :  { %v2890_v6 = vmul.f32 %v5180_v5, %v5178_v33 }
0x14ba   :  { %4981 = vmatmul.mubr.msk.f32.vlgmr.msra.gmra.mxu1 %vm308_vm3, %v2890_v6 }
0x14bb   :  { %4984 = vmatpush3.xpose.msk.msra.mxu1 %vm228_vm2, %v2975_v7  ;;  %4987 = vmatprep.mubr.msk.f32.mxu1 %vm5281_vm0, %v5280_v0 }
0x14bc   :  { %4985 = vmatprep.subr.mxu1 %v5280_v0 }
0x14bf   :  { %4986 = vmatpush3.xpose.msk.msra.mxu1 %vm228_vm2, %v2973_v16 }
0x14c0   :  { %5008 = vmatprep.subr.mxu1 %v5280_v0 }
0x14c2   :  { %4988 = vmatmul.mubr.msk.f32.vlgmr.msra.gmra.mxu1 %vm228_vm2, %v2971_v22 }
0x14c3   :  { %5010 = vmatprep.mubr.msk.f32.mxu1 %vm5281_vm0, %v5280_v0 }
0x157a   :  { %v2966_v63 = vpop.f32.mrf.mxu1 }
0x157c   :  { %v4982_v19 = vpop.f32.mrf.mxu1 }
0x1582   :  { %v3048_v8 = vpop.f32.mrf.mxu1 }
0x1583   :  { %v3049_v42 = vadd.f32 %v3048_v8, %v5771_v41 }
0x1584   :  { %v4989_v9 = vpop.f32.mrf.mxu1 }
0x1585   :  { %v3052_v10 = vsel %vm308_vm3, %v3049_v42, -inf }
0x1586   :  { %3053 = vmax.xlane.f32.xlu1 %v3052_v10 }
0x1597   :  { %3063 = vrot.lane.b32.xlu1 %v5740_v4, %s5288_s18 }
0x159b   :  { %3143 = vrot.lane.b32.xlu1 %v2794_v49, %s5279_s25 }
0x160f   :  { %v3054_v34 = vpop.xlane.xlu1 %3053 }
0x1610   :  { %v3055_v56 = vsub.f32 %v3049_v42, %v3054_v34 }
0x1612   :  { %v3056_v11 = vmul.f32 1.442695, %v3055_v56 }
0x1613   :  { %v3064_v18 = vpop.permute.xlu1 %3063 }
0x1614   :  { %5181 = vpow2.f32 %v3056_v11 }
0x1617   :  { %v3144_v31 = vpop.permute.xlu1 %3143 }
0x1618   :  { %v3154_v36 = vsel %vm927_vm4, %v5812_v47, %v3144_v31 }
0x1621   :  { %v5182_v12 = vpop.eup %5181 }
0x1622   :  { %v3058_v14 = vsel %vm308_vm3, %v5182_v12, 0.0 }
0x1623   :  { %3059 = vadd.xlane.f32.xlu0 %v3058_v14 }
0x1639   :  { %3065 = vrot.lane.b32.xlu0 %v5735_v2, %s5288_s18 }
0x163d   :  { %3147 = vrot.lane.b32.xlu0 %v2966_v63, %s5289_s19 }
0x16ac   :  { %v3060_v41 = vpop.xlane.xlu0 %3059 }
0x16ad   :  { %5183 = vrcp.f32 %v3060_v41 }
0x16b0   :  { %v3066_v17 = vpop.permute.xlu0 %3065 }
0x16b1   :  { %4991 = vmatpush3.msra.mxu0 %v3066_v17 }
0x16b2   :  { %4992 = vmatprep.subr.mxu0 %v5280_v0 }
0x16b3   :  { %4993 = vmatpush3.msra.mxu0 %v3064_v18 }
0x16b4   :  { %4997 = vmatprep.subr.mxu0 %v5280_v0  ;;  %v3148_v32 = vpop.permute.xlu0 %3147 }
0x16b5   :  { %v3155_v37 = vsel %vm308_vm3, %v3154_v36, %v3148_v32 }
0x16ba   :  { %v5184_v20 = vpop.eup %5183 }
0x16bb   :  { %v3062_v21 = vmul.f32 %v5184_v20, %v5182_v12 }
0x16bd   :  { %4995 = vmatmul.mubr.msk.f32.vlgmr.msra.gmra.mxu0 %vm308_vm3, %v3062_v21  ;;  %v3922_v21 = vsel %vm1707_vm6, %v5735_v2, -inf }
0x16be   :  { %4998 = vmatpush3.msra.mxu0 %v5246_v23  ;;  %5005 = vmatprep.mubr.msk.f32.mxu0 %vm5281_vm0, %v5280_v0  ;;  %v4037_v23 = vsel %vm1823_vm7, %v5735_v2, -inf }
0x16bf   :  { %4999 = vmatprep.subr.mxu0 %v5280_v0 }
0x16c0   :  { %5000 = vmatpush3.msra.mxu0 %v5247_v25  ;;  %v4153_v25 = vsel %vm1943_vm8, %v5740_v4, -inf }
0x16c1   :  { %5001 = vmatprep.subr.mxu0 %v5280_v0 }
0x16c2   :  { %5002 = vmatpush3.msra.mxu0 %v5248_v26  ;;  %v4156_v26 = vsel %vm1943_vm8, %v5735_v2, -inf }
0x16c3   :  { %5003 = vmatprep.subr.mxu0 %v5280_v0 }
0x16c4   :  { %5004 = vmatpush3.msra.mxu0 %v5249_v27  ;;  %v3919_v27 = vsel %vm1707_vm6, %v5740_v4, -inf }
0x16c5   :  { %5018 = vmatprep.subr.mxu0 %v5280_v0 }
0x177d   :  { %v3138_v28 = vpop.f32.mrf.mxu0 }
0x177e   :  { %3151 = vrot.lane.b32.xlu1 %v3138_v28, %s5290_s20  ;;  %v4034_v28 = vsel %vm1823_vm7, %v5740_v4, -inf }
0x177f   :  { %v4996_v29 = vpop.f32.mrf.mxu0 }
0x17f0   :  { %v3152_v38 = vpop.permute.xlu1 %3151 }
0x17f1   :  { %v5860_v35 = vsel %vm930_vm5, %v3155_v37, %v3152_v38 }
0x17f2   :  { %5006 = vmatmul.mubr.msk.f32.vlgmr.msra.gmra.mxu0 %vm69_vm1, %v5860_v35 }
0x17f3   :  { %5020 = vmatprep.mubr.msk.f32.mxu0 %vm5281_vm0, %v5280_v0 }
0x18b2   :  { %v3226_v43 = vpop.f32.mrf.mxu0 }
0x18b3   :  { %v5867_v44 = vadd.f32 %v3226_v43, %v5516_v58 }
0x18b4   :  { %v5007_v45 = vpop.f32.mrf.mxu0 }
0x18b5   :  { %3396 = vrot.lane.b32.xlu1 %v5867_v44, %s5283_s12  ;;  %3231 = vrot.lane.b32.xlu0 %v5867_v44, %s5291_s21 }
0x18b6   :  { %5009 = vmatpush3.xpose.msk.msra.mxu1 %vm228_vm2, %v5867_v44 }
0x18b7   :  { %5013 = vmatprep.subr.mxu1 %v5280_v0 }
0x18b9   :  { %3561 = vrot.lane.b32.xlu1 %v5867_v44, %s5284_s13  ;;  %3394 = vrot.lane.b32.xlu0 %v5867_v44, %s5292_s22 }
0x18bd   :  { %3726 = vrot.lane.b32.xlu1 %v5867_v44, %s5287_s17  ;;  %3559 = vrot.lane.b32.xlu0 %v5867_v44, %s5293_s23 }
0x18c1   :  { %3724 = vrot.lane.b32.xlu0 %v5867_v44, %s5294_s24 }
0x1927   :  { %v3397_v58 = vpop.permute.xlu1 %3396  ;;  %v3232_v46 = vpop.permute.xlu0 %3231 }
0x1928   :  { %5011 = vmatmul.mubr.msk.f32.vlgmr.msra.gmra.mxu1 %vm228_vm2, %v3232_v46  ;;  %5019 = vmatpush3.xpose.msk.msra.mxu0 %vm228_vm2, %v3397_v58 }
0x1929   :  { %5028 = vmatprep.subr.mxu0 %v5280_v0  ;;  %5015 = vmatprep.mubr.msk.f32.mxu1 %vm5281_vm0, %v5280_v0 }
0x192b   :  { %v3562_v30 = vpop.permute.xlu1 %3561  ;;  %v3395_v47 = vpop.permute.xlu0 %3394 }
0x192c   :  { %5021 = vmatmul.mubr.msk.f32.vlgmr.msra.gmra.mxu0 %vm228_vm2, %v3395_v47 }
0x192d   :  { %5029 = vmatpush3.xpose.msk.msra.mxu0 %vm228_vm2, %v3562_v30  ;;  %5030 = vmatprep.mubr.msk.f32.mxu0 %vm5281_vm0, %v5280_v0 }
0x192e   :  { %5038 = vmatprep.subr.mxu0 %v5280_v0 }
0x192f   :  { %v3727_v48 = vpop.permute.xlu1 %3726  ;;  %v3560_v49 = vpop.permute.xlu0 %3559 }
0x1930   :  { %5031 = vmatmul.mubr.msk.f32.vlgmr.msra.gmra.mxu0 %vm228_vm2, %v3560_v49 }
0x1931   :  { %5039 = vmatpush3.xpose.msk.msra.mxu0 %vm228_vm2, %v3727_v48  ;;  %5040 = vmatprep.mubr.msk.f32.mxu0 %vm5281_vm0, %v5280_v0 }
0x1933   :  { %v3725_v50 = vpop.permute.xlu0 %3724 }
0x1934   :  { %5041 = vmatmul.mubr.msk.f32.vlgmr.msra.gmra.mxu0 %vm228_vm2, %v3725_v50 }
0x19e8   :  { %v3303_v51 = vpop.f32.mrf.mxu1 }
0x19e9   :  { %v3307_v53 = vsel %vm927_vm4, %v3303_v51, -inf }
0x19ea   :  { %3308 = vmax.xlane.f32.xlu1 %v3307_v53  ;;  %v5012_v54 = vpop.f32.mrf.mxu1 }
0x19ec   :  { %v3468_v57 = vpop.f32.mrf.mxu0 }
0x19ed   :  { %v3472_v59 = vsel %vm927_vm4, %v3468_v57, -inf }
0x19ee   :  { %3473 = vmax.xlane.f32.xlu0 %v3472_v59  ;;  %v5022_v60 = vpop.f32.mrf.mxu0 }
0x19f0   :  { %v3633_v61 = vpop.f32.mrf.mxu0 }
0x19f1   :  { %v3637_v62 = vsel %vm927_vm4, %v3633_v61, -inf }
0x19f2   :  { %3638 = vmax.xlane.f32.xlu0 %v3637_v62  ;;  %v5032_v15 = vpop.f32.mrf.mxu0 }
0x19f4   :  { %v3798_v33 = vpop.f32.mrf.mxu0 }
0x19f5   :  { %v3802_v39 = vsel %vm927_vm4, %v3798_v33, -inf }
0x19f6   :  { %v5042_v3 = vpop.f32.mrf.mxu0  ;;  %3803 = vmax.xlane.f32.xlu1 %v3802_v39 }
0x1a07   :  { %3483 = vrot.lane.b32.xlu1 %v5867_v44, %s5285_s2 }
0x1a73   :  { %v3309_v5 = vpop.xlane.xlu1 %3308 }
0x1a74   :  { %v3310_v6 = vsub.f32 %v3303_v51, %v3309_v5 }
0x1a76   :  { %v3311_v7 = vmul.f32 1.442695, %v3310_v6  ;;  %v4274_v6 = vsel %vm2062_vm9, %v5735_v2, -inf }
0x1a77   :  { %v3474_v16 = vpop.xlane.xlu0 %3473 }
0x1a78   :  { %5185 = vpow2.f32 %v3311_v7  ;;  %v3475_v22 = vsub.f32 %v3468_v57, %v3474_v16 }
0x1a7a   :  { %v3476_v63 = vmul.f32 1.442695, %v3475_v22  ;;  %v4271_v22 = vsel %vm2062_vm9, %v5740_v4, -inf }
0x1a7b   :  { %v3639_v14 = vpop.xlane.xlu0 %3638 }
0x1a7c   :  { %5187 = vpow2.f32 %v3476_v63  ;;  %v3640_v41 = vsub.f32 %v3633_v61, %v3639_v14 }
0x1a7e   :  { %v3641_v17 = vmul.f32 1.442695, %v3640_v41 }
0x1a7f   :  { %v3804_v19 = vpop.xlane.xlu1 %3803 }
0x1a80   :  { %v3805_v8 = vsub.f32 %v3798_v33, %v3804_v19 }
0x1a82   :  { %v3806_v42 = vmul.f32 1.442695, %v3805_v8 }
0x1a83   :  { %v3484_v29 = vpop.permute.xlu1 %3483 }
0x1a84   :  { %5189 = vpow2.f32 %v3806_v42 }
0x1a85   :  { %v5186_v9 = vpop.eup %5185  ;;  %5191 = vpow2.f32 %v3641_v17 }
0x1a86   :  { %v3313_v10 = vsel %vm927_vm4, %v5186_v9, 0.0 }
0x1a87   :  { %3314 = vadd.xlane.f32.xlu0 %v3313_v10 }
0x1a89   :  { %v5188_v34 = vpop.eup %5187 }
0x1a8a   :  { %v3478_v56 = vsel %vm927_vm4, %v5188_v34, 0.0 }
0x1a8b   :  { %3479 = vadd.xlane.f32.xlu1 %v3478_v56 }
0x1a91   :  { %v5190_v11 = vpop.eup %5189 }
0x1a92   :  { %v3808_v12 = vsel %vm927_vm4, %v5190_v11, 0.0  ;;  %v5192_v18 = vpop.eup %5191 }
0x1a93   :  { %3809 = vadd.xlane.f32.xlu1 %v3808_v12  ;;  %v3643_v20 = vsel %vm927_vm4, %v5192_v18, 0.0 }
0x1a9d   :  { %3318 = vrot.lane.b32.xlu0 %v5867_v44, %s5282_s11 }
0x1aa4   :  { %3648 = vrot.lane.b32.xlu1 %v5867_v44, %s5286_s16 }
0x1abc   :  { %3644 = vadd.xlane.f32.xlu0 %v3643_v20 }
0x1ac8   :  { %3923 = vmax.xlane.f32.xlu1 %v3922_v21 }
0x1acc   :  { %4038 = vmax.xlane.f32.xlu1 %v4037_v23 }
0x1ad0   :  { %4154 = vmax.xlane.f32.xlu1 %v4153_v25 }
0x1ad2   :  { %3813 = vrot.lane.b32.xlu0 %v5867_v44, %s5288_s18 }
0x1ad4   :  { %4157 = vmax.xlane.f32.xlu1 %v4156_v26 }
0x1af1   :  { %3920 = vmax.xlane.f32.xlu0 %v3919_v27 }
0x1af5   :  { %4035 = vmax.xlane.f32.xlu0 %v4034_v28 }
0x1b10   :  { %v3315_v31 = vpop.xlane.xlu0 %3314 }
0x1b11   :  { %5193 = vrcp.f32 %v3315_v31 }
0x1b14   :  { %v3319_v32 = vpop.permute.xlu0 %3318  ;;  %v3480_v36 = vpop.xlane.xlu1 %3479 }
0x1b15   :  { %5195 = vrcp.f32 %v3480_v36  ;;  %5014 = vmatpush3.msra.mxu1 %v3319_v32 }
0x1b16   :  { %5023 = vmatprep.subr.mxu1 %v5280_v0 }
0x1b1c   :  { %v3810_v38 = vpop.xlane.xlu1 %3809 }
0x1b1e   :  { %v5194_v37 = vpop.eup %5193 }
0x1b1f   :  { %v3317_v43 = vmul.f32 %v5194_v37, %v5186_v9 }
0x1b20   :  { %v3649_v58 = vpop.permute.xlu1 %3648 }
0x1b21   :  { %5016 = vmatmul.mubr.msk.f32.vlgmr.msra.gmra.mxu1 %vm927_vm4, %v3317_v43 }
0x1b22   :  { %v5196_v44 = vpop.eup %5195  ;;  %5024 = vmatpush3.msra.mxu1 %v3484_v29  ;;  %5025 = vmatprep.mubr.msk.f32.mxu1 %vm5281_vm0, %v5280_v0 }
0x1b23   :  { %5033 = vmatprep.subr.mxu1 %v5280_v0  ;;  %v3482_v45 = vmul.f32 %v5196_v44, %v5188_v34 }
0x1b25   :  { %5026 = vmatmul.mubr.msk.f32.vlgmr.msra.gmra.mxu1 %vm927_vm4, %v3482_v45 }
0x1b26   :  { %5034 = vmatpush3.msra.mxu1 %v3649_v58  ;;  %5035 = vmatprep.mubr.msk.f32.mxu1 %vm5281_vm0, %v5280_v0 }
0x1b27   :  { %5043 = vmatprep.subr.mxu1 %v5280_v0 }
0x1b45   :  { %v3645_v46 = vpop.xlane.xlu0 %3644 }
0x1b46   :  { %5197 = vrcp.f32 %v3645_v46 }
0x1b47   :  { %5199 = vrcp.f32 %v3810_v38 }
0x1b49   :  { %v3814_v49 = vpop.permute.xlu0 %3813 }
0x1b51   :  { %v3924_v15 = vpop.xlane.xlu1 %3923 }
0x1b52   :  { %v3926_v5 = vsub.f32 %v5735_v2, %v3924_v15 }
0x1b53   :  { %v5198_v30 = vpop.eup %5197 }
0x1b54   :  { %v3647_v47 = vmul.f32 %v5198_v30, %v5192_v18  ;;  %v5200_v48 = vpop.eup %5199  ;;  %v3929_v19 = vmul.f32 1.442695, %v3926_v5 }
0x1b55   :  { %v3812_v50 = vmul.f32 %v5200_v48, %v5190_v11 }
0x1b56   :  { %5036 = vmatmul.mubr.msk.f32.vlgmr.msra.gmra.mxu1 %vm927_vm4, %v3647_v47 }
0x1b57   :  { %5044 = vmatpush3.msra.mxu1 %v3814_v49  ;;  %5045 = vmatprep.mubr.msk.f32.mxu1 %vm5281_vm0, %v5280_v0  ;;  %v4039_v0 = vpop.xlane.xlu1 %4038 }
0x1b58   :  { %v4041_v9 = vsub.f32 %v5735_v2, %v4039_v0 }
0x1b5a   :  { %5046 = vmatmul.mubr.msk.f32.vlgmr.msra.gmra.mxu1 %vm927_vm4, %v3812_v50  ;;  %v4044_v56 = vmul.f32 1.442695, %v4041_v9 }
0x1b5b   :  { %v4155_v3 = vpop.xlane.xlu1 %4154 }
0x1b5c   :  { %v4159_v7 = vsub.f32 %v5740_v4, %v4155_v3 }
0x1b5e   :  { %v4161_v8 = vmul.f32 1.442695, %v4159_v7 }
0x1b5f   :  { %v4158_v34 = vpop.xlane.xlu1 %4157 }
0x1b60   :  { %v4160_v11 = vsub.f32 %v5735_v2, %v4158_v34 }
0x1b62   :  { %v4163_v12 = vmul.f32 1.442695, %v4160_v11 }
0x1b7a   :  { %v3921_v33 = vpop.xlane.xlu0 %3920 }
0x1b7b   :  { %v3925_v39 = vsub.f32 %v5740_v4, %v3921_v33 }
0x1b7d   :  { %v3927_v16 = vmul.f32 1.442695, %v3925_v39 }
0x1b7e   :  { %v4036_v63 = vpop.xlane.xlu0 %4035 }
0x1b7f   :  { %5201 = vpow2.f32 %v3927_v16  ;;  %v4040_v42 = vsub.f32 %v5740_v4, %v4036_v63 }
0x1b80   :  { %5203 = vpow2.f32 %v3929_v19 }
0x1b81   :  { %5205 = vpow2.f32 %v4161_v8  ;;  %v4042_v10 = vmul.f32 1.442695, %v4040_v42 }
0x1b83   :  { %5207 = vpow2.f32 %v4042_v10 }
0x1b84   :  { %5209 = vpow2.f32 %v4044_v56 }
0x1b85   :  { %5211 = vpow2.f32 %v4163_v12 }
0x1b8c   :  { %v5202_v14 = vpop.eup %5201 }
0x1b8d   :  { %v5958_v41 = vpop.eup %5203 }
0x1b8e   :  { %v5960_v17 = vpop.eup %5205 }
0x1b90   :  { %v5208_v18 = vpop.eup %5207 }
0x1b91   :  { %v5967_v20 = vpop.eup %5209 }
0x1b92   :  { %v5971_v21 = vpop.eup %5211 }
0x1be1   :  { %v5942_v51 = vpop.f32.mrf.mxu1 }
0x1be3   :  { %v5017_v53 = vpop.f32.mrf.mxu1 }
0x1be5   :  { %v3555_v54 = vpop.f32.mrf.mxu1 }
0x1be6   :  { %3890 = vrot.lane.b32.xlu1 %v3555_v54, %s5279_s25 }
0x1be7   :  { %v5027_v57 = vpop.f32.mrf.mxu1 }
0x1c16   :  { %v3720_v59 = vpop.f32.mrf.mxu1 }
0x1c17   :  { %3894 = vrot.lane.b32.xlu1 %v3720_v59, %s5289_s19 }
0x1c18   :  { %v5037_v60 = vpop.f32.mrf.mxu1 }
0x1c1a   :  { %v3885_v61 = vpop.f32.mrf.mxu1 }
0x1c1b   :  { %3898 = vrot.lane.b32.xlu0 %v3885_v61, %s5290_s20 }
0x1c1c   :  { %v5047_v62 = vpop.f32.mrf.mxu1 }
0x1c3a   :  { %4275 = vmax.xlane.f32.xlu0 %v4274_v6 }
0x1c3b   :  { %4272 = vmax.xlane.f32.xlu1 %v4271_v22 }
0x1c4c   :  { %3933 = vrot.lane.b32.xlu1 %v5202_v14, %s5291_s21 }
0x1c50   :  { %3935 = vrot.lane.b32.xlu1 %v5958_v41, %s5291_s21  ;;  %4167 = vrot.lane.b32.xlu0 %v5960_v17, %s5296_s27 }
0x1c54   :  { %4048 = vrot.lane.b32.xlu1 %v5208_v18, %s5295_s26 }
0x1c58   :  { %4050 = vrot.lane.b32.xlu1 %v5967_v20, %s5295_s26  ;;  %v3891_v23 = vpop.permute.xlu1 %3890 }
0x1c5c   :  { %4169 = vrot.lane.b32.xlu1 %v5971_v21, %s5296_s27 }
0x1c89   :  { %v3895_v25 = vpop.permute.xlu1 %3894 }
0x1c8d   :  { %v3899_v29 = vpop.permute.xlu0 %3898 }
0x1cc3   :  { %v4276_v36 = vpop.xlane.xlu0 %4275 }
0x1cc4   :  { %v4273_v26 = vpop.xlane.xlu1 %4272  ;;  %v4278_v30 = vsub.f32 %v5735_v2, %v4276_v36 }
0x1cc5   :  { %v4277_v27 = vsub.f32 %v5740_v4, %v4273_v26  ;;  %v3901_v4 = vsel %vm927_vm4, %v5942_v51, %v3891_v23 }
0x1cc6   :  { %v3902_v46 = vsel %vm308_vm3, %v3901_v4, %v3895_v25  ;;  %v4281_v48 = vmul.f32 1.442695, %v4278_v30 }
0x1cc7   :  { %v4279_v28 = vmul.f32 1.442695, %v4277_v27  ;;  %v4168_v44 = vpop.permute.xlu0 %4167  ;;  %v3903_v47 = vsel %vm930_vm5, %v3902_v46, %v3899_v29 }
0x1cc8   :  { %v3934_v31 = vpop.permute.xlu1 %3933  ;;  %v4173_v45 = vsel %vm927_vm4, %v4168_v44, 0.0  ;;  %v3904_v49 = vsel %vm69_vm1, %v3903_v47, 0.0 }
0x1cc9   :  { %5213 = vpow2.f32 %v4279_v28  ;;  %v3939_v32 = vsel %vm927_vm4, %v3934_v31, 0.0 }
0x1cca   :  { %3940 = vadd.xlane.f32.xlu0 %v3939_v32  ;;  %5215 = vpow2.f32 %v4281_v48  ;;  %v5251_v48 = vld [vmem:[#allocation2 + $0x70] sm:$0xff] }
0x1ccc   :  { %v3936_v37 = vpop.permute.xlu1 %3935 }
0x1ccd   :  { %v3942_v6 = vsel %vm927_vm4, %v3936_v37, 0.0 }
0x1cd0   :  { %v4049_v38 = vpop.permute.xlu1 %4048 }
0x1cd1   :  { %v4054_v43 = vsel %vm927_vm4, %v4049_v38, 0.0 }
0x1cd2   :  { %4055 = vadd.xlane.f32.xlu0 %v4054_v43 }
0x1cd4   :  { %v4051_v53 = vpop.permute.xlu1 %4050 }
0x1cd5   :  { %v4057_v7 = vsel %vm927_vm4, %v4051_v53, 0.0  ;;  %v5253_v53 = vld [vmem:[#allocation2 + $0x60] sm:$0xff] }
0x1cd6   :  { %v5979_v58 = vpop.eup %5213  ;;  %4174 = vadd.xlane.f32.xlu0 %v4173_v45 }
0x1cd7   :  { %4285 = vrot.lane.b32.xlu1 %v5979_v58, %s5297_s28  ;;  %v5989_v50 = vpop.eup %5215 }
0x1cd8   :  { %v4170_v54 = vpop.permute.xlu1 %4169 }
0x1cd9   :  { %v4176_v16 = vsel %vm927_vm4, %v4170_v54, 0.0 }
0x1cfb   :  { %3905 = vadd.xlane.f32.xlu1 %v3904_v49 }
0x1d0c   :  { %4287 = vrot.lane.b32.xlu1 %v5989_v50, %s5297_s28 }
0x1d49   :  { %v4286_v57 = vpop.permute.xlu1 %4285 }
0x1d4a   :  { %v4291_v51 = vsel %vm927_vm4, %v4286_v57, 0.0 }
0x1d4b   :  { %4292 = vadd.xlane.f32.xlu0 %v4291_v51 }
0x1d53   :  { %v3941_v59 = vpop.xlane.xlu0 %3940 }
0x1d54   :  { %5217 = vrcp.f32 %v3941_v59 }
0x1d5b   :  { %v4056_v2 = vpop.xlane.xlu0 %4055 }
0x1d5c   :  { %5219 = vrcp.f32 %v4056_v2 }
0x1d5f   :  { %v4175_v19 = vpop.xlane.xlu0 %4174 }
0x1d61   :  { %v5218_v60 = vpop.eup %5217 }
0x1d62   :  { %v3947_v61 = vmul.f32 %v5218_v60, %v5202_v14 }
0x1d64   :  { %3951 = vrot.lane.b32.xlu0 %v3947_v61, %s5291_s21 }
0x1d69   :  { %v5220_v62 = vpop.eup %5219 }
0x1d6a   :  { %v4062_v15 = vmul.f32 %v5220_v62, %v5208_v18 }
0x1d6c   :  { %4066 = vrot.lane.b32.xlu0 %v4062_v15, %s5295_s26 }
0x1d84   :  { %v3906_v0 = vpop.xlane.xlu1 %3905 }
0x1d85   :  { %v3907_v33 = vmul.f32 0.03125, %v3906_v0 }
0x1d87   :  { %v3908_v39 = vsub.f32 %v3903_v47, %v3907_v33 }
0x1d88   :  { %v4288_v22 = vpop.permute.xlu1 %4287 }
0x1d89   :  { %v3909_v3 = vmul.f32 %v3908_v39, %v3908_v39  ;;  %v4294_v63 = vsel %vm927_vm4, %v4288_v22, 0.0 }
0x1d8b   :  { %v3910_v5 = vsel %vm69_vm1, %v3909_v3, 0.0 }
0x1d8c   :  { %3911 = vadd.xlane.f32.xlu1 %v3910_v5 }
0x1d90   :  { %3943 = vadd.xlane.f32.xlu1 %v3942_v6 }
0x1d94   :  { %4058 = vadd.xlane.f32.xlu1 %v4057_v7 }
0x1d98   :  { %4177 = vadd.xlane.f32.xlu1 %v4176_v16 }
0x1d9c   :  { %4295 = vadd.xlane.f32.xlu1 %v4294_v63 }
0x1dd4   :  { %v4293_v8 = vpop.xlane.xlu0 %4292 }
0x1dd8   :  { %v3952_v42 = vpop.permute.xlu0 %3951 }
0x1dd9   :  { %5050 = vmatprep.mubr.msk.f32.mxu0 %vm927_vm4, %v3952_v42  ;;  %v5254_v42 = vld [vmem:[%s6064_s4] sm:$0xff] }
0x1dde   :  { %v4067_v9 = vpop.permute.xlu0 %4066 }
0x1ddf   :  { %5055 = vmatprep.mubr.msk.f32.mxu1 %vm927_vm4, %v4067_v9 }
0x1e15   :  { %v3912_v10 = vpop.xlane.xlu1 %3911 }
0x1e16   :  { %v3913_v34 = vmul.f32 0.03125, %v3912_v10 }
0x1e18   :  { %v3914_v56 = vadd.f32 1e-05, %v3913_v34 }
0x1e19   :  { %v3944_v11 = vpop.xlane.xlu1 %3943 }
0x1e1a   :  { %5221 = vrsqrt.f32 %v3914_v56 }
0x1e1b   :  { %5223 = vrcp.f32 %v3944_v11 }
0x1e1d   :  { %v4059_v12 = vpop.xlane.xlu1 %4058 }
0x1e1e   :  { %5225 = vrcp.f32 %v4059_v12 }
0x1e1f   :  { %5227 = vrcp.f32 %v4175_v19 }
0x1e20   :  { %5229 = vrcp.f32 %v4293_v8  ;;  %v2213_v8 = vsub.s32 3, %v5364_v13 }
0x1e21   :  { %v4178_v14 = vpop.xlane.xlu1 %4177 }
0x1e22   :  { %5231 = vrcp.f32 %v4178_v14  ;;  %v2214_v9 = vrot.slane %v5254_v42, %v2213_v8 }
0x1e24   :  { %v2293_v12 = vadd.f32 %v5732_v1, %v2214_v9  ;;  %v2288_v13 = vadd.f32 %v5737_v24, %v2214_v9 }
0x1e25   :  { %v4296_v27 = vpop.xlane.xlu1 %4295 }
0x1e26   :  { %5233 = vrcp.f32 %v4296_v27 }
0x1e27   :  { %v5222_v18 = vpop.eup %5221 }
0x1e28   :  { %v5224_v23 = vpop.eup %5223  ;;  %v3916_v25 = vmul.f32 %v5222_v18, %v3908_v39 }
0x1e29   :  { %v3948_v26 = vmul.f32 %v5224_v23, %v5958_v41 }
0x1e2a   :  { %v3917_v28 = vmul.f32 %v3916_v25, %v5661_v40 }
0x1e2b   :  { %v5226_v29 = vpop.eup %5225  ;;  %3953 = vrot.lane.b32.xlu1 %v3948_v26, %s5291_s21 }
0x1e2c   :  { %v3918_v31 = vadd.f32 %v3917_v28, %v5664_v52  ;;  %v4063_v32 = vmul.f32 %v5226_v29, %v5967_v20  ;;  %v5228_v36 = vpop.eup %5227 }
0x1e2d   :  { %v5230_v37 = vpop.eup %5229  ;;  %v4181_v41 = vmul.f32 %v5228_v36, %v5960_v17 }
0x1e2e   :  { %5048 = vmatprep.subr.mxu0 %v3918_v31  ;;  %4189 = vrot.lane.b32.xlu0 %v3918_v31, %s5298_s29  ;;  %v4299_v40 = vmul.f32 %v5230_v37, %v5979_v58  ;;  %v5250_v58 = vld [vmem:[#allocation2 + $0x78] sm:$0xff] }
0x1e2f   :  { %4068 = vrot.lane.b32.xlu1 %v4063_v32, %s5295_s26  ;;  %5049 = vmatpush3.msra.mxu0 %v3918_v31  ;;  %v5232_v52 = vpop.eup %5231 }
0x1e30   :  { %v4182_v20 = vmul.f32 %v5232_v52, %v5971_v21 }
0x1e32   :  { %4307 = vrot.lane.b32.xlu0 %v3918_v31, %s5282_s11 }
0x1e33   :  { %4185 = vrot.lane.b32.xlu1 %v4181_v41, %s5296_s27  ;;  %v5234_v38 = vpop.eup %5233 }
0x1e34   :  { %v4300_v43 = vmul.f32 %v5234_v38, %v5989_v50  ;;  %v5252_v50 = vld [vmem:[#allocation2 + $0x68] sm:$0xff] }
0x1e36   :  { %4303 = vrot.lane.b32.xlu0 %v4299_v40, %s5297_s28 }
0x1e37   :  { %4071 = vrot.lane.b32.xlu1 %v3918_v31, %s5299_s3 }
0x1e3b   :  { %4187 = vrot.lane.b32.xlu1 %v4182_v20, %s5296_s27 }
0x1e3f   :  { %4305 = vrot.lane.b32.xlu1 %v4300_v43, %s5297_s28 }
0x1e9d   :  { %v3954_v17 = vpop.permute.xlu1 %3953 }
0x1e9e   :  { %5051 = vmatmul.mubr.msk.f32.vlgmr.msra.gmra.mxu0 %vm927_vm4, %v3954_v17 }
0x1ea0   :  { %v4190_v44 = vpop.permute.xlu0 %4189 }
0x1ea1   :  { %v4069_v45 = vpop.permute.xlu1 %4068  ;;  %5058 = vmatprep.subr.mxu0 %v4190_v44 }
0x1ea2   :  { %5059 = vmatpush3.msra.mxu0 %v4190_v44 }
0x1ea3   :  { %5068 = vmatprep.subr.mxu0 %v5250_v58 }
0x1ea4   :  { %v4308_v46 = vpop.permute.xlu0 %4307 }
0x1ea5   :  { %v4186_v4 = vpop.permute.xlu1 %4185 }
0x1ea6   :  { %5060 = vmatprep.mubr.msk.f32.mxu0 %vm927_vm4, %v4186_v4 }
0x1ea8   :  { %v4304_v30 = vpop.permute.xlu0 %4303 }
0x1ea9   :  { %v4072_v21 = vpop.permute.xlu1 %4071 }
0x1eaa   :  { %5053 = vmatprep.subr.mxu1 %v4072_v21 }
0x1eab   :  { %5054 = vmatpush3.msra.mxu1 %v4072_v21 }
0x1eac   :  { %5056 = vmatmul.mubr.msk.f32.vlgmr.msra.gmra.mxu1 %vm927_vm4, %v4069_v45  ;;  %5063 = vmatprep.subr.mxu1 %v4308_v46 }
0x1ead   :  { %v4188_v47 = vpop.permute.xlu1 %4187  ;;  %5064 = vmatpush3.msra.mxu1 %v4308_v46  ;;  %5065 = vmatprep.mubr.msk.f32.mxu1 %vm927_vm4, %v4304_v30 }
0x1eae   :  { %5061 = vmatmul.mubr.msk.f32.vlgmr.msra.gmra.mxu0 %vm927_vm4, %v4188_v47 }
0x1eaf   :  { %5069 = vmatpush3.msra.mxu0 %v5250_v58 }
0x1eb0   :  { %5070 = vmatprep.subr.mxu0 %v5251_v48 }
0x1eb1   :  { %v4306_v49 = vpop.permute.xlu1 %4305  ;;  %5071 = vmatpush3.msra.mxu0 %v5251_v48 }
0x1eb2   :  { %5066 = vmatmul.mubr.msk.f32.vlgmr.msra.gmra.mxu1 %vm927_vm4, %v4306_v49  ;;  %5072 = vmatprep.subr.mxu0 %v5252_v50 }
0x1eb3   :  { %5073 = vmatpush3.msra.mxu0 %v5252_v50 }
0x1eb4   :  { %5074 = vmatprep.subr.mxu0 %v5253_v53 }
0x1eb5   :  { %5075 = vmatpush3.msra.mxu0 %v5253_v53 }
0x1f5e   :  { %v5052_v54 = vpop.f32.mrf.mxu0 }
0x1f60   :  { %v4025_v57 = vpop.f32.mrf.mxu0 }
0x1f6c   :  { %v5057_v51 = vpop.f32.mrf.mxu1 }
0x1f6d   :  { %4393 = vrot.lane.b32.xlu1 %v5057_v51, %s5279_s25 }
0x1f6e   :  { %v4144_v59 = vpop.f32.mrf.mxu1  ;;  %v5062_v2 = vpop.f32.mrf.mxu0 }
0x1f6f   :  { %4391 = vrot.lane.b32.xlu0 %v4144_v59, %s5279_s25  ;;  %s5300_s25 = smov 32  }
0x1f70   :  { %v4262_v60 = vpop.f32.mrf.mxu0 }
0x1f71   :  { %4401 = vrot.lane.b32.xlu1 %v5062_v2, %s5289_s19 }
0x1f72   :  { %v5067_v61 = vpop.f32.mrf.mxu1 }
0x1f73   :  { %4399 = vrot.lane.b32.xlu0 %v4262_v60, %s5289_s19 }
0x1f74   :  { %v4380_v62 = vpop.f32.mrf.mxu1 }
0x1f75   :  { %4409 = vrot.lane.b32.xlu1 %v5067_v61, %s5290_s20 }
0x1f77   :  { %4407 = vrot.lane.b32.xlu0 %v4380_v62, %s5290_s20 }
0x1fdf   :  { %v4394_v15 = vpop.permute.xlu1 %4393 }
0x1fe0   :  { %v4414_v6 = vsel %vm927_vm4, %v5052_v54, %v4394_v15 }
0x1fe1   :  { %v4392_v0 = vpop.permute.xlu0 %4391 }
0x1fe2   :  { %v4413_v3 = vsel %vm927_vm4, %v4025_v57, %v4392_v0 }
0x1fe3   :  { %v4402_v33 = vpop.permute.xlu1 %4401 }
0x1fe4   :  { %v4416_v22 = vsel %vm308_vm3, %v4414_v6, %v4402_v33 }
0x1fe5   :  { %v4400_v39 = vpop.permute.xlu0 %4399 }
0x1fe6   :  { %v4415_v7 = vsel %vm308_vm3, %v4413_v3, %v4400_v39 }
0x1fe7   :  { %v4410_v5 = vpop.permute.xlu1 %4409 }
0x1fe8   :  { %v4418_v19 = vsel %vm930_vm5, %v4416_v22, %v4410_v5 }
0x1fe9   :  { %v4408_v16 = vpop.permute.xlu0 %4407 }
0x1fea   :  { %v4417_v63 = vsel %vm930_vm5, %v4415_v7, %v4408_v16 }
0x1feb   :  { %5076 = vmatprep.mubr.msk.f32.mxu0 %vm69_vm1, %v4417_v63 }
0x1fec   :  { %5077 = vmatmul.mubr.msk.f32.vlgmr.msra.gmra.mxu0 %vm69_vm1, %v4418_v19 }
0x20ac   :  { %v5078_v10 = vpop.f32.mrf.mxu0 }
0x20ad   :  { %v4497_v34 = vadd.f32 %v5078_v10, %v2214_v9 }
0x20ae   :  { %v4491_v56 = vpop.f32.mrf.mxu0 }
0x20af   :  { %v4492_v11 = vadd.f32 %v4491_v56, %v2214_v9  ;;  %4504 = vrot.lane.b32.xlu1 %v4497_v34, %s5300_s25 }
0x20b1   :  { %4502 = vrot.lane.b32.xlu0 %v4492_v11, %s5300_s25 }
0x20b5   :  { %4513 = vrot.lane.b32.xlu0 %v5860_v35, %s5300_s25 }
0x2121   :  { %v4505_v14 = vpop.permute.xlu1 %4504 }
0x2122   :  { %v4509_v18 = vsel %vm69_vm1, %v2293_v12, %v4505_v14 }
0x2123   :  { %4512 = vst.msk [vmem:[%s6065_s5 + $0x8] sm:$0xff] %vm4510_vm10, %v4509_v18  ;;  %v4503_v23 = vpop.permute.xlu0 %4502 }
0x2124   :  { %v4508_v25 = vsel %vm69_vm1, %v2288_v13, %v4503_v23 }
0x2125   :  { %4511 = vst.msk [vmem:[%s6065_s5] sm:$0xff] %vm4510_vm10, %v4508_v25 }
0x2127   :  { %v4514_v35 = vpop.permute.xlu0 %4513 }
0x2128   :  { %v4516_v1 = vsel %vm69_vm1, %v5506_v55, %v4514_v35 }
0x2129   :  { %4517 = vst.msk [vmem:[%s6066_s6] sm:$0xff] %vm4510_vm10, %v4516_v1 }
0x212a   :  { %4526 = vsyncpa [#allocation3], 1 }

</bundles_post_ra>
